<compile_context>
chip_gen: v5e
topology: v5e:2x2
jax: 0.10.0
libtpu: 0.0.40
codegen_flags: <defaults>
</compile_context>

<pallas_src>
import jax
import jax.numpy as jnp
from jax.experimental import pallas as pl
from jax.experimental.pallas import tpu as pltpu

EMBEDDING_DIM = 12
HIDDEN_DIM = 12
MAX_CHARS = 16


# --------------------------------------------------------------------------
# Fused kernel: char LSTM (batched over words) -> word LSTM -> tag head
# --------------------------------------------------------------------------
def fused_tagger_kernel(len_ref,        # (W, 1)  int32, valid chars per word
                        cemb_ref,       # (MC, W, D) f32, time-major char embs
                        wemb_ref,       # (W, D)  f32, word embeddings
                        cw_ref,         # (2D, 4D) f32, char LSTM fused weights
                        cb_ref,         # (1, 4D) f32, char LSTM fused bias
                        ww_ref,         # (2D+H, 4H) f32, word LSTM fused W
                        wb_ref,         # (1, 4H) f32, word LSTM fused bias
                        tw_ref,         # (H, C) f32, hidden2tag weight^T
                        tb_ref,         # (1, C) f32, hidden2tag bias
                        out_ref):       # (W, C) f32, log-probs
    MC, W, D = cemb_ref.shape
    Hc = cw_ref.shape[1] // 4           # char LSTM hidden (= D)
    H = ww_ref.shape[1] // 4            # word LSTM hidden

    # ---- character LSTM, batched over all words, fully unrolled over MC ----
    cw = cw_ref[...]
    cb = cb_ref[...]
    lens = len_ref[...]                 # (W, 1) int32

    h = jnp.zeros((W, Hc), jnp.float32)
    c = jnp.zeros((W, Hc), jnp.float32)
    for t in range(MC):                 # static unroll, static indices
        x_t = cemb_ref[t]               # (W, D)
        gates = jnp.dot(jnp.concatenate([x_t, h], axis=1), cw,
                        preferred_element_type=jnp.float32) + cb
        i = jax.nn.sigmoid(gates[:, 0:Hc])
        f = jax.nn.sigmoid(gates[:, Hc:2 * Hc])
        g = jnp.tanh(gates[:, 2 * Hc:3 * Hc])
        o = jax.nn.sigmoid(gates[:, 3 * Hc:4 * Hc])
        c_new = f * c + i * g
        h_new = o * jnp.tanh(c_new)
        valid = lens > t                # (W, 1) bool, freezes padded steps
        h = jnp.where(valid, h_new, h)
        c = jnp.where(valid, c_new, c)
    char_repr = h                       # (W, Hc) = last valid hidden per word

    # ---- word LSTM over the sentence (batch 1), fully unrolled over W ----
    concat = jnp.concatenate([wemb_ref[...], char_repr], axis=1)  # (W, 2D)
    ww = ww_ref[...]
    wb = wb_ref[...]

    wh = jnp.zeros((1, H), jnp.float32)
    wc = jnp.zeros((1, H), jnp.float32)
    hidden_rows = []
    for t in range(W):
        x_t = concat[t:t + 1, :]        # (1, 2D), static slice
        gates = jnp.dot(jnp.concatenate([x_t, wh], axis=1), ww,
                        preferred_element_type=jnp.float32) + wb
        i = jax.nn.sigmoid(gates[:, 0:H])
        f = jax.nn.sigmoid(gates[:, H:2 * H])
        g = jnp.tanh(gates[:, 2 * H:3 * H])
        o = jax.nn.sigmoid(gates[:, 3 * H:4 * H])
        wc = f * wc + i * g
        wh = o * jnp.tanh(wc)
        hidden_rows.append(wh)
    lstm_out = jnp.concatenate(hidden_rows, axis=0)               # (W, H)

    # ---- tag head: Linear + log_softmax; single store at the end ----
    logits = jnp.dot(lstm_out, tw_ref[...],
                     preferred_element_type=jnp.float32) + tb_ref[...]
    m = jnp.max(logits, axis=-1, keepdims=True)
    e = jnp.exp(logits - m)
    lse = jnp.log(jnp.sum(e, axis=-1, keepdims=True)) + m
    out_ref[...] = logits - lse


# --------------------------------------------------------------------------
# Forward pass wrapper (embedding gathers + weight packing are JAX glue)
# --------------------------------------------------------------------------
def augmented_lstm_tagger_forward(params, word_idx, char_idx, char_len):
    W, MC = char_idx.shape
    D = params["word_emb"].shape[1]
    H = params["w_whh"].shape[1]
    C = params["tag_w"].shape[0]

    # embedding gathers (tiny tables, single XLA gathers)
    char_emb = jnp.take(params["char_emb"], char_idx.T, axis=0)   # (MC, W, D)
    word_emb = jnp.take(params["word_emb"], word_idx, axis=0)     # (W, D)

    # fused (i,f,g,o) gate weights: gates = [x, h] @ Wf + b   (PyTorch layout)
    cw = jnp.concatenate([params["c_wih"].T, params["c_whh"].T], axis=0)
    cb = (params["c_bih"] + params["c_bhh"]).reshape(1, 4 * D)
    ww = jnp.concatenate([params["w_wih"].T, params["w_whh"].T], axis=0)
    wb = (params["w_bih"] + params["w_bhh"]).reshape(1, 4 * H)
    tw = params["tag_w"].T                                        # (H, C)
    tb = params["tag_b"].reshape(1, C)

    lens = jnp.clip(char_len, 0, MC).astype(jnp.int32).reshape(W, 1)

    return pl.pallas_call(
        fused_tagger_kernel,
        out_shape=jax.ShapeDtypeStruct((W, C), jnp.float32),
        grid=(1,),
        in_specs=[
            pl.BlockSpec((W, 1), lambda i: (0, 0)),
            pl.BlockSpec((MC, W, D), lambda i: (0, 0, 0)),
            pl.BlockSpec((W, D), lambda i: (0, 0)),
            pl.BlockSpec((2 * D, 4 * D), lambda i: (0, 0)),
            pl.BlockSpec((1, 4 * D), lambda i: (0, 0)),
            pl.BlockSpec((2 * D + H, 4 * H), lambda i: (0, 0)),
            pl.BlockSpec((1, 4 * H), lambda i: (0, 0)),
            pl.BlockSpec((H, C), lambda i: (0, 0)),
            pl.BlockSpec((1, C), lambda i: (0, 0)),
        ],
        out_specs=pl.BlockSpec((W, C), lambda i: (0, 0)),
        compiler_params=pltpu.CompilerParams(
            dimension_semantics=("arbitrary",)),
    )(lens, char_emb, word_emb, cw, cb, ww, wb, tw, tb)


forward_jit = jax.jit(augmented_lstm_tagger_forward)


# --------------------------------------------------------------------------
# Pure-JAX reference (independent per-gate formulation, for validation)
# --------------------------------------------------------------------------
def _lstm_cell_ref(x, h, c, wih, whh, bih, bhh):
    H = whh.shape[1]
    gates = x @ wih.T + h @ whh.T + bih + bhh
    i = jax.nn.sigmoid(gates[:, 0:H])
    f = jax.nn.sigmoid(gates[:, H:2 * H])
    g = jnp.tanh(gates[:, 2 * H:3 * H])
    o = jax.nn.sigmoid(gates[:, 3 * H:4 * H])
    c = f * c + i * g
    h = o * jnp.tanh(c)
    return h, c


def forward_reference(params, word_idx, char_idx, char_len):
    W, MC = char_idx.shape
    D = params["word_emb"].shape[1]
    H = params["w_whh"].shape[1]
    reps = []
    for w in range(W):
        h = jnp.zeros((1, D), jnp.float32)
        c = jnp.zeros((1, D), jnp.float32)
        L = min(int(char_len[w]), MC)
        for t in range(L):
            x = params["char_emb"][char_idx[w, t]][None, :]
            h, c = _lstm_cell_ref(x, h, c, params["c_wih"], params["c_whh"],
                                  params["c_bih"], params["c_bhh"])
        reps.append(h)
    char_repr = jnp.concatenate(reps, axis=0)
    word_emb = params["word_emb"][word_idx]
    concat = jnp.concatenate([word_emb, char_repr], axis=1)
    h = jnp.zeros((1, H), jnp.float32)
    c = jnp.zeros((1, H), jnp.float32)
    outs = []
    for t in range(W):
        h, c = _lstm_cell_ref(concat[t:t + 1], h, c, params["w_wih"],
                              params["w_whh"], params["w_bih"],
                              params["w_bhh"])
        outs.append(h)
    lstm_out = jnp.concatenate(outs, axis=0)
    logits = lstm_out @ params["tag_w"].T + params["tag_b"]
    return jax.nn.log_softmax(logits, axis=-1)


# --------------------------------------------------------------------------
# Deterministic parameter init (PyTorch-like shapes)
# --------------------------------------------------------------------------
def init_params(key, embedding_dim, hidden_dim, vocab_size, charset_size,
                tagset_size):
    ks = jax.random.split(key, 12)
    k_lstm = 1.0 / jnp.sqrt(embedding_dim)
    k_word = 1.0 / jnp.sqrt(hidden_dim)
    k_tag = 1.0 / jnp.sqrt(hidden_dim)
    u = lambda k, shp, s: jax.random.uniform(k, shp, jnp.float32, -s, s)
    return {
        "char_emb": jax.random.normal(ks[0], (charset_size, embedding_dim),
                                      jnp.float32),
        "word_emb": jax.random.normal(ks[1], (vocab_size, embedding_dim),
                                      jnp.float32),
        # character LSTM: input=embedding_dim, hidden=embedding_dim
        "c_wih": u(ks[2], (4 * embedding_dim, embedding_dim), k_lstm),
        "c_whh": u(ks[3], (4 * embedding_dim, embedding_dim), k_lstm),
        "c_bih": u(ks[4], (4 * embedding_dim,), k_lstm),
        "c_bhh": u(ks[5], (4 * embedding_dim,), k_lstm),
        # word LSTM: input=2*embedding_dim, hidden=hidden_dim
        "w_wih": u(ks[6], (4 * hidden_dim, 2 * embedding_dim), k_word),
        "w_whh": u(ks[7], (4 * hidden_dim, hidden_dim), k_word),
        "w_bih": u(ks[8], (4 * hidden_dim,), k_word),
        "w_bhh": u(ks[9], (4 * hidden_dim,), k_word),
        # hidden2tag
        "tag_w": u(ks[10], (tagset_size, hidden_dim), k_tag),
        "tag_b": u(ks[11], (tagset_size,), k_tag),
    }


if __name__ == "__main__":
    # Build vocab / charset from the training data in the reference module.
    training_str_1 = "The dog ate the apple"
    training_str_2 = "Everybody read that book"
    tag_to_index = {"DET": 0, "NN": 1, "V": 2}

    word_to_index, char_to_index = {}, {}
    for s in (training_str_1, training_str_2):
        for w in s.split():
            word_to_index.setdefault(w, len(word_to_index))
            for ch in w:
                char_to_index.setdefault(ch, len(char_to_index))

    sentence = training_str_1.split()          # 5 words

    word_idx = jnp.array([word_to_index[w] for w in sentence], jnp.int32)
    char_len = jnp.array([min(len(w), MAX_CHARS) for w in sentence], jnp.int32)
    rows = []
    for w in sentence:
        ids = [char_to_index[c] for c in w[:MAX_CHARS]]
        ids += [0] * (MAX_CHARS - len(ids))
        rows.append(ids)
    char_idx = jnp.array(rows, jnp.int32)      # (W, MAX_CHARS)

    params = init_params(jax.random.PRNGKey(0), EMBEDDING_DIM, HIDDEN_DIM,
                         len(word_to_index), len(char_to_index),
                         len(tag_to_index))

    tag_scores = forward_jit(params, word_idx, char_idx, char_len)
    tag_scores = jax.block_until_ready(tag_scores)

    assert tag_scores.shape == (len(sentence), len(tag_to_index))
    # log_softmax rows must (numerically) sum to 1 after exp
    assert bool(jnp.all(jnp.abs(jnp.sum(jnp.exp(tag_scores), -1) - 1.0) < 1e-4))
    # compare against a pure-JAX reference (tolerant of MXU/XLA matmul modes)
    ref = forward_reference(params, word_idx, char_idx, char_len)
    assert bool(jnp.all(jnp.abs(tag_scores - ref) < 3e-2))
    print("KERNEL_OK")
</pallas_src>

<mosaic_0001>
module attributes {stable_mosaic.version = 11 : i64} {
  func.func @fused_tagger_kernel(%arg0: i32, %arg1: memref<5x1xi32, #tpu.memory_space<vmem>>, %arg2: memref<16x5x12xf32, #tpu.memory_space<vmem>>, %arg3: memref<5x12xf32, #tpu.memory_space<vmem>>, %arg4: memref<24x48xf32, #tpu.memory_space<vmem>>, %arg5: memref<1x48xf32, #tpu.memory_space<vmem>>, %arg6: memref<36x48xf32, #tpu.memory_space<vmem>>, %arg7: memref<1x48xf32, #tpu.memory_space<vmem>>, %arg8: memref<12x3xf32, #tpu.memory_space<vmem>>, %arg9: memref<1x3xf32, #tpu.memory_space<vmem>>, %arg10: memref<5x3xf32, #tpu.memory_space<vmem>>) attributes {dimension_semantics = [#tpu.dimension_semantics<arbitrary>], iteration_bounds = array<i64: 1>, scalar_prefetch = 0 : i64, scratch_operands = 0 : i64, tpu.core_type = #tpu.core_type<tc>, window_params = [{pipeline_mode = #tpu.pipeline_mode<synchronous>, transform_indices = @transform_0, window_bounds = array<i64: 5, 1>}, {pipeline_mode = #tpu.pipeline_mode<synchronous>, transform_indices = @transform_1, window_bounds = array<i64: 16, 5, 12>}, {pipeline_mode = #tpu.pipeline_mode<synchronous>, transform_indices = @transform_2, window_bounds = array<i64: 5, 12>}, {pipeline_mode = #tpu.pipeline_mode<synchronous>, transform_indices = @transform_3, window_bounds = array<i64: 24, 48>}, {pipeline_mode = #tpu.pipeline_mode<synchronous>, transform_indices = @transform_4, window_bounds = array<i64: 1, 48>}, {pipeline_mode = #tpu.pipeline_mode<synchronous>, transform_indices = @transform_5, window_bounds = array<i64: 36, 48>}, {pipeline_mode = #tpu.pipeline_mode<synchronous>, transform_indices = @transform_6, window_bounds = array<i64: 1, 48>}, {pipeline_mode = #tpu.pipeline_mode<synchronous>, transform_indices = @transform_7, window_bounds = array<i64: 12, 3>}, {pipeline_mode = #tpu.pipeline_mode<synchronous>, transform_indices = @transform_8, window_bounds = array<i64: 1, 3>}, {pipeline_mode = #tpu.pipeline_mode<synchronous>, transform_indices = @transform_9, window_bounds = array<i64: 5, 3>}]} {
    %c0 = arith.constant 0 : index
    %c0_0 = arith.constant 0 : index
    %0 = vector.load %arg4[%c0, %c0_0] : memref<24x48xf32, #tpu.memory_space<vmem>>, vector<24x48xf32>
    %c0_1 = arith.constant 0 : index
    %c0_2 = arith.constant 0 : index
    %1 = vector.load %arg5[%c0_1, %c0_2] : memref<1x48xf32, #tpu.memory_space<vmem>>, vector<1x48xf32>
    %c0_3 = arith.constant 0 : index
    %c0_4 = arith.constant 0 : index
    %2 = vector.load %arg1[%c0_3, %c0_4] : memref<5x1xi32, #tpu.memory_space<vmem>>, vector<5x1xi32>
    %cst = arith.constant 0.000000e+00 : f32
    %3 = vector.broadcast %cst : f32 to vector<5x12xf32>
    %cst_5 = arith.constant 0.000000e+00 : f32
    %4 = vector.broadcast %cst_5 : f32 to vector<5x12xf32>
    %c0_6 = arith.constant 0 : index
    %c0_7 = arith.constant 0 : index
    %c0_8 = arith.constant 0 : index
    %5 = vector.load %arg2[%c0_6, %c0_7, %c0_8] : memref<16x5x12xf32, #tpu.memory_space<vmem>>, vector<1x5x12xf32>
    %6 = vector.shape_cast %5 : vector<1x5x12xf32> to vector<5x12xf32>
    %7 = tpu.concatenate %6, %3 in 1 : vector<5x12xf32>, vector<5x12xf32> -> vector<5x24xf32>
    %cst_9 = arith.constant dense<0.000000e+00> : vector<5x48xf32>
    %8 = tpu.matmul %7, %0, %cst_9 {dimension_numbers = #tpu.dot_dimension_numbers<[1], [0], [0], [1], [0, 0, 1, 1], [], []>} : vector<5x24xf32>, vector<24x48xf32>, vector<5x48xf32> -> vector<5x48xf32>
    %9 = vector.broadcast %1 : vector<1x48xf32> to vector<5x48xf32>
    %10 = arith.addf %8, %9 : vector<5x48xf32>
    %11 = vector.extract_strided_slice %10 {offsets = [0, 0], sizes = [5, 12], strides = [1, 1]} : vector<5x48xf32> to vector<5x12xf32>
    %12 = arith.negf %11 : vector<5x12xf32>
    %13 = math.exp %12 : vector<5x12xf32>
    %cst_10 = arith.constant 1.000000e+00 : f32
    %14 = vector.broadcast %cst_10 : f32 to vector<5x12xf32>
    %15 = arith.addf %14, %13 : vector<5x12xf32>
    %16 = arith.divf %14, %15 : vector<5x12xf32>
    %17 = vector.extract_strided_slice %10 {offsets = [0, 12], sizes = [5, 12], strides = [1, 1]} : vector<5x48xf32> to vector<5x12xf32>
    %18 = arith.negf %17 : vector<5x12xf32>
    %19 = math.exp %18 : vector<5x12xf32>
    %cst_11 = arith.constant 1.000000e+00 : f32
    %20 = vector.broadcast %cst_11 : f32 to vector<5x12xf32>
    %21 = arith.addf %20, %19 : vector<5x12xf32>
    %22 = arith.divf %20, %21 : vector<5x12xf32>
    %23 = vector.extract_strided_slice %10 {offsets = [0, 24], sizes = [5, 12], strides = [1, 1]} : vector<5x48xf32> to vector<5x12xf32>
    %24 = math.tanh %23 : vector<5x12xf32>
    %25 = vector.extract_strided_slice %10 {offsets = [0, 36], sizes = [5, 12], strides = [1, 1]} : vector<5x48xf32> to vector<5x12xf32>
    %26 = arith.negf %25 : vector<5x12xf32>
    %27 = math.exp %26 : vector<5x12xf32>
    %cst_12 = arith.constant 1.000000e+00 : f32
    %28 = vector.broadcast %cst_12 : f32 to vector<5x12xf32>
    %29 = arith.addf %28, %27 : vector<5x12xf32>
    %30 = arith.divf %28, %29 : vector<5x12xf32>
    %31 = arith.mulf %22, %4 : vector<5x12xf32>
    %32 = arith.mulf %16, %24 : vector<5x12xf32>
    %33 = arith.addf %31, %32 : vector<5x12xf32>
    %34 = math.tanh %33 : vector<5x12xf32>
    %35 = arith.mulf %30, %34 : vector<5x12xf32>
    %c0_i32 = arith.constant 0 : i32
    %36 = vector.broadcast %c0_i32 : i32 to vector<5x1xi32>
    %37 = arith.cmpi sgt, %2, %36 : vector<5x1xi32>
    %38 = vector.shape_cast %37 : vector<5x1xi1> to vector<5x1xi1>
    %39 = vector.broadcast %38 : vector<5x1xi1> to vector<5x12xi1>
    %40 = arith.select %39, %35, %3 : vector<5x12xi1>, vector<5x12xf32>
    %41 = vector.shape_cast %37 : vector<5x1xi1> to vector<5x1xi1>
    %42 = vector.broadcast %41 : vector<5x1xi1> to vector<5x12xi1>
    %43 = arith.select %42, %33, %4 : vector<5x12xi1>, vector<5x12xf32>
    %c1 = arith.constant 1 : index
    %c0_13 = arith.constant 0 : index
    %c0_14 = arith.constant 0 : index
    %44 = vector.load %arg2[%c1, %c0_13, %c0_14] : memref<16x5x12xf32, #tpu.memory_space<vmem>>, vector<1x5x12xf32>
    %45 = vector.shape_cast %44 : vector<1x5x12xf32> to vector<5x12xf32>
    %46 = tpu.concatenate %45, %40 in 1 : vector<5x12xf32>, vector<5x12xf32> -> vector<5x24xf32>
    %cst_15 = arith.constant dense<0.000000e+00> : vector<5x48xf32>
    %47 = tpu.matmul %46, %0, %cst_15 {dimension_numbers = #tpu.dot_dimension_numbers<[1], [0], [0], [1], [0, 0, 1, 1], [], []>} : vector<5x24xf32>, vector<24x48xf32>, vector<5x48xf32> -> vector<5x48xf32>
    %48 = vector.broadcast %1 : vector<1x48xf32> to vector<5x48xf32>
    %49 = arith.addf %47, %48 : vector<5x48xf32>
    %50 = vector.extract_strided_slice %49 {offsets = [0, 0], sizes = [5, 12], strides = [1, 1]} : vector<5x48xf32> to vector<5x12xf32>
    %51 = arith.negf %50 : vector<5x12xf32>
    %52 = math.exp %51 : vector<5x12xf32>
    %cst_16 = arith.constant 1.000000e+00 : f32
    %53 = vector.broadcast %cst_16 : f32 to vector<5x12xf32>
    %54 = arith.addf %53, %52 : vector<5x12xf32>
    %55 = arith.divf %53, %54 : vector<5x12xf32>
    %56 = vector.extract_strided_slice %49 {offsets = [0, 12], sizes = [5, 12], strides = [1, 1]} : vector<5x48xf32> to vector<5x12xf32>
    %57 = arith.negf %56 : vector<5x12xf32>
    %58 = math.exp %57 : vector<5x12xf32>
    %cst_17 = arith.constant 1.000000e+00 : f32
    %59 = vector.broadcast %cst_17 : f32 to vector<5x12xf32>
    %60 = arith.addf %59, %58 : vector<5x12xf32>
    %61 = arith.divf %59, %60 : vector<5x12xf32>
    %62 = vector.extract_strided_slice %49 {offsets = [0, 24], sizes = [5, 12], strides = [1, 1]} : vector<5x48xf32> to vector<5x12xf32>
    %63 = math.tanh %62 : vector<5x12xf32>
    %64 = vector.extract_strided_slice %49 {offsets = [0, 36], sizes = [5, 12], strides = [1, 1]} : vector<5x48xf32> to vector<5x12xf32>
    %65 = arith.negf %64 : vector<5x12xf32>
    %66 = math.exp %65 : vector<5x12xf32>
    %cst_18 = arith.constant 1.000000e+00 : f32
    %67 = vector.broadcast %cst_18 : f32 to vector<5x12xf32>
    %68 = arith.addf %67, %66 : vector<5x12xf32>
    %69 = arith.divf %67, %68 : vector<5x12xf32>
    %70 = arith.mulf %61, %43 : vector<5x12xf32>
    %71 = arith.mulf %55, %63 : vector<5x12xf32>
    %72 = arith.addf %70, %71 : vector<5x12xf32>
    %73 = math.tanh %72 : vector<5x12xf32>
    %74 = arith.mulf %69, %73 : vector<5x12xf32>
    %c1_i32 = arith.constant 1 : i32
    %75 = vector.broadcast %c1_i32 : i32 to vector<5x1xi32>
    %76 = arith.cmpi sgt, %2, %75 : vector<5x1xi32>
    %77 = vector.shape_cast %76 : vector<5x1xi1> to vector<5x1xi1>
    %78 = vector.broadcast %77 : vector<5x1xi1> to vector<5x12xi1>
    %79 = arith.select %78, %74, %40 : vector<5x12xi1>, vector<5x12xf32>
    %80 = vector.shape_cast %76 : vector<5x1xi1> to vector<5x1xi1>
    %81 = vector.broadcast %80 : vector<5x1xi1> to vector<5x12xi1>
    %82 = arith.select %81, %72, %43 : vector<5x12xi1>, vector<5x12xf32>
    %c2 = arith.constant 2 : index
    %c0_19 = arith.constant 0 : index
    %c0_20 = arith.constant 0 : index
    %83 = vector.load %arg2[%c2, %c0_19, %c0_20] : memref<16x5x12xf32, #tpu.memory_space<vmem>>, vector<1x5x12xf32>
    %84 = vector.shape_cast %83 : vector<1x5x12xf32> to vector<5x12xf32>
    %85 = tpu.concatenate %84, %79 in 1 : vector<5x12xf32>, vector<5x12xf32> -> vector<5x24xf32>
    %cst_21 = arith.constant dense<0.000000e+00> : vector<5x48xf32>
    %86 = tpu.matmul %85, %0, %cst_21 {dimension_numbers = #tpu.dot_dimension_numbers<[1], [0], [0], [1], [0, 0, 1, 1], [], []>} : vector<5x24xf32>, vector<24x48xf32>, vector<5x48xf32> -> vector<5x48xf32>
    %87 = vector.broadcast %1 : vector<1x48xf32> to vector<5x48xf32>
    %88 = arith.addf %86, %87 : vector<5x48xf32>
    %89 = vector.extract_strided_slice %88 {offsets = [0, 0], sizes = [5, 12], strides = [1, 1]} : vector<5x48xf32> to vector<5x12xf32>
    %90 = arith.negf %89 : vector<5x12xf32>
    %91 = math.exp %90 : vector<5x12xf32>
    %cst_22 = arith.constant 1.000000e+00 : f32
    %92 = vector.broadcast %cst_22 : f32 to vector<5x12xf32>
    %93 = arith.addf %92, %91 : vector<5x12xf32>
    %94 = arith.divf %92, %93 : vector<5x12xf32>
    %95 = vector.extract_strided_slice %88 {offsets = [0, 12], sizes = [5, 12], strides = [1, 1]} : vector<5x48xf32> to vector<5x12xf32>
    %96 = arith.negf %95 : vector<5x12xf32>
    %97 = math.exp %96 : vector<5x12xf32>
    %cst_23 = arith.constant 1.000000e+00 : f32
    %98 = vector.broadcast %cst_23 : f32 to vector<5x12xf32>
    %99 = arith.addf %98, %97 : vector<5x12xf32>
    %100 = arith.divf %98, %99 : vector<5x12xf32>
    %101 = vector.extract_strided_slice %88 {offsets = [0, 24], sizes = [5, 12], strides = [1, 1]} : vector<5x48xf32> to vector<5x12xf32>
    %102 = math.tanh %101 : vector<5x12xf32>
    %103 = vector.extract_strided_slice %88 {offsets = [0, 36], sizes = [5, 12], strides = [1, 1]} : vector<5x48xf32> to vector<5x12xf32>
    %104 = arith.negf %103 : vector<5x12xf32>
    %105 = math.exp %104 : vector<5x12xf32>
    %cst_24 = arith.constant 1.000000e+00 : f32
    %106 = vector.broadcast %cst_24 : f32 to vector<5x12xf32>
    %107 = arith.addf %106, %105 : vector<5x12xf32>
    %108 = arith.divf %106, %107 : vector<5x12xf32>
    %109 = arith.mulf %100, %82 : vector<5x12xf32>
    %110 = arith.mulf %94, %102 : vector<5x12xf32>
    %111 = arith.addf %109, %110 : vector<5x12xf32>
    %112 = math.tanh %111 : vector<5x12xf32>
    %113 = arith.mulf %108, %112 : vector<5x12xf32>
    %c2_i32 = arith.constant 2 : i32
    %114 = vector.broadcast %c2_i32 : i32 to vector<5x1xi32>
    %115 = arith.cmpi sgt, %2, %114 : vector<5x1xi32>
    %116 = vector.shape_cast %115 : vector<5x1xi1> to vector<5x1xi1>
    %117 = vector.broadcast %116 : vector<5x1xi1> to vector<5x12xi1>
    %118 = arith.select %117, %113, %79 : vector<5x12xi1>, vector<5x12xf32>
    %119 = vector.shape_cast %115 : vector<5x1xi1> to vector<5x1xi1>
    %120 = vector.broadcast %119 : vector<5x1xi1> to vector<5x12xi1>
    %121 = arith.select %120, %111, %82 : vector<5x12xi1>, vector<5x12xf32>
    %c3 = arith.constant 3 : index
    %c0_25 = arith.constant 0 : index
    %c0_26 = arith.constant 0 : index
    %122 = vector.load %arg2[%c3, %c0_25, %c0_26] : memref<16x5x12xf32, #tpu.memory_space<vmem>>, vector<1x5x12xf32>
    %123 = vector.shape_cast %122 : vector<1x5x12xf32> to vector<5x12xf32>
    %124 = tpu.concatenate %123, %118 in 1 : vector<5x12xf32>, vector<5x12xf32> -> vector<5x24xf32>
    %cst_27 = arith.constant dense<0.000000e+00> : vector<5x48xf32>
    %125 = tpu.matmul %124, %0, %cst_27 {dimension_numbers = #tpu.dot_dimension_numbers<[1], [0], [0], [1], [0, 0, 1, 1], [], []>} : vector<5x24xf32>, vector<24x48xf32>, vector<5x48xf32> -> vector<5x48xf32>
    %126 = vector.broadcast %1 : vector<1x48xf32> to vector<5x48xf32>
    %127 = arith.addf %125, %126 : vector<5x48xf32>
    %128 = vector.extract_strided_slice %127 {offsets = [0, 0], sizes = [5, 12], strides = [1, 1]} : vector<5x48xf32> to vector<5x12xf32>
    %129 = arith.negf %128 : vector<5x12xf32>
    %130 = math.exp %129 : vector<5x12xf32>
    %cst_28 = arith.constant 1.000000e+00 : f32
    %131 = vector.broadcast %cst_28 : f32 to vector<5x12xf32>
    %132 = arith.addf %131, %130 : vector<5x12xf32>
    %133 = arith.divf %131, %132 : vector<5x12xf32>
    %134 = vector.extract_strided_slice %127 {offsets = [0, 12], sizes = [5, 12], strides = [1, 1]} : vector<5x48xf32> to vector<5x12xf32>
    %135 = arith.negf %134 : vector<5x12xf32>
    %136 = math.exp %135 : vector<5x12xf32>
    %cst_29 = arith.constant 1.000000e+00 : f32
    %137 = vector.broadcast %cst_29 : f32 to vector<5x12xf32>
    %138 = arith.addf %137, %136 : vector<5x12xf32>
    %139 = arith.divf %137, %138 : vector<5x12xf32>
    %140 = vector.extract_strided_slice %127 {offsets = [0, 24], sizes = [5, 12], strides = [1, 1]} : vector<5x48xf32> to vector<5x12xf32>
    %141 = math.tanh %140 : vector<5x12xf32>
    %142 = vector.extract_strided_slice %127 {offsets = [0, 36], sizes = [5, 12], strides = [1, 1]} : vector<5x48xf32> to vector<5x12xf32>
    %143 = arith.negf %142 : vector<5x12xf32>
    %144 = math.exp %143 : vector<5x12xf32>
    %cst_30 = arith.constant 1.000000e+00 : f32
    %145 = vector.broadcast %cst_30 : f32 to vector<5x12xf32>
    %146 = arith.addf %145, %144 : vector<5x12xf32>
    %147 = arith.divf %145, %146 : vector<5x12xf32>
    %148 = arith.mulf %139, %121 : vector<5x12xf32>
    %149 = arith.mulf %133, %141 : vector<5x12xf32>
    %150 = arith.addf %148, %149 : vector<5x12xf32>
    %151 = math.tanh %150 : vector<5x12xf32>
    %152 = arith.mulf %147, %151 : vector<5x12xf32>
    %c3_i32 = arith.constant 3 : i32
    %153 = vector.broadcast %c3_i32 : i32 to vector<5x1xi32>
    %154 = arith.cmpi sgt, %2, %153 : vector<5x1xi32>
    %155 = vector.shape_cast %154 : vector<5x1xi1> to vector<5x1xi1>
    %156 = vector.broadcast %155 : vector<5x1xi1> to vector<5x12xi1>
    %157 = arith.select %156, %152, %118 : vector<5x12xi1>, vector<5x12xf32>
    %158 = vector.shape_cast %154 : vector<5x1xi1> to vector<5x1xi1>
    %159 = vector.broadcast %158 : vector<5x1xi1> to vector<5x12xi1>
    %160 = arith.select %159, %150, %121 : vector<5x12xi1>, vector<5x12xf32>
    %c4 = arith.constant 4 : index
    %c0_31 = arith.constant 0 : index
    %c0_32 = arith.constant 0 : index
    %161 = vector.load %arg2[%c4, %c0_31, %c0_32] : memref<16x5x12xf32, #tpu.memory_space<vmem>>, vector<1x5x12xf32>
    %162 = vector.shape_cast %161 : vector<1x5x12xf32> to vector<5x12xf32>
    %163 = tpu.concatenate %162, %157 in 1 : vector<5x12xf32>, vector<5x12xf32> -> vector<5x24xf32>
    %cst_33 = arith.constant dense<0.000000e+00> : vector<5x48xf32>
    %164 = tpu.matmul %163, %0, %cst_33 {dimension_numbers = #tpu.dot_dimension_numbers<[1], [0], [0], [1], [0, 0, 1, 1], [], []>} : vector<5x24xf32>, vector<24x48xf32>, vector<5x48xf32> -> vector<5x48xf32>
    %165 = vector.broadcast %1 : vector<1x48xf32> to vector<5x48xf32>
    %166 = arith.addf %164, %165 : vector<5x48xf32>
    %167 = vector.extract_strided_slice %166 {offsets = [0, 0], sizes = [5, 12], strides = [1, 1]} : vector<5x48xf32> to vector<5x12xf32>
    %168 = arith.negf %167 : vector<5x12xf32>
    %169 = math.exp %168 : vector<5x12xf32>
    %cst_34 = arith.constant 1.000000e+00 : f32
    %170 = vector.broadcast %cst_34 : f32 to vector<5x12xf32>
    %171 = arith.addf %170, %169 : vector<5x12xf32>
    %172 = arith.divf %170, %171 : vector<5x12xf32>
    %173 = vector.extract_strided_slice %166 {offsets = [0, 12], sizes = [5, 12], strides = [1, 1]} : vector<5x48xf32> to vector<5x12xf32>
    %174 = arith.negf %173 : vector<5x12xf32>
    %175 = math.exp %174 : vector<5x12xf32>
    %cst_35 = arith.constant 1.000000e+00 : f32
    %176 = vector.broadcast %cst_35 : f32 to vector<5x12xf32>
    %177 = arith.addf %176, %175 : vector<5x12xf32>
    %178 = arith.divf %176, %177 : vector<5x12xf32>
    %179 = vector.extract_strided_slice %166 {offsets = [0, 24], sizes = [5, 12], strides = [1, 1]} : vector<5x48xf32> to vector<5x12xf32>
    %180 = math.tanh %179 : vector<5x12xf32>
    %181 = vector.extract_strided_slice %166 {offsets = [0, 36], sizes = [5, 12], strides = [1, 1]} : vector<5x48xf32> to vector<5x12xf32>
    %182 = arith.negf %181 : vector<5x12xf32>
    %183 = math.exp %182 : vector<5x12xf32>
    %cst_36 = arith.constant 1.000000e+00 : f32
    %184 = vector.broadcast %cst_36 : f32 to vector<5x12xf32>
    %185 = arith.addf %184, %183 : vector<5x12xf32>
    %186 = arith.divf %184, %185 : vector<5x12xf32>
    %187 = arith.mulf %178, %160 : vector<5x12xf32>
    %188 = arith.mulf %172, %180 : vector<5x12xf32>
    %189 = arith.addf %187, %188 : vector<5x12xf32>
    %190 = math.tanh %189 : vector<5x12xf32>
    %191 = arith.mulf %186, %190 : vector<5x12xf32>
    %c4_i32 = arith.constant 4 : i32
    %192 = vector.broadcast %c4_i32 : i32 to vector<5x1xi32>
    %193 = arith.cmpi sgt, %2, %192 : vector<5x1xi32>
    %194 = vector.shape_cast %193 : vector<5x1xi1> to vector<5x1xi1>
    %195 = vector.broadcast %194 : vector<5x1xi1> to vector<5x12xi1>
    %196 = arith.select %195, %191, %157 : vector<5x12xi1>, vector<5x12xf32>
    %197 = vector.shape_cast %193 : vector<5x1xi1> to vector<5x1xi1>
    %198 = vector.broadcast %197 : vector<5x1xi1> to vector<5x12xi1>
    %199 = arith.select %198, %189, %160 : vector<5x12xi1>, vector<5x12xf32>
    %c5 = arith.constant 5 : index
    %c0_37 = arith.constant 0 : index
    %c0_38 = arith.constant 0 : index
    %200 = vector.load %arg2[%c5, %c0_37, %c0_38] : memref<16x5x12xf32, #tpu.memory_space<vmem>>, vector<1x5x12xf32>
    %201 = vector.shape_cast %200 : vector<1x5x12xf32> to vector<5x12xf32>
    %202 = tpu.concatenate %201, %196 in 1 : vector<5x12xf32>, vector<5x12xf32> -> vector<5x24xf32>
    %cst_39 = arith.constant dense<0.000000e+00> : vector<5x48xf32>
    %203 = tpu.matmul %202, %0, %cst_39 {dimension_numbers = #tpu.dot_dimension_numbers<[1], [0], [0], [1], [0, 0, 1, 1], [], []>} : vector<5x24xf32>, vector<24x48xf32>, vector<5x48xf32> -> vector<5x48xf32>
    %204 = vector.broadcast %1 : vector<1x48xf32> to vector<5x48xf32>
    %205 = arith.addf %203, %204 : vector<5x48xf32>
    %206 = vector.extract_strided_slice %205 {offsets = [0, 0], sizes = [5, 12], strides = [1, 1]} : vector<5x48xf32> to vector<5x12xf32>
    %207 = arith.negf %206 : vector<5x12xf32>
    %208 = math.exp %207 : vector<5x12xf32>
    %cst_40 = arith.constant 1.000000e+00 : f32
    %209 = vector.broadcast %cst_40 : f32 to vector<5x12xf32>
    %210 = arith.addf %209, %208 : vector<5x12xf32>
    %211 = arith.divf %209, %210 : vector<5x12xf32>
    %212 = vector.extract_strided_slice %205 {offsets = [0, 12], sizes = [5, 12], strides = [1, 1]} : vector<5x48xf32> to vector<5x12xf32>
    %213 = arith.negf %212 : vector<5x12xf32>
    %214 = math.exp %213 : vector<5x12xf32>
    %cst_41 = arith.constant 1.000000e+00 : f32
    %215 = vector.broadcast %cst_41 : f32 to vector<5x12xf32>
    %216 = arith.addf %215, %214 : vector<5x12xf32>
    %217 = arith.divf %215, %216 : vector<5x12xf32>
    %218 = vector.extract_strided_slice %205 {offsets = [0, 24], sizes = [5, 12], strides = [1, 1]} : vector<5x48xf32> to vector<5x12xf32>
    %219 = math.tanh %218 : vector<5x12xf32>
    %220 = vector.extract_strided_slice %205 {offsets = [0, 36], sizes = [5, 12], strides = [1, 1]} : vector<5x48xf32> to vector<5x12xf32>
    %221 = arith.negf %220 : vector<5x12xf32>
    %222 = math.exp %221 : vector<5x12xf32>
    %cst_42 = arith.constant 1.000000e+00 : f32
    %223 = vector.broadcast %cst_42 : f32 to vector<5x12xf32>
    %224 = arith.addf %223, %222 : vector<5x12xf32>
    %225 = arith.divf %223, %224 : vector<5x12xf32>
    %226 = arith.mulf %217, %199 : vector<5x12xf32>
    %227 = arith.mulf %211, %219 : vector<5x12xf32>
    %228 = arith.addf %226, %227 : vector<5x12xf32>
    %229 = math.tanh %228 : vector<5x12xf32>
    %230 = arith.mulf %225, %229 : vector<5x12xf32>
    %c5_i32 = arith.constant 5 : i32
    %231 = vector.broadcast %c5_i32 : i32 to vector<5x1xi32>
    %232 = arith.cmpi sgt, %2, %231 : vector<5x1xi32>
    %233 = vector.shape_cast %232 : vector<5x1xi1> to vector<5x1xi1>
    %234 = vector.broadcast %233 : vector<5x1xi1> to vector<5x12xi1>
    %235 = arith.select %234, %230, %196 : vector<5x12xi1>, vector<5x12xf32>
    %236 = vector.shape_cast %232 : vector<5x1xi1> to vector<5x1xi1>
    %237 = vector.broadcast %236 : vector<5x1xi1> to vector<5x12xi1>
    %238 = arith.select %237, %228, %199 : vector<5x12xi1>, vector<5x12xf32>
    %c6 = arith.constant 6 : index
    %c0_43 = arith.constant 0 : index
    %c0_44 = arith.constant 0 : index
    %239 = vector.load %arg2[%c6, %c0_43, %c0_44] : memref<16x5x12xf32, #tpu.memory_space<vmem>>, vector<1x5x12xf32>
    %240 = vector.shape_cast %239 : vector<1x5x12xf32> to vector<5x12xf32>
    %241 = tpu.concatenate %240, %235 in 1 : vector<5x12xf32>, vector<5x12xf32> -> vector<5x24xf32>
    %cst_45 = arith.constant dense<0.000000e+00> : vector<5x48xf32>
    %242 = tpu.matmul %241, %0, %cst_45 {dimension_numbers = #tpu.dot_dimension_numbers<[1], [0], [0], [1], [0, 0, 1, 1], [], []>} : vector<5x24xf32>, vector<24x48xf32>, vector<5x48xf32> -> vector<5x48xf32>
    %243 = vector.broadcast %1 : vector<1x48xf32> to vector<5x48xf32>
    %244 = arith.addf %242, %243 : vector<5x48xf32>
    %245 = vector.extract_strided_slice %244 {offsets = [0, 0], sizes = [5, 12], strides = [1, 1]} : vector<5x48xf32> to vector<5x12xf32>
    %246 = arith.negf %245 : vector<5x12xf32>
    %247 = math.exp %246 : vector<5x12xf32>
    %cst_46 = arith.constant 1.000000e+00 : f32
    %248 = vector.broadcast %cst_46 : f32 to vector<5x12xf32>
    %249 = arith.addf %248, %247 : vector<5x12xf32>
    %250 = arith.divf %248, %249 : vector<5x12xf32>
    %251 = vector.extract_strided_slice %244 {offsets = [0, 12], sizes = [5, 12], strides = [1, 1]} : vector<5x48xf32> to vector<5x12xf32>
    %252 = arith.negf %251 : vector<5x12xf32>
    %253 = math.exp %252 : vector<5x12xf32>
    %cst_47 = arith.constant 1.000000e+00 : f32
    %254 = vector.broadcast %cst_47 : f32 to vector<5x12xf32>
    %255 = arith.addf %254, %253 : vector<5x12xf32>
    %256 = arith.divf %254, %255 : vector<5x12xf32>
    %257 = vector.extract_strided_slice %244 {offsets = [0, 24], sizes = [5, 12], strides = [1, 1]} : vector<5x48xf32> to vector<5x12xf32>
    %258 = math.tanh %257 : vector<5x12xf32>
    %259 = vector.extract_strided_slice %244 {offsets = [0, 36], sizes = [5, 12], strides = [1, 1]} : vector<5x48xf32> to vector<5x12xf32>
    %260 = arith.negf %259 : vector<5x12xf32>
    %261 = math.exp %260 : vector<5x12xf32>
    %cst_48 = arith.constant 1.000000e+00 : f32
    %262 = vector.broadcast %cst_48 : f32 to vector<5x12xf32>
    %263 = arith.addf %262, %261 : vector<5x12xf32>
    %264 = arith.divf %262, %263 : vector<5x12xf32>
    %265 = arith.mulf %256, %238 : vector<5x12xf32>
    %266 = arith.mulf %250, %258 : vector<5x12xf32>
    %267 = arith.addf %265, %266 : vector<5x12xf32>
    %268 = math.tanh %267 : vector<5x12xf32>
    %269 = arith.mulf %264, %268 : vector<5x12xf32>
    %c6_i32 = arith.constant 6 : i32
    %270 = vector.broadcast %c6_i32 : i32 to vector<5x1xi32>
    %271 = arith.cmpi sgt, %2, %270 : vector<5x1xi32>
    %272 = vector.shape_cast %271 : vector<5x1xi1> to vector<5x1xi1>
    %273 = vector.broadcast %272 : vector<5x1xi1> to vector<5x12xi1>
    %274 = arith.select %273, %269, %235 : vector<5x12xi1>, vector<5x12xf32>
    %275 = vector.shape_cast %271 : vector<5x1xi1> to vector<5x1xi1>
    %276 = vector.broadcast %275 : vector<5x1xi1> to vector<5x12xi1>
    %277 = arith.select %276, %267, %238 : vector<5x12xi1>, vector<5x12xf32>
    %c7 = arith.constant 7 : index
    %c0_49 = arith.constant 0 : index
    %c0_50 = arith.constant 0 : index
    %278 = vector.load %arg2[%c7, %c0_49, %c0_50] : memref<16x5x12xf32, #tpu.memory_space<vmem>>, vector<1x5x12xf32>
    %279 = vector.shape_cast %278 : vector<1x5x12xf32> to vector<5x12xf32>
    %280 = tpu.concatenate %279, %274 in 1 : vector<5x12xf32>, vector<5x12xf32> -> vector<5x24xf32>
    %cst_51 = arith.constant dense<0.000000e+00> : vector<5x48xf32>
    %281 = tpu.matmul %280, %0, %cst_51 {dimension_numbers = #tpu.dot_dimension_numbers<[1], [0], [0], [1], [0, 0, 1, 1], [], []>} : vector<5x24xf32>, vector<24x48xf32>, vector<5x48xf32> -> vector<5x48xf32>
    %282 = vector.broadcast %1 : vector<1x48xf32> to vector<5x48xf32>
    %283 = arith.addf %281, %282 : vector<5x48xf32>
    %284 = vector.extract_strided_slice %283 {offsets = [0, 0], sizes = [5, 12], strides = [1, 1]} : vector<5x48xf32> to vector<5x12xf32>
    %285 = arith.negf %284 : vector<5x12xf32>
    %286 = math.exp %285 : vector<5x12xf32>
    %cst_52 = arith.constant 1.000000e+00 : f32
    %287 = vector.broadcast %cst_52 : f32 to vector<5x12xf32>
    %288 = arith.addf %287, %286 : vector<5x12xf32>
    %289 = arith.divf %287, %288 : vector<5x12xf32>
    %290 = vector.extract_strided_slice %283 {offsets = [0, 12], sizes = [5, 12], strides = [1, 1]} : vector<5x48xf32> to vector<5x12xf32>
    %291 = arith.negf %290 : vector<5x12xf32>
    %292 = math.exp %291 : vector<5x12xf32>
    %cst_53 = arith.constant 1.000000e+00 : f32
    %293 = vector.broadcast %cst_53 : f32 to vector<5x12xf32>
    %294 = arith.addf %293, %292 : vector<5x12xf32>
    %295 = arith.divf %293, %294 : vector<5x12xf32>
    %296 = vector.extract_strided_slice %283 {offsets = [0, 24], sizes = [5, 12], strides = [1, 1]} : vector<5x48xf32> to vector<5x12xf32>
    %297 = math.tanh %296 : vector<5x12xf32>
    %298 = vector.extract_strided_slice %283 {offsets = [0, 36], sizes = [5, 12], strides = [1, 1]} : vector<5x48xf32> to vector<5x12xf32>
    %299 = arith.negf %298 : vector<5x12xf32>
    %300 = math.exp %299 : vector<5x12xf32>
    %cst_54 = arith.constant 1.000000e+00 : f32
    %301 = vector.broadcast %cst_54 : f32 to vector<5x12xf32>
    %302 = arith.addf %301, %300 : vector<5x12xf32>
    %303 = arith.divf %301, %302 : vector<5x12xf32>
    %304 = arith.mulf %295, %277 : vector<5x12xf32>
    %305 = arith.mulf %289, %297 : vector<5x12xf32>
    %306 = arith.addf %304, %305 : vector<5x12xf32>
    %307 = math.tanh %306 : vector<5x12xf32>
    %308 = arith.mulf %303, %307 : vector<5x12xf32>
    %c7_i32 = arith.constant 7 : i32
    %309 = vector.broadcast %c7_i32 : i32 to vector<5x1xi32>
    %310 = arith.cmpi sgt, %2, %309 : vector<5x1xi32>
    %311 = vector.shape_cast %310 : vector<5x1xi1> to vector<5x1xi1>
    %312 = vector.broadcast %311 : vector<5x1xi1> to vector<5x12xi1>
    %313 = arith.select %312, %308, %274 : vector<5x12xi1>, vector<5x12xf32>
    %314 = vector.shape_cast %310 : vector<5x1xi1> to vector<5x1xi1>
    %315 = vector.broadcast %314 : vector<5x1xi1> to vector<5x12xi1>
    %316 = arith.select %315, %306, %277 : vector<5x12xi1>, vector<5x12xf32>
    %c8 = arith.constant 8 : index
    %c0_55 = arith.constant 0 : index
    %c0_56 = arith.constant 0 : index
    %317 = vector.load %arg2[%c8, %c0_55, %c0_56] : memref<16x5x12xf32, #tpu.memory_space<vmem>>, vector<1x5x12xf32>
    %318 = vector.shape_cast %317 : vector<1x5x12xf32> to vector<5x12xf32>
    %319 = tpu.concatenate %318, %313 in 1 : vector<5x12xf32>, vector<5x12xf32> -> vector<5x24xf32>
    %cst_57 = arith.constant dense<0.000000e+00> : vector<5x48xf32>
    %320 = tpu.matmul %319, %0, %cst_57 {dimension_numbers = #tpu.dot_dimension_numbers<[1], [0], [0], [1], [0, 0, 1, 1], [], []>} : vector<5x24xf32>, vector<24x48xf32>, vector<5x48xf32> -> vector<5x48xf32>
    %321 = vector.broadcast %1 : vector<1x48xf32> to vector<5x48xf32>
    %322 = arith.addf %320, %321 : vector<5x48xf32>
    %323 = vector.extract_strided_slice %322 {offsets = [0, 0], sizes = [5, 12], strides = [1, 1]} : vector<5x48xf32> to vector<5x12xf32>
    %324 = arith.negf %323 : vector<5x12xf32>
    %325 = math.exp %324 : vector<5x12xf32>
    %cst_58 = arith.constant 1.000000e+00 : f32
    %326 = vector.broadcast %cst_58 : f32 to vector<5x12xf32>
    %327 = arith.addf %326, %325 : vector<5x12xf32>
    %328 = arith.divf %326, %327 : vector<5x12xf32>
    %329 = vector.extract_strided_slice %322 {offsets = [0, 12], sizes = [5, 12], strides = [1, 1]} : vector<5x48xf32> to vector<5x12xf32>
    %330 = arith.negf %329 : vector<5x12xf32>
    %331 = math.exp %330 : vector<5x12xf32>
    %cst_59 = arith.constant 1.000000e+00 : f32
    %332 = vector.broadcast %cst_59 : f32 to vector<5x12xf32>
    %333 = arith.addf %332, %331 : vector<5x12xf32>
    %334 = arith.divf %332, %333 : vector<5x12xf32>
    %335 = vector.extract_strided_slice %322 {offsets = [0, 24], sizes = [5, 12], strides = [1, 1]} : vector<5x48xf32> to vector<5x12xf32>
    %336 = math.tanh %335 : vector<5x12xf32>
    %337 = vector.extract_strided_slice %322 {offsets = [0, 36], sizes = [5, 12], strides = [1, 1]} : vector<5x48xf32> to vector<5x12xf32>
    %338 = arith.negf %337 : vector<5x12xf32>
    %339 = math.exp %338 : vector<5x12xf32>
    %cst_60 = arith.constant 1.000000e+00 : f32
    %340 = vector.broadcast %cst_60 : f32 to vector<5x12xf32>
    %341 = arith.addf %340, %339 : vector<5x12xf32>
    %342 = arith.divf %340, %341 : vector<5x12xf32>
    %343 = arith.mulf %334, %316 : vector<5x12xf32>
    %344 = arith.mulf %328, %336 : vector<5x12xf32>
    %345 = arith.addf %343, %344 : vector<5x12xf32>
    %346 = math.tanh %345 : vector<5x12xf32>
    %347 = arith.mulf %342, %346 : vector<5x12xf32>
    %c8_i32 = arith.constant 8 : i32
    %348 = vector.broadcast %c8_i32 : i32 to vector<5x1xi32>
    %349 = arith.cmpi sgt, %2, %348 : vector<5x1xi32>
    %350 = vector.shape_cast %349 : vector<5x1xi1> to vector<5x1xi1>
    %351 = vector.broadcast %350 : vector<5x1xi1> to vector<5x12xi1>
    %352 = arith.select %351, %347, %313 : vector<5x12xi1>, vector<5x12xf32>
    %353 = vector.shape_cast %349 : vector<5x1xi1> to vector<5x1xi1>
    %354 = vector.broadcast %353 : vector<5x1xi1> to vector<5x12xi1>
    %355 = arith.select %354, %345, %316 : vector<5x12xi1>, vector<5x12xf32>
    %c9 = arith.constant 9 : index
    %c0_61 = arith.constant 0 : index
    %c0_62 = arith.constant 0 : index
    %356 = vector.load %arg2[%c9, %c0_61, %c0_62] : memref<16x5x12xf32, #tpu.memory_space<vmem>>, vector<1x5x12xf32>
    %357 = vector.shape_cast %356 : vector<1x5x12xf32> to vector<5x12xf32>
    %358 = tpu.concatenate %357, %352 in 1 : vector<5x12xf32>, vector<5x12xf32> -> vector<5x24xf32>
    %cst_63 = arith.constant dense<0.000000e+00> : vector<5x48xf32>
    %359 = tpu.matmul %358, %0, %cst_63 {dimension_numbers = #tpu.dot_dimension_numbers<[1], [0], [0], [1], [0, 0, 1, 1], [], []>} : vector<5x24xf32>, vector<24x48xf32>, vector<5x48xf32> -> vector<5x48xf32>
    %360 = vector.broadcast %1 : vector<1x48xf32> to vector<5x48xf32>
    %361 = arith.addf %359, %360 : vector<5x48xf32>
    %362 = vector.extract_strided_slice %361 {offsets = [0, 0], sizes = [5, 12], strides = [1, 1]} : vector<5x48xf32> to vector<5x12xf32>
    %363 = arith.negf %362 : vector<5x12xf32>
    %364 = math.exp %363 : vector<5x12xf32>
    %cst_64 = arith.constant 1.000000e+00 : f32
    %365 = vector.broadcast %cst_64 : f32 to vector<5x12xf32>
    %366 = arith.addf %365, %364 : vector<5x12xf32>
    %367 = arith.divf %365, %366 : vector<5x12xf32>
    %368 = vector.extract_strided_slice %361 {offsets = [0, 12], sizes = [5, 12], strides = [1, 1]} : vector<5x48xf32> to vector<5x12xf32>
    %369 = arith.negf %368 : vector<5x12xf32>
    %370 = math.exp %369 : vector<5x12xf32>
    %cst_65 = arith.constant 1.000000e+00 : f32
    %371 = vector.broadcast %cst_65 : f32 to vector<5x12xf32>
    %372 = arith.addf %371, %370 : vector<5x12xf32>
    %373 = arith.divf %371, %372 : vector<5x12xf32>
    %374 = vector.extract_strided_slice %361 {offsets = [0, 24], sizes = [5, 12], strides = [1, 1]} : vector<5x48xf32> to vector<5x12xf32>
    %375 = math.tanh %374 : vector<5x12xf32>
    %376 = vector.extract_strided_slice %361 {offsets = [0, 36], sizes = [5, 12], strides = [1, 1]} : vector<5x48xf32> to vector<5x12xf32>
    %377 = arith.negf %376 : vector<5x12xf32>
    %378 = math.exp %377 : vector<5x12xf32>
    %cst_66 = arith.constant 1.000000e+00 : f32
    %379 = vector.broadcast %cst_66 : f32 to vector<5x12xf32>
    %380 = arith.addf %379, %378 : vector<5x12xf32>
    %381 = arith.divf %379, %380 : vector<5x12xf32>
    %382 = arith.mulf %373, %355 : vector<5x12xf32>
    %383 = arith.mulf %367, %375 : vector<5x12xf32>
    %384 = arith.addf %382, %383 : vector<5x12xf32>
    %385 = math.tanh %384 : vector<5x12xf32>
    %386 = arith.mulf %381, %385 : vector<5x12xf32>
    %c9_i32 = arith.constant 9 : i32
    %387 = vector.broadcast %c9_i32 : i32 to vector<5x1xi32>
    %388 = arith.cmpi sgt, %2, %387 : vector<5x1xi32>
    %389 = vector.shape_cast %388 : vector<5x1xi1> to vector<5x1xi1>
    %390 = vector.broadcast %389 : vector<5x1xi1> to vector<5x12xi1>
    %391 = arith.select %390, %386, %352 : vector<5x12xi1>, vector<5x12xf32>
    %392 = vector.shape_cast %388 : vector<5x1xi1> to vector<5x1xi1>
    %393 = vector.broadcast %392 : vector<5x1xi1> to vector<5x12xi1>
    %394 = arith.select %393, %384, %355 : vector<5x12xi1>, vector<5x12xf32>
    %c10 = arith.constant 10 : index
    %c0_67 = arith.constant 0 : index
    %c0_68 = arith.constant 0 : index
    %395 = vector.load %arg2[%c10, %c0_67, %c0_68] : memref<16x5x12xf32, #tpu.memory_space<vmem>>, vector<1x5x12xf32>
    %396 = vector.shape_cast %395 : vector<1x5x12xf32> to vector<5x12xf32>
    %397 = tpu.concatenate %396, %391 in 1 : vector<5x12xf32>, vector<5x12xf32> -> vector<5x24xf32>
    %cst_69 = arith.constant dense<0.000000e+00> : vector<5x48xf32>
    %398 = tpu.matmul %397, %0, %cst_69 {dimension_numbers = #tpu.dot_dimension_numbers<[1], [0], [0], [1], [0, 0, 1, 1], [], []>} : vector<5x24xf32>, vector<24x48xf32>, vector<5x48xf32> -> vector<5x48xf32>
    %399 = vector.broadcast %1 : vector<1x48xf32> to vector<5x48xf32>
    %400 = arith.addf %398, %399 : vector<5x48xf32>
    %401 = vector.extract_strided_slice %400 {offsets = [0, 0], sizes = [5, 12], strides = [1, 1]} : vector<5x48xf32> to vector<5x12xf32>
    %402 = arith.negf %401 : vector<5x12xf32>
    %403 = math.exp %402 : vector<5x12xf32>
    %cst_70 = arith.constant 1.000000e+00 : f32
    %404 = vector.broadcast %cst_70 : f32 to vector<5x12xf32>
    %405 = arith.addf %404, %403 : vector<5x12xf32>
    %406 = arith.divf %404, %405 : vector<5x12xf32>
    %407 = vector.extract_strided_slice %400 {offsets = [0, 12], sizes = [5, 12], strides = [1, 1]} : vector<5x48xf32> to vector<5x12xf32>
    %408 = arith.negf %407 : vector<5x12xf32>
    %409 = math.exp %408 : vector<5x12xf32>
    %cst_71 = arith.constant 1.000000e+00 : f32
    %410 = vector.broadcast %cst_71 : f32 to vector<5x12xf32>
    %411 = arith.addf %410, %409 : vector<5x12xf32>
    %412 = arith.divf %410, %411 : vector<5x12xf32>
    %413 = vector.extract_strided_slice %400 {offsets = [0, 24], sizes = [5, 12], strides = [1, 1]} : vector<5x48xf32> to vector<5x12xf32>
    %414 = math.tanh %413 : vector<5x12xf32>
    %415 = vector.extract_strided_slice %400 {offsets = [0, 36], sizes = [5, 12], strides = [1, 1]} : vector<5x48xf32> to vector<5x12xf32>
    %416 = arith.negf %415 : vector<5x12xf32>
    %417 = math.exp %416 : vector<5x12xf32>
    %cst_72 = arith.constant 1.000000e+00 : f32
    %418 = vector.broadcast %cst_72 : f32 to vector<5x12xf32>
    %419 = arith.addf %418, %417 : vector<5x12xf32>
    %420 = arith.divf %418, %419 : vector<5x12xf32>
    %421 = arith.mulf %412, %394 : vector<5x12xf32>
    %422 = arith.mulf %406, %414 : vector<5x12xf32>
    %423 = arith.addf %421, %422 : vector<5x12xf32>
    %424 = math.tanh %423 : vector<5x12xf32>
    %425 = arith.mulf %420, %424 : vector<5x12xf32>
    %c10_i32 = arith.constant 10 : i32
    %426 = vector.broadcast %c10_i32 : i32 to vector<5x1xi32>
    %427 = arith.cmpi sgt, %2, %426 : vector<5x1xi32>
    %428 = vector.shape_cast %427 : vector<5x1xi1> to vector<5x1xi1>
    %429 = vector.broadcast %428 : vector<5x1xi1> to vector<5x12xi1>
    %430 = arith.select %429, %425, %391 : vector<5x12xi1>, vector<5x12xf32>
    %431 = vector.shape_cast %427 : vector<5x1xi1> to vector<5x1xi1>
    %432 = vector.broadcast %431 : vector<5x1xi1> to vector<5x12xi1>
    %433 = arith.select %432, %423, %394 : vector<5x12xi1>, vector<5x12xf32>
    %c11 = arith.constant 11 : index
    %c0_73 = arith.constant 0 : index
    %c0_74 = arith.constant 0 : index
    %434 = vector.load %arg2[%c11, %c0_73, %c0_74] : memref<16x5x12xf32, #tpu.memory_space<vmem>>, vector<1x5x12xf32>
    %435 = vector.shape_cast %434 : vector<1x5x12xf32> to vector<5x12xf32>
    %436 = tpu.concatenate %435, %430 in 1 : vector<5x12xf32>, vector<5x12xf32> -> vector<5x24xf32>
    %cst_75 = arith.constant dense<0.000000e+00> : vector<5x48xf32>
    %437 = tpu.matmul %436, %0, %cst_75 {dimension_numbers = #tpu.dot_dimension_numbers<[1], [0], [0], [1], [0, 0, 1, 1], [], []>} : vector<5x24xf32>, vector<24x48xf32>, vector<5x48xf32> -> vector<5x48xf32>
    %438 = vector.broadcast %1 : vector<1x48xf32> to vector<5x48xf32>
    %439 = arith.addf %437, %438 : vector<5x48xf32>
    %440 = vector.extract_strided_slice %439 {offsets = [0, 0], sizes = [5, 12], strides = [1, 1]} : vector<5x48xf32> to vector<5x12xf32>
    %441 = arith.negf %440 : vector<5x12xf32>
    %442 = math.exp %441 : vector<5x12xf32>
    %cst_76 = arith.constant 1.000000e+00 : f32
    %443 = vector.broadcast %cst_76 : f32 to vector<5x12xf32>
    %444 = arith.addf %443, %442 : vector<5x12xf32>
    %445 = arith.divf %443, %444 : vector<5x12xf32>
    %446 = vector.extract_strided_slice %439 {offsets = [0, 12], sizes = [5, 12], strides = [1, 1]} : vector<5x48xf32> to vector<5x12xf32>
    %447 = arith.negf %446 : vector<5x12xf32>
    %448 = math.exp %447 : vector<5x12xf32>
    %cst_77 = arith.constant 1.000000e+00 : f32
    %449 = vector.broadcast %cst_77 : f32 to vector<5x12xf32>
    %450 = arith.addf %449, %448 : vector<5x12xf32>
    %451 = arith.divf %449, %450 : vector<5x12xf32>
    %452 = vector.extract_strided_slice %439 {offsets = [0, 24], sizes = [5, 12], strides = [1, 1]} : vector<5x48xf32> to vector<5x12xf32>
    %453 = math.tanh %452 : vector<5x12xf32>
    %454 = vector.extract_strided_slice %439 {offsets = [0, 36], sizes = [5, 12], strides = [1, 1]} : vector<5x48xf32> to vector<5x12xf32>
    %455 = arith.negf %454 : vector<5x12xf32>
    %456 = math.exp %455 : vector<5x12xf32>
    %cst_78 = arith.constant 1.000000e+00 : f32
    %457 = vector.broadcast %cst_78 : f32 to vector<5x12xf32>
    %458 = arith.addf %457, %456 : vector<5x12xf32>
    %459 = arith.divf %457, %458 : vector<5x12xf32>
    %460 = arith.mulf %451, %433 : vector<5x12xf32>
    %461 = arith.mulf %445, %453 : vector<5x12xf32>
    %462 = arith.addf %460, %461 : vector<5x12xf32>
    %463 = math.tanh %462 : vector<5x12xf32>
    %464 = arith.mulf %459, %463 : vector<5x12xf32>
    %c11_i32 = arith.constant 11 : i32
    %465 = vector.broadcast %c11_i32 : i32 to vector<5x1xi32>
    %466 = arith.cmpi sgt, %2, %465 : vector<5x1xi32>
    %467 = vector.shape_cast %466 : vector<5x1xi1> to vector<5x1xi1>
    %468 = vector.broadcast %467 : vector<5x1xi1> to vector<5x12xi1>
    %469 = arith.select %468, %464, %430 : vector<5x12xi1>, vector<5x12xf32>
    %470 = vector.shape_cast %466 : vector<5x1xi1> to vector<5x1xi1>
    %471 = vector.broadcast %470 : vector<5x1xi1> to vector<5x12xi1>
    %472 = arith.select %471, %462, %433 : vector<5x12xi1>, vector<5x12xf32>
    %c12 = arith.constant 12 : index
    %c0_79 = arith.constant 0 : index
    %c0_80 = arith.constant 0 : index
    %473 = vector.load %arg2[%c12, %c0_79, %c0_80] : memref<16x5x12xf32, #tpu.memory_space<vmem>>, vector<1x5x12xf32>
    %474 = vector.shape_cast %473 : vector<1x5x12xf32> to vector<5x12xf32>
    %475 = tpu.concatenate %474, %469 in 1 : vector<5x12xf32>, vector<5x12xf32> -> vector<5x24xf32>
    %cst_81 = arith.constant dense<0.000000e+00> : vector<5x48xf32>
    %476 = tpu.matmul %475, %0, %cst_81 {dimension_numbers = #tpu.dot_dimension_numbers<[1], [0], [0], [1], [0, 0, 1, 1], [], []>} : vector<5x24xf32>, vector<24x48xf32>, vector<5x48xf32> -> vector<5x48xf32>
    %477 = vector.broadcast %1 : vector<1x48xf32> to vector<5x48xf32>
    %478 = arith.addf %476, %477 : vector<5x48xf32>
    %479 = vector.extract_strided_slice %478 {offsets = [0, 0], sizes = [5, 12], strides = [1, 1]} : vector<5x48xf32> to vector<5x12xf32>
    %480 = arith.negf %479 : vector<5x12xf32>
    %481 = math.exp %480 : vector<5x12xf32>
    %cst_82 = arith.constant 1.000000e+00 : f32
    %482 = vector.broadcast %cst_82 : f32 to vector<5x12xf32>
    %483 = arith.addf %482, %481 : vector<5x12xf32>
    %484 = arith.divf %482, %483 : vector<5x12xf32>
    %485 = vector.extract_strided_slice %478 {offsets = [0, 12], sizes = [5, 12], strides = [1, 1]} : vector<5x48xf32> to vector<5x12xf32>
    %486 = arith.negf %485 : vector<5x12xf32>
    %487 = math.exp %486 : vector<5x12xf32>
    %cst_83 = arith.constant 1.000000e+00 : f32
    %488 = vector.broadcast %cst_83 : f32 to vector<5x12xf32>
    %489 = arith.addf %488, %487 : vector<5x12xf32>
    %490 = arith.divf %488, %489 : vector<5x12xf32>
    %491 = vector.extract_strided_slice %478 {offsets = [0, 24], sizes = [5, 12], strides = [1, 1]} : vector<5x48xf32> to vector<5x12xf32>
    %492 = math.tanh %491 : vector<5x12xf32>
    %493 = vector.extract_strided_slice %478 {offsets = [0, 36], sizes = [5, 12], strides = [1, 1]} : vector<5x48xf32> to vector<5x12xf32>
    %494 = arith.negf %493 : vector<5x12xf32>
    %495 = math.exp %494 : vector<5x12xf32>
    %cst_84 = arith.constant 1.000000e+00 : f32
    %496 = vector.broadcast %cst_84 : f32 to vector<5x12xf32>
    %497 = arith.addf %496, %495 : vector<5x12xf32>
    %498 = arith.divf %496, %497 : vector<5x12xf32>
    %499 = arith.mulf %490, %472 : vector<5x12xf32>
    %500 = arith.mulf %484, %492 : vector<5x12xf32>
    %501 = arith.addf %499, %500 : vector<5x12xf32>
    %502 = math.tanh %501 : vector<5x12xf32>
    %503 = arith.mulf %498, %502 : vector<5x12xf32>
    %c12_i32 = arith.constant 12 : i32
    %504 = vector.broadcast %c12_i32 : i32 to vector<5x1xi32>
    %505 = arith.cmpi sgt, %2, %504 : vector<5x1xi32>
    %506 = vector.shape_cast %505 : vector<5x1xi1> to vector<5x1xi1>
    %507 = vector.broadcast %506 : vector<5x1xi1> to vector<5x12xi1>
    %508 = arith.select %507, %503, %469 : vector<5x12xi1>, vector<5x12xf32>
    %509 = vector.shape_cast %505 : vector<5x1xi1> to vector<5x1xi1>
    %510 = vector.broadcast %509 : vector<5x1xi1> to vector<5x12xi1>
    %511 = arith.select %510, %501, %472 : vector<5x12xi1>, vector<5x12xf32>
    %c13 = arith.constant 13 : index
    %c0_85 = arith.constant 0 : index
    %c0_86 = arith.constant 0 : index
    %512 = vector.load %arg2[%c13, %c0_85, %c0_86] : memref<16x5x12xf32, #tpu.memory_space<vmem>>, vector<1x5x12xf32>
    %513 = vector.shape_cast %512 : vector<1x5x12xf32> to vector<5x12xf32>
    %514 = tpu.concatenate %513, %508 in 1 : vector<5x12xf32>, vector<5x12xf32> -> vector<5x24xf32>
    %cst_87 = arith.constant dense<0.000000e+00> : vector<5x48xf32>
    %515 = tpu.matmul %514, %0, %cst_87 {dimension_numbers = #tpu.dot_dimension_numbers<[1], [0], [0], [1], [0, 0, 1, 1], [], []>} : vector<5x24xf32>, vector<24x48xf32>, vector<5x48xf32> -> vector<5x48xf32>
    %516 = vector.broadcast %1 : vector<1x48xf32> to vector<5x48xf32>
    %517 = arith.addf %515, %516 : vector<5x48xf32>
    %518 = vector.extract_strided_slice %517 {offsets = [0, 0], sizes = [5, 12], strides = [1, 1]} : vector<5x48xf32> to vector<5x12xf32>
    %519 = arith.negf %518 : vector<5x12xf32>
    %520 = math.exp %519 : vector<5x12xf32>
    %cst_88 = arith.constant 1.000000e+00 : f32
    %521 = vector.broadcast %cst_88 : f32 to vector<5x12xf32>
    %522 = arith.addf %521, %520 : vector<5x12xf32>
    %523 = arith.divf %521, %522 : vector<5x12xf32>
    %524 = vector.extract_strided_slice %517 {offsets = [0, 12], sizes = [5, 12], strides = [1, 1]} : vector<5x48xf32> to vector<5x12xf32>
    %525 = arith.negf %524 : vector<5x12xf32>
    %526 = math.exp %525 : vector<5x12xf32>
    %cst_89 = arith.constant 1.000000e+00 : f32
    %527 = vector.broadcast %cst_89 : f32 to vector<5x12xf32>
    %528 = arith.addf %527, %526 : vector<5x12xf32>
    %529 = arith.divf %527, %528 : vector<5x12xf32>
    %530 = vector.extract_strided_slice %517 {offsets = [0, 24], sizes = [5, 12], strides = [1, 1]} : vector<5x48xf32> to vector<5x12xf32>
    %531 = math.tanh %530 : vector<5x12xf32>
    %532 = vector.extract_strided_slice %517 {offsets = [0, 36], sizes = [5, 12], strides = [1, 1]} : vector<5x48xf32> to vector<5x12xf32>
    %533 = arith.negf %532 : vector<5x12xf32>
    %534 = math.exp %533 : vector<5x12xf32>
    %cst_90 = arith.constant 1.000000e+00 : f32
    %535 = vector.broadcast %cst_90 : f32 to vector<5x12xf32>
    %536 = arith.addf %535, %534 : vector<5x12xf32>
    %537 = arith.divf %535, %536 : vector<5x12xf32>
    %538 = arith.mulf %529, %511 : vector<5x12xf32>
    %539 = arith.mulf %523, %531 : vector<5x12xf32>
    %540 = arith.addf %538, %539 : vector<5x12xf32>
    %541 = math.tanh %540 : vector<5x12xf32>
    %542 = arith.mulf %537, %541 : vector<5x12xf32>
    %c13_i32 = arith.constant 13 : i32
    %543 = vector.broadcast %c13_i32 : i32 to vector<5x1xi32>
    %544 = arith.cmpi sgt, %2, %543 : vector<5x1xi32>
    %545 = vector.shape_cast %544 : vector<5x1xi1> to vector<5x1xi1>
    %546 = vector.broadcast %545 : vector<5x1xi1> to vector<5x12xi1>
    %547 = arith.select %546, %542, %508 : vector<5x12xi1>, vector<5x12xf32>
    %548 = vector.shape_cast %544 : vector<5x1xi1> to vector<5x1xi1>
    %549 = vector.broadcast %548 : vector<5x1xi1> to vector<5x12xi1>
    %550 = arith.select %549, %540, %511 : vector<5x12xi1>, vector<5x12xf32>
    %c14 = arith.constant 14 : index
    %c0_91 = arith.constant 0 : index
    %c0_92 = arith.constant 0 : index
    %551 = vector.load %arg2[%c14, %c0_91, %c0_92] : memref<16x5x12xf32, #tpu.memory_space<vmem>>, vector<1x5x12xf32>
    %552 = vector.shape_cast %551 : vector<1x5x12xf32> to vector<5x12xf32>
    %553 = tpu.concatenate %552, %547 in 1 : vector<5x12xf32>, vector<5x12xf32> -> vector<5x24xf32>
    %cst_93 = arith.constant dense<0.000000e+00> : vector<5x48xf32>
    %554 = tpu.matmul %553, %0, %cst_93 {dimension_numbers = #tpu.dot_dimension_numbers<[1], [0], [0], [1], [0, 0, 1, 1], [], []>} : vector<5x24xf32>, vector<24x48xf32>, vector<5x48xf32> -> vector<5x48xf32>
    %555 = vector.broadcast %1 : vector<1x48xf32> to vector<5x48xf32>
    %556 = arith.addf %554, %555 : vector<5x48xf32>
    %557 = vector.extract_strided_slice %556 {offsets = [0, 0], sizes = [5, 12], strides = [1, 1]} : vector<5x48xf32> to vector<5x12xf32>
    %558 = arith.negf %557 : vector<5x12xf32>
    %559 = math.exp %558 : vector<5x12xf32>
    %cst_94 = arith.constant 1.000000e+00 : f32
    %560 = vector.broadcast %cst_94 : f32 to vector<5x12xf32>
    %561 = arith.addf %560, %559 : vector<5x12xf32>
    %562 = arith.divf %560, %561 : vector<5x12xf32>
    %563 = vector.extract_strided_slice %556 {offsets = [0, 12], sizes = [5, 12], strides = [1, 1]} : vector<5x48xf32> to vector<5x12xf32>
    %564 = arith.negf %563 : vector<5x12xf32>
    %565 = math.exp %564 : vector<5x12xf32>
    %cst_95 = arith.constant 1.000000e+00 : f32
    %566 = vector.broadcast %cst_95 : f32 to vector<5x12xf32>
    %567 = arith.addf %566, %565 : vector<5x12xf32>
    %568 = arith.divf %566, %567 : vector<5x12xf32>
    %569 = vector.extract_strided_slice %556 {offsets = [0, 24], sizes = [5, 12], strides = [1, 1]} : vector<5x48xf32> to vector<5x12xf32>
    %570 = math.tanh %569 : vector<5x12xf32>
    %571 = vector.extract_strided_slice %556 {offsets = [0, 36], sizes = [5, 12], strides = [1, 1]} : vector<5x48xf32> to vector<5x12xf32>
    %572 = arith.negf %571 : vector<5x12xf32>
    %573 = math.exp %572 : vector<5x12xf32>
    %cst_96 = arith.constant 1.000000e+00 : f32
    %574 = vector.broadcast %cst_96 : f32 to vector<5x12xf32>
    %575 = arith.addf %574, %573 : vector<5x12xf32>
    %576 = arith.divf %574, %575 : vector<5x12xf32>
    %577 = arith.mulf %568, %550 : vector<5x12xf32>
    %578 = arith.mulf %562, %570 : vector<5x12xf32>
    %579 = arith.addf %577, %578 : vector<5x12xf32>
    %580 = math.tanh %579 : vector<5x12xf32>
    %581 = arith.mulf %576, %580 : vector<5x12xf32>
    %c14_i32 = arith.constant 14 : i32
    %582 = vector.broadcast %c14_i32 : i32 to vector<5x1xi32>
    %583 = arith.cmpi sgt, %2, %582 : vector<5x1xi32>
    %584 = vector.shape_cast %583 : vector<5x1xi1> to vector<5x1xi1>
    %585 = vector.broadcast %584 : vector<5x1xi1> to vector<5x12xi1>
    %586 = arith.select %585, %581, %547 : vector<5x12xi1>, vector<5x12xf32>
    %587 = vector.shape_cast %583 : vector<5x1xi1> to vector<5x1xi1>
    %588 = vector.broadcast %587 : vector<5x1xi1> to vector<5x12xi1>
    %589 = arith.select %588, %579, %550 : vector<5x12xi1>, vector<5x12xf32>
    %c15 = arith.constant 15 : index
    %c0_97 = arith.constant 0 : index
    %c0_98 = arith.constant 0 : index
    %590 = vector.load %arg2[%c15, %c0_97, %c0_98] : memref<16x5x12xf32, #tpu.memory_space<vmem>>, vector<1x5x12xf32>
    %591 = vector.shape_cast %590 : vector<1x5x12xf32> to vector<5x12xf32>
    %592 = tpu.concatenate %591, %586 in 1 : vector<5x12xf32>, vector<5x12xf32> -> vector<5x24xf32>
    %cst_99 = arith.constant dense<0.000000e+00> : vector<5x48xf32>
    %593 = tpu.matmul %592, %0, %cst_99 {dimension_numbers = #tpu.dot_dimension_numbers<[1], [0], [0], [1], [0, 0, 1, 1], [], []>} : vector<5x24xf32>, vector<24x48xf32>, vector<5x48xf32> -> vector<5x48xf32>
    %594 = vector.broadcast %1 : vector<1x48xf32> to vector<5x48xf32>
    %595 = arith.addf %593, %594 : vector<5x48xf32>
    %596 = vector.extract_strided_slice %595 {offsets = [0, 0], sizes = [5, 12], strides = [1, 1]} : vector<5x48xf32> to vector<5x12xf32>
    %597 = arith.negf %596 : vector<5x12xf32>
    %598 = math.exp %597 : vector<5x12xf32>
    %cst_100 = arith.constant 1.000000e+00 : f32
    %599 = vector.broadcast %cst_100 : f32 to vector<5x12xf32>
    %600 = arith.addf %599, %598 : vector<5x12xf32>
    %601 = arith.divf %599, %600 : vector<5x12xf32>
    %602 = vector.extract_strided_slice %595 {offsets = [0, 12], sizes = [5, 12], strides = [1, 1]} : vector<5x48xf32> to vector<5x12xf32>
    %603 = arith.negf %602 : vector<5x12xf32>
    %604 = math.exp %603 : vector<5x12xf32>
    %cst_101 = arith.constant 1.000000e+00 : f32
    %605 = vector.broadcast %cst_101 : f32 to vector<5x12xf32>
    %606 = arith.addf %605, %604 : vector<5x12xf32>
    %607 = arith.divf %605, %606 : vector<5x12xf32>
    %608 = vector.extract_strided_slice %595 {offsets = [0, 24], sizes = [5, 12], strides = [1, 1]} : vector<5x48xf32> to vector<5x12xf32>
    %609 = math.tanh %608 : vector<5x12xf32>
    %610 = vector.extract_strided_slice %595 {offsets = [0, 36], sizes = [5, 12], strides = [1, 1]} : vector<5x48xf32> to vector<5x12xf32>
    %611 = arith.negf %610 : vector<5x12xf32>
    %612 = math.exp %611 : vector<5x12xf32>
    %cst_102 = arith.constant 1.000000e+00 : f32
    %613 = vector.broadcast %cst_102 : f32 to vector<5x12xf32>
    %614 = arith.addf %613, %612 : vector<5x12xf32>
    %615 = arith.divf %613, %614 : vector<5x12xf32>
    %616 = arith.mulf %607, %589 : vector<5x12xf32>
    %617 = arith.mulf %601, %609 : vector<5x12xf32>
    %618 = arith.addf %616, %617 : vector<5x12xf32>
    %619 = math.tanh %618 : vector<5x12xf32>
    %620 = arith.mulf %615, %619 : vector<5x12xf32>
    %c15_i32 = arith.constant 15 : i32
    %621 = vector.broadcast %c15_i32 : i32 to vector<5x1xi32>
    %622 = arith.cmpi sgt, %2, %621 : vector<5x1xi32>
    %623 = vector.shape_cast %622 : vector<5x1xi1> to vector<5x1xi1>
    %624 = vector.broadcast %623 : vector<5x1xi1> to vector<5x12xi1>
    %625 = arith.select %624, %620, %586 : vector<5x12xi1>, vector<5x12xf32>
    %c0_103 = arith.constant 0 : index
    %c0_104 = arith.constant 0 : index
    %626 = vector.load %arg3[%c0_103, %c0_104] : memref<5x12xf32, #tpu.memory_space<vmem>>, vector<5x12xf32>
    %627 = tpu.concatenate %626, %625 in 1 : vector<5x12xf32>, vector<5x12xf32> -> vector<5x24xf32>
    %c0_105 = arith.constant 0 : index
    %c0_106 = arith.constant 0 : index
    %628 = vector.load %arg6[%c0_105, %c0_106] : memref<36x48xf32, #tpu.memory_space<vmem>>, vector<36x48xf32>
    %c0_107 = arith.constant 0 : index
    %c0_108 = arith.constant 0 : index
    %629 = vector.load %arg7[%c0_107, %c0_108] : memref<1x48xf32, #tpu.memory_space<vmem>>, vector<1x48xf32>
    %cst_109 = arith.constant 0.000000e+00 : f32
    %630 = vector.broadcast %cst_109 : f32 to vector<1x12xf32>
    %cst_110 = arith.constant 0.000000e+00 : f32
    %631 = vector.broadcast %cst_110 : f32 to vector<1x12xf32>
    %632 = vector.extract_strided_slice %627 {offsets = [0, 0], sizes = [1, 24], strides = [1, 1]} : vector<5x24xf32> to vector<1x24xf32>
    %633 = tpu.concatenate %632, %630 in 1 : vector<1x24xf32>, vector<1x12xf32> -> vector<1x36xf32>
    %cst_111 = arith.constant dense<0.000000e+00> : vector<1x48xf32>
    %634 = tpu.matmul %633, %628, %cst_111 {dimension_numbers = #tpu.dot_dimension_numbers<[1], [0], [0], [1], [0, 0, 1, 1], [], []>} : vector<1x36xf32>, vector<36x48xf32>, vector<1x48xf32> -> vector<1x48xf32>
    %635 = arith.addf %634, %629 : vector<1x48xf32>
    %636 = vector.extract_strided_slice %635 {offsets = [0, 0], sizes = [1, 12], strides = [1, 1]} : vector<1x48xf32> to vector<1x12xf32>
    %637 = arith.negf %636 : vector<1x12xf32>
    %638 = math.exp %637 : vector<1x12xf32>
    %cst_112 = arith.constant 1.000000e+00 : f32
    %639 = vector.broadcast %cst_112 : f32 to vector<1x12xf32>
    %640 = arith.addf %639, %638 : vector<1x12xf32>
    %641 = arith.divf %639, %640 : vector<1x12xf32>
    %642 = vector.extract_strided_slice %635 {offsets = [0, 12], sizes = [1, 12], strides = [1, 1]} : vector<1x48xf32> to vector<1x12xf32>
    %643 = arith.negf %642 : vector<1x12xf32>
    %644 = math.exp %643 : vector<1x12xf32>
    %cst_113 = arith.constant 1.000000e+00 : f32
    %645 = vector.broadcast %cst_113 : f32 to vector<1x12xf32>
    %646 = arith.addf %645, %644 : vector<1x12xf32>
    %647 = arith.divf %645, %646 : vector<1x12xf32>
    %648 = vector.extract_strided_slice %635 {offsets = [0, 24], sizes = [1, 12], strides = [1, 1]} : vector<1x48xf32> to vector<1x12xf32>
    %649 = math.tanh %648 : vector<1x12xf32>
    %650 = vector.extract_strided_slice %635 {offsets = [0, 36], sizes = [1, 12], strides = [1, 1]} : vector<1x48xf32> to vector<1x12xf32>
    %651 = arith.negf %650 : vector<1x12xf32>
    %652 = math.exp %651 : vector<1x12xf32>
    %cst_114 = arith.constant 1.000000e+00 : f32
    %653 = vector.broadcast %cst_114 : f32 to vector<1x12xf32>
    %654 = arith.addf %653, %652 : vector<1x12xf32>
    %655 = arith.divf %653, %654 : vector<1x12xf32>
    %656 = arith.mulf %647, %631 : vector<1x12xf32>
    %657 = arith.mulf %641, %649 : vector<1x12xf32>
    %658 = arith.addf %656, %657 : vector<1x12xf32>
    %659 = math.tanh %658 : vector<1x12xf32>
    %660 = arith.mulf %655, %659 : vector<1x12xf32>
    %661 = vector.extract_strided_slice %627 {offsets = [1, 0], sizes = [1, 24], strides = [1, 1]} : vector<5x24xf32> to vector<1x24xf32>
    %662 = tpu.concatenate %661, %660 in 1 : vector<1x24xf32>, vector<1x12xf32> -> vector<1x36xf32>
    %cst_115 = arith.constant dense<0.000000e+00> : vector<1x48xf32>
    %663 = tpu.matmul %662, %628, %cst_115 {dimension_numbers = #tpu.dot_dimension_numbers<[1], [0], [0], [1], [0, 0, 1, 1], [], []>} : vector<1x36xf32>, vector<36x48xf32>, vector<1x48xf32> -> vector<1x48xf32>
    %664 = arith.addf %663, %629 : vector<1x48xf32>
    %665 = vector.extract_strided_slice %664 {offsets = [0, 0], sizes = [1, 12], strides = [1, 1]} : vector<1x48xf32> to vector<1x12xf32>
    %666 = arith.negf %665 : vector<1x12xf32>
    %667 = math.exp %666 : vector<1x12xf32>
    %cst_116 = arith.constant 1.000000e+00 : f32
    %668 = vector.broadcast %cst_116 : f32 to vector<1x12xf32>
    %669 = arith.addf %668, %667 : vector<1x12xf32>
    %670 = arith.divf %668, %669 : vector<1x12xf32>
    %671 = vector.extract_strided_slice %664 {offsets = [0, 12], sizes = [1, 12], strides = [1, 1]} : vector<1x48xf32> to vector<1x12xf32>
    %672 = arith.negf %671 : vector<1x12xf32>
    %673 = math.exp %672 : vector<1x12xf32>
    %cst_117 = arith.constant 1.000000e+00 : f32
    %674 = vector.broadcast %cst_117 : f32 to vector<1x12xf32>
    %675 = arith.addf %674, %673 : vector<1x12xf32>
    %676 = arith.divf %674, %675 : vector<1x12xf32>
    %677 = vector.extract_strided_slice %664 {offsets = [0, 24], sizes = [1, 12], strides = [1, 1]} : vector<1x48xf32> to vector<1x12xf32>
    %678 = math.tanh %677 : vector<1x12xf32>
    %679 = vector.extract_strided_slice %664 {offsets = [0, 36], sizes = [1, 12], strides = [1, 1]} : vector<1x48xf32> to vector<1x12xf32>
    %680 = arith.negf %679 : vector<1x12xf32>
    %681 = math.exp %680 : vector<1x12xf32>
    %cst_118 = arith.constant 1.000000e+00 : f32
    %682 = vector.broadcast %cst_118 : f32 to vector<1x12xf32>
    %683 = arith.addf %682, %681 : vector<1x12xf32>
    %684 = arith.divf %682, %683 : vector<1x12xf32>
    %685 = arith.mulf %676, %658 : vector<1x12xf32>
    %686 = arith.mulf %670, %678 : vector<1x12xf32>
    %687 = arith.addf %685, %686 : vector<1x12xf32>
    %688 = math.tanh %687 : vector<1x12xf32>
    %689 = arith.mulf %684, %688 : vector<1x12xf32>
    %690 = vector.extract_strided_slice %627 {offsets = [2, 0], sizes = [1, 24], strides = [1, 1]} : vector<5x24xf32> to vector<1x24xf32>
    %691 = tpu.concatenate %690, %689 in 1 : vector<1x24xf32>, vector<1x12xf32> -> vector<1x36xf32>
    %cst_119 = arith.constant dense<0.000000e+00> : vector<1x48xf32>
    %692 = tpu.matmul %691, %628, %cst_119 {dimension_numbers = #tpu.dot_dimension_numbers<[1], [0], [0], [1], [0, 0, 1, 1], [], []>} : vector<1x36xf32>, vector<36x48xf32>, vector<1x48xf32> -> vector<1x48xf32>
    %693 = arith.addf %692, %629 : vector<1x48xf32>
    %694 = vector.extract_strided_slice %693 {offsets = [0, 0], sizes = [1, 12], strides = [1, 1]} : vector<1x48xf32> to vector<1x12xf32>
    %695 = arith.negf %694 : vector<1x12xf32>
    %696 = math.exp %695 : vector<1x12xf32>
    %cst_120 = arith.constant 1.000000e+00 : f32
    %697 = vector.broadcast %cst_120 : f32 to vector<1x12xf32>
    %698 = arith.addf %697, %696 : vector<1x12xf32>
    %699 = arith.divf %697, %698 : vector<1x12xf32>
    %700 = vector.extract_strided_slice %693 {offsets = [0, 12], sizes = [1, 12], strides = [1, 1]} : vector<1x48xf32> to vector<1x12xf32>
    %701 = arith.negf %700 : vector<1x12xf32>
    %702 = math.exp %701 : vector<1x12xf32>
    %cst_121 = arith.constant 1.000000e+00 : f32
    %703 = vector.broadcast %cst_121 : f32 to vector<1x12xf32>
    %704 = arith.addf %703, %702 : vector<1x12xf32>
    %705 = arith.divf %703, %704 : vector<1x12xf32>
    %706 = vector.extract_strided_slice %693 {offsets = [0, 24], sizes = [1, 12], strides = [1, 1]} : vector<1x48xf32> to vector<1x12xf32>
    %707 = math.tanh %706 : vector<1x12xf32>
    %708 = vector.extract_strided_slice %693 {offsets = [0, 36], sizes = [1, 12], strides = [1, 1]} : vector<1x48xf32> to vector<1x12xf32>
    %709 = arith.negf %708 : vector<1x12xf32>
    %710 = math.exp %709 : vector<1x12xf32>
    %cst_122 = arith.constant 1.000000e+00 : f32
    %711 = vector.broadcast %cst_122 : f32 to vector<1x12xf32>
    %712 = arith.addf %711, %710 : vector<1x12xf32>
    %713 = arith.divf %711, %712 : vector<1x12xf32>
    %714 = arith.mulf %705, %687 : vector<1x12xf32>
    %715 = arith.mulf %699, %707 : vector<1x12xf32>
    %716 = arith.addf %714, %715 : vector<1x12xf32>
    %717 = math.tanh %716 : vector<1x12xf32>
    %718 = arith.mulf %713, %717 : vector<1x12xf32>
    %719 = vector.extract_strided_slice %627 {offsets = [3, 0], sizes = [1, 24], strides = [1, 1]} : vector<5x24xf32> to vector<1x24xf32>
    %720 = tpu.concatenate %719, %718 in 1 : vector<1x24xf32>, vector<1x12xf32> -> vector<1x36xf32>
    %cst_123 = arith.constant dense<0.000000e+00> : vector<1x48xf32>
    %721 = tpu.matmul %720, %628, %cst_123 {dimension_numbers = #tpu.dot_dimension_numbers<[1], [0], [0], [1], [0, 0, 1, 1], [], []>} : vector<1x36xf32>, vector<36x48xf32>, vector<1x48xf32> -> vector<1x48xf32>
    %722 = arith.addf %721, %629 : vector<1x48xf32>
    %723 = vector.extract_strided_slice %722 {offsets = [0, 0], sizes = [1, 12], strides = [1, 1]} : vector<1x48xf32> to vector<1x12xf32>
    %724 = arith.negf %723 : vector<1x12xf32>
    %725 = math.exp %724 : vector<1x12xf32>
    %cst_124 = arith.constant 1.000000e+00 : f32
    %726 = vector.broadcast %cst_124 : f32 to vector<1x12xf32>
    %727 = arith.addf %726, %725 : vector<1x12xf32>
    %728 = arith.divf %726, %727 : vector<1x12xf32>
    %729 = vector.extract_strided_slice %722 {offsets = [0, 12], sizes = [1, 12], strides = [1, 1]} : vector<1x48xf32> to vector<1x12xf32>
    %730 = arith.negf %729 : vector<1x12xf32>
    %731 = math.exp %730 : vector<1x12xf32>
    %cst_125 = arith.constant 1.000000e+00 : f32
    %732 = vector.broadcast %cst_125 : f32 to vector<1x12xf32>
    %733 = arith.addf %732, %731 : vector<1x12xf32>
    %734 = arith.divf %732, %733 : vector<1x12xf32>
    %735 = vector.extract_strided_slice %722 {offsets = [0, 24], sizes = [1, 12], strides = [1, 1]} : vector<1x48xf32> to vector<1x12xf32>
    %736 = math.tanh %735 : vector<1x12xf32>
    %737 = vector.extract_strided_slice %722 {offsets = [0, 36], sizes = [1, 12], strides = [1, 1]} : vector<1x48xf32> to vector<1x12xf32>
    %738 = arith.negf %737 : vector<1x12xf32>
    %739 = math.exp %738 : vector<1x12xf32>
    %cst_126 = arith.constant 1.000000e+00 : f32
    %740 = vector.broadcast %cst_126 : f32 to vector<1x12xf32>
    %741 = arith.addf %740, %739 : vector<1x12xf32>
    %742 = arith.divf %740, %741 : vector<1x12xf32>
    %743 = arith.mulf %734, %716 : vector<1x12xf32>
    %744 = arith.mulf %728, %736 : vector<1x12xf32>
    %745 = arith.addf %743, %744 : vector<1x12xf32>
    %746 = math.tanh %745 : vector<1x12xf32>
    %747 = arith.mulf %742, %746 : vector<1x12xf32>
    %748 = vector.extract_strided_slice %627 {offsets = [4, 0], sizes = [1, 24], strides = [1, 1]} : vector<5x24xf32> to vector<1x24xf32>
    %749 = tpu.concatenate %748, %747 in 1 : vector<1x24xf32>, vector<1x12xf32> -> vector<1x36xf32>
    %cst_127 = arith.constant dense<0.000000e+00> : vector<1x48xf32>
    %750 = tpu.matmul %749, %628, %cst_127 {dimension_numbers = #tpu.dot_dimension_numbers<[1], [0], [0], [1], [0, 0, 1, 1], [], []>} : vector<1x36xf32>, vector<36x48xf32>, vector<1x48xf32> -> vector<1x48xf32>
    %751 = arith.addf %750, %629 : vector<1x48xf32>
    %752 = vector.extract_strided_slice %751 {offsets = [0, 0], sizes = [1, 12], strides = [1, 1]} : vector<1x48xf32> to vector<1x12xf32>
    %753 = arith.negf %752 : vector<1x12xf32>
    %754 = math.exp %753 : vector<1x12xf32>
    %cst_128 = arith.constant 1.000000e+00 : f32
    %755 = vector.broadcast %cst_128 : f32 to vector<1x12xf32>
    %756 = arith.addf %755, %754 : vector<1x12xf32>
    %757 = arith.divf %755, %756 : vector<1x12xf32>
    %758 = vector.extract_strided_slice %751 {offsets = [0, 12], sizes = [1, 12], strides = [1, 1]} : vector<1x48xf32> to vector<1x12xf32>
    %759 = arith.negf %758 : vector<1x12xf32>
    %760 = math.exp %759 : vector<1x12xf32>
    %cst_129 = arith.constant 1.000000e+00 : f32
    %761 = vector.broadcast %cst_129 : f32 to vector<1x12xf32>
    %762 = arith.addf %761, %760 : vector<1x12xf32>
    %763 = arith.divf %761, %762 : vector<1x12xf32>
    %764 = vector.extract_strided_slice %751 {offsets = [0, 24], sizes = [1, 12], strides = [1, 1]} : vector<1x48xf32> to vector<1x12xf32>
    %765 = math.tanh %764 : vector<1x12xf32>
    %766 = vector.extract_strided_slice %751 {offsets = [0, 36], sizes = [1, 12], strides = [1, 1]} : vector<1x48xf32> to vector<1x12xf32>
    %767 = arith.negf %766 : vector<1x12xf32>
    %768 = math.exp %767 : vector<1x12xf32>
    %cst_130 = arith.constant 1.000000e+00 : f32
    %769 = vector.broadcast %cst_130 : f32 to vector<1x12xf32>
    %770 = arith.addf %769, %768 : vector<1x12xf32>
    %771 = arith.divf %769, %770 : vector<1x12xf32>
    %772 = arith.mulf %763, %745 : vector<1x12xf32>
    %773 = arith.mulf %757, %765 : vector<1x12xf32>
    %774 = arith.addf %772, %773 : vector<1x12xf32>
    %775 = math.tanh %774 : vector<1x12xf32>
    %776 = arith.mulf %771, %775 : vector<1x12xf32>
    %777 = tpu.concatenate %660, %689, %718, %747, %776 in 0 : vector<1x12xf32>, vector<1x12xf32>, vector<1x12xf32>, vector<1x12xf32>, vector<1x12xf32> -> vector<5x12xf32>
    %c0_131 = arith.constant 0 : index
    %c0_132 = arith.constant 0 : index
    %778 = vector.load %arg8[%c0_131, %c0_132] : memref<12x3xf32, #tpu.memory_space<vmem>>, vector<12x3xf32>
    %cst_133 = arith.constant dense<0.000000e+00> : vector<5x3xf32>
    %779 = tpu.matmul %777, %778, %cst_133 {dimension_numbers = #tpu.dot_dimension_numbers<[1], [0], [0], [1], [0, 0, 1, 1], [], []>} : vector<5x12xf32>, vector<12x3xf32>, vector<5x3xf32> -> vector<5x3xf32>
    %c0_134 = arith.constant 0 : index
    %c0_135 = arith.constant 0 : index
    %780 = vector.load %arg9[%c0_134, %c0_135] : memref<1x3xf32, #tpu.memory_space<vmem>>, vector<1x3xf32>
    %781 = vector.broadcast %780 : vector<1x3xf32> to vector<5x3xf32>
    %782 = arith.addf %779, %781 : vector<5x3xf32>
    %cst_136 = arith.constant dense<0xFF800000> : vector<5xf32>
    %783 = vector.multi_reduction <maximumf>, %782, %cst_136 [1] : vector<5x3xf32> to vector<5xf32>
    %784 = vector.shape_cast %783 : vector<5xf32> to vector<5x1xf32>
    %785 = vector.broadcast %784 : vector<5x1xf32> to vector<5x3xf32>
    %786 = arith.subf %782, %785 : vector<5x3xf32>
    %787 = math.exp %786 : vector<5x3xf32>
    %cst_137 = arith.constant dense<0.000000e+00> : vector<5xf32>
    %788 = vector.multi_reduction <add>, %787, %cst_137 [1] : vector<5x3xf32> to vector<5xf32>
    %789 = vector.shape_cast %788 : vector<5xf32> to vector<5x1xf32>
    %790 = math.log %789 : vector<5x1xf32>
    %791 = arith.addf %790, %784 : vector<5x1xf32>
    %792 = vector.broadcast %791 : vector<5x1xf32> to vector<5x3xf32>
    %793 = arith.subf %782, %792 : vector<5x3xf32>
    %c0_138 = arith.constant 0 : index
    %c0_139 = arith.constant 0 : index
    %794 = vector.load %arg10[%c0_138, %c0_139] : memref<5x3xf32, #tpu.memory_space<vmem>>, vector<5x3xf32>
    tpu.vector_store %arg10[%c0_138, %c0_139], %793 {strides = array<i32>} : memref<5x3xf32, #tpu.memory_space<vmem>>, vector<5x3xf32>,
    return
  }
  func.func @transform_0(%arg0: i32) -> (i32, i32) {
    %c0_i32 = arith.constant 0 : i32
    %c0_i32_0 = arith.constant 0 : i32
    %c0_i32_1 = arith.constant 0 : i32
    return %c0_i32, %c0_i32_0 : i32, i32
  }
  func.func @transform_1(%arg0: i32) -> (i32, i32, i32) {
    %c0_i32 = arith.constant 0 : i32
    %c0_i32_0 = arith.constant 0 : i32
    %c0_i32_1 = arith.constant 0 : i32
    %c0_i32_2 = arith.constant 0 : i32
    return %c0_i32, %c0_i32_0, %c0_i32_1 : i32, i32, i32
  }
  func.func @transform_2(%arg0: i32) -> (i32, i32) {
    %c0_i32 = arith.constant 0 : i32
    %c0_i32_0 = arith.constant 0 : i32
    %c0_i32_1 = arith.constant 0 : i32
    return %c0_i32, %c0_i32_0 : i32, i32
  }
  func.func @transform_3(%arg0: i32) -> (i32, i32) {
    %c0_i32 = arith.constant 0 : i32
    %c0_i32_0 = arith.constant 0 : i32
    %c0_i32_1 = arith.constant 0 : i32
    return %c0_i32, %c0_i32_0 : i32, i32
  }
  func.func @transform_4(%arg0: i32) -> (i32, i32) {
    %c0_i32 = arith.constant 0 : i32
    %c0_i32_0 = arith.constant 0 : i32
    %c0_i32_1 = arith.constant 0 : i32
    return %c0_i32, %c0_i32_0 : i32, i32
  }
  func.func @transform_5(%arg0: i32) -> (i32, i32) {
    %c0_i32 = arith.constant 0 : i32
    %c0_i32_0 = arith.constant 0 : i32
    %c0_i32_1 = arith.constant 0 : i32
    return %c0_i32, %c0_i32_0 : i32, i32
  }
  func.func @transform_6(%arg0: i32) -> (i32, i32) {
    %c0_i32 = arith.constant 0 : i32
    %c0_i32_0 = arith.constant 0 : i32
    %c0_i32_1 = arith.constant 0 : i32
    return %c0_i32, %c0_i32_0 : i32, i32
  }
  func.func @transform_7(%arg0: i32) -> (i32, i32) {
    %c0_i32 = arith.constant 0 : i32
    %c0_i32_0 = arith.constant 0 : i32
    %c0_i32_1 = arith.constant 0 : i32
    return %c0_i32, %c0_i32_0 : i32, i32
  }
  func.func @transform_8(%arg0: i32) -> (i32, i32) {
    %c0_i32 = arith.constant 0 : i32
    %c0_i32_0 = arith.constant 0 : i32
    %c0_i32_1 = arith.constant 0 : i32
    return %c0_i32, %c0_i32_0 : i32, i32
  }
  func.func @transform_9(%arg0: i32) -> (i32, i32) {
    %c0_i32 = arith.constant 0 : i32
    %c0_i32_0 = arith.constant 0 : i32
    %c0_i32_1 = arith.constant 0 : i32
    return %c0_i32, %c0_i32_0 : i32, i32
  }
}

</mosaic_0001>

<bundles_post_ra>
// kernel: augmented_lstm_tagger_forward.1
= control target key start
LH: loop header
LB: loop body
LE: loop exit
PB: predicated region body
PF: predicated region fallthrough
CT: control target
= control target key end

     0   :  { %vm38_vm0 = vcmask 97280   ;;  %vm43_vm1 = vcmask 195584   ;;  %s1900_s18 = smov 104   ;;  %s1901_s19 = smov 12   ;;  %v1902_v24 = vmov 0   ;;  %s2360_s3 = inlined_call_operand.vmem [shape: f32[24,48], index: 3, kind: input, shape index: {}]   ;;  %s2361_s1 = inlined_call_operand.vmem [shape: f32[16,5,12], index: 1, kind: input, shape index: {}]   ;;  %s2362_s4 = inlined_call_operand.vmem [shape: f32[1,48], index: 4, kind: input, shape index: {}]   ;;  %s2363_s0 = inlined_call_operand.vmem [shape: s32[5,1], index: 0, kind: input, shape index: {}]   ;;  %s2364_s5 = inlined_call_operand.vmem [shape: f32[36,48], index: 5, kind: input, shape index: {}]   ;;  %s2365_s2 = inlined_call_operand.vmem [shape: f32[5,12], index: 2, kind: input, shape index: {}]   ;;  %s2366_s6 = inlined_call_operand.vmem [shape: f32[1,48], index: 6, kind: input, shape index: {}]   ;;  %s2367_s7 = inlined_call_operand.vmem [shape: f32[12,3], index: 7, kind: input, shape index: {}]   ;;  %s2368_s8 = inlined_call_operand.vmem [shape: f32[1,3], index: 8, kind: input, shape index: {}]   ;;  %s2369_s9 = inlined_call_operand.vmem [shape: f32[5,3], index: 9, kind: output, shape index: {}]  }
   0x1   :  { %v1959_v0 = vld [vmem:[%s2360_s3 + $0x10] sm:$0xff]  ;;  %v1964_v1 = vld [vmem:[%s2360_s3 + $0x8] sm:$0xff]  ;;  %v37_v2 = vld [vmem:[%s2361_s1] sm:$0x1f]  ;;  %1721 = vset.pattern.permute.xlu1 %v1902_v24  ;;  %1722 = vset.pattern.permute.xlu2 %v1902_v24  ;;  %s1903_s22 = smov 24  }
   0x2   :  { %60 = vmatpush.msra.mxu2 %v1959_v0  ;;  %135 = vmatpush.msra.mxu1 %v1959_v0  ;;  %v1974_v3 = vld [vmem:[%s2360_s3] sm:$0xff]  ;;  %v39_v4 = vsel %vm38_vm0, %v37_v2, 0.0  ;;  %v1653_v35 = vld [vmem:[%s2361_s1 + $0x8] sm:$0x1f] }
   0x3   :  { %285 = vmatpush.msra.mxu3 %v1959_v0  ;;  %360 = vmatpush.msra.mxu0 %v1959_v0  ;;  %v2006_v5 = vld [vmem:[%s2362_s4] ss:$0 sm:$0xff] }
   0x4   :  { %61 = vmatpush.msra.mxu2 %v1964_v1  ;;  %136 = vmatpush.msra.mxu1 %v1964_v1  ;;  %v2017_v29 = vld [vmem:[%s2363_s0] sm:$0x1f] }
   0x5   :  { %286 = vmatpush.msra.mxu3 %v1964_v1  ;;  %361 = vmatpush.msra.mxu0 %v1964_v1  ;;  %vm104_vm6 = vcmp.gt.s32.totalorder %v2017_v29, 0  ;;  %vm179_vm8 = vcmp.gt.s32.totalorder %v2017_v29, 1  ;;  %vm254_vm14 = vcmp.gt.s32.totalorder %v2017_v29, 2 }
   0x6   :  { %62 = vmatpush.msra.mxu2 %v1974_v3  ;;  %137 = vmatpush.msra.mxu1 %v1974_v3  ;;  %v105_v30 = vsel %vm104_vm6, 1, %v1902_v24  ;;  %v180_v44 = vsel %vm179_vm8, 1, %v1902_v24  ;;  %vm329_vm6 = vcmp.gt.s32.totalorder %v2017_v29, 3 }
   0x7   :  { %1651 = vmatmul.msk.f32.vlgmr.msra.gmra.mxu2 %vm43_vm1, %v39_v4  ;;  %287 = vmatpush.msra.mxu3 %v1974_v3 }
   0x8   :  { %210 = vmatpush.msrb.mxu2 %v1959_v0  ;;  %362 = vmatpush.msra.mxu0 %v1974_v3 }
   0x9   :  { %435 = vmatpush.msrb.mxu1 %v1959_v0  ;;  %585 = vmatpush.msrb.mxu3 %v1959_v0 }
   0xa   :  { %211 = vmatpush.msrb.mxu2 %v1964_v1  ;;  %660 = vmatpush.msrb.mxu0 %v1959_v0 }
   0xb   :  { %436 = vmatpush.msrb.mxu1 %v1964_v1  ;;  %586 = vmatpush.msrb.mxu3 %v1964_v1 }
   0xc   :  { %212 = vmatpush.msrb.mxu2 %v1974_v3  ;;  %661 = vmatpush.msrb.mxu0 %v1964_v1 }
   0xd   :  { %437 = vmatpush.msrb.mxu1 %v1974_v3  ;;  %587 = vmatpush.msrb.mxu3 %v1974_v3 }
   0xe   :  { %510 = vmatpush.msra.mxu2 %v1959_v0  ;;  %662 = vmatpush.msrb.mxu0 %v1974_v3 }
   0xf   :  { %1723 = vset.pattern.permute.xlu0 %v1902_v24 }
  0x10   :  { %511 = vmatpush.msra.mxu2 %v1964_v1 }
  0x12   :  { %512 = vmatpush.msra.mxu2 %v1974_v3 }
  0x8a   :  { %v64_v6 = vpop.f32.mrf.mxu2 }
  0x8b   :  { %v65_v7 = vadd.f32 %v2006_v5, %v64_v6  ;;  %v1656_v6 = vld [vmem:[%s2361_s1 + $0x10] sm:$0x1f] }
  0x8d   :  { %1726 = vtanh.f32 %v65_v7  ;;  %v1652_v9 = vmul.f32 -1.442695, %v65_v7 }
  0x8f   :  { %1728 = vpow2.f32 %v1652_v9 }
  0x93   :  { %v1727_v8 = vpop.eup %1726 }
  0x94   :  { %89 = vrot.lane.b32.xlu0 %v1727_v8, %s1900_s18 }
  0x95   :  { %v1729_v10 = vpop.eup %1728 }
  0x96   :  { %v70_v11 = vadd.f32 1.0, %v1729_v10 }
  0x98   :  { %1730 = vrcp.f32 %v70_v11  ;;  %v82_v17 = vand.u32 2147483648, %v70_v11  ;;  %vm76_vm3 = vweird.f32 %v70_v11  ;;  %v80_v18 = vand.u32 2147483647, %v70_v11 }
  0x9a   :  { %v83_v20 = vor.u32 1.1754944e-38, %v82_v17  ;;  %vm81_vm5 = vcmp.eq.f32.partialorder %v80_v18, 8.507059e+37 }
  0x9e   :  { %v1731_v12 = vpop.eup %1730 }
  0x9f   :  { %v72_v13 = vmul.f32 %v1731_v12, %v70_v11  ;;  %vm77_vm2 = vweird.f32 %v1731_v12 }
  0xa0   :  { %vm78_vm4 = vmor %vm76_vm3, %vm77_vm2 }
  0xa1   :  { %v73_v14 = vsub.f32 1.0, %v72_v13 }
  0xa3   :  { %v74_v15 = vmul.f32 %v1731_v12, %v73_v14 }
  0xa5   :  { %v75_v16 = vadd.f32 %v1731_v12, %v74_v15 }
  0xa7   :  { %v79_v19 = vsel %vm78_vm4, %v1731_v12, %v75_v16  ;;  %v255_v12 = vsel %vm254_vm14, 1, %v1902_v24 }
  0xa8   :  { %v84_v22 = vsel %vm81_vm5, %v83_v20, %v79_v19 }
  0xa9   :  { %v87_v25 = vmul.f32 0.0, %v84_v22 }
 0x106   :  { %v90_v21 = vpop.permute.xlu0 %89 }
 0x107   :  { %v92_v23 = vmul.f32 %v90_v21, %v84_v22 }
 0x109   :  { %94 = vrot.lane.b32.xlu0 %v92_v23, %s1901_s19 }
 0x17b   :  { %v95_v26 = vpop.permute.xlu0 %94 }
 0x17c   :  { %v97_v27 = vadd.f32 %v95_v26, %v87_v25 }
 0x17e   :  { %1732 = vtanh.f32 %v97_v27 }
 0x184   :  { %v1733_v28 = vpop.eup %1732 }
 0x185   :  { %100 = vrot.lane.b32.xlu1 %v1733_v28, %s1903_s22 }
 0x18d   :  { %107 = vperm.xlu1 %1721, %v105_v30  }
 0x1f7   :  { %v101_v31 = vpop.permute.xlu1 %100 }
 0x1f8   :  { %v103_v32 = vmul.f32 %v101_v31, %v84_v22 }
 0x1ff   :  { %v108_v33 = vpop.permute.xlu1 %107 }
 0x200   :  { %vm109_vm7 = vcmp.eq.s32.totalorder %v108_v33, 1 }
 0x201   :  { %v110_v34 = vsel %vm109_vm7, %v103_v32, 0.0  ;;  %v111_v57 = vsel %vm109_vm7, %v97_v27, 0.0  ;;  %vm404_vm7 = vcmp.gt.s32.totalorder %v2017_v29, 4 }
 0x202   :  { %115 = vrot.lane.b32.xlu2 %v110_v34, %s1900_s18 }
 0x25c   :  { %v116_v36 = vpop.permute.xlu2 %115 }
 0x25d   :  { %v118_v37 = vsel %vm38_vm0, %v1653_v35, %v116_v36 }
 0x25e   :  { %1654 = vmatmul.msk.f32.vlgmr.msra.gmra.mxu1 %vm43_vm1, %v118_v37 }
 0x25f   :  { %735 = vmatpush.msra.mxu1 %v1959_v0 }
 0x261   :  { %736 = vmatpush.msra.mxu1 %v1964_v1 }
 0x263   :  { %737 = vmatpush.msra.mxu1 %v1974_v3 }
 0x2db   :  { %v139_v38 = vpop.f32.mrf.mxu1 }
 0x2dc   :  { %v140_v39 = vadd.f32 %v2006_v5, %v139_v38 }
 0x2de   :  { %1734 = vtanh.f32 %v140_v39  ;;  %v1655_v41 = vmul.f32 -1.442695, %v140_v39  ;;  %v1659_v39 = vld [vmem:[%s2361_s1 + $0x18] sm:$0x1f] }
 0x2e0   :  { %1736 = vpow2.f32 %v1655_v41 }
 0x2e4   :  { %v1735_v40 = vpop.eup %1734 }
 0x2e5   :  { %164 = vrot.lane.b32.xlu2 %v1735_v40, %s1900_s18 }
 0x2e6   :  { %v1737_v42 = vpop.eup %1736 }
 0x2e7   :  { %v145_v43 = vadd.f32 1.0, %v1737_v42 }
 0x2e9   :  { %1738 = vrcp.f32 %v145_v43  ;;  %v157_v50 = vand.u32 2147483648, %v145_v43  ;;  %vm151_vm10 = vweird.f32 %v145_v43  ;;  %v155_v51 = vand.u32 2147483647, %v145_v43 }
 0x2eb   :  { %v158_v53 = vor.u32 1.1754944e-38, %v157_v50  ;;  %vm156_vm12 = vcmp.eq.f32.partialorder %v155_v51, 8.507059e+37 }
 0x2ed   :  { %182 = vperm.xlu2 %1722, %v180_v44  }
 0x2ef   :  { %v1739_v45 = vpop.eup %1738 }
 0x2f0   :  { %v147_v46 = vmul.f32 %v1739_v45, %v145_v43  ;;  %vm152_vm9 = vweird.f32 %v1739_v45 }
 0x2f1   :  { %vm153_vm11 = vmor %vm151_vm10, %vm152_vm9 }
 0x2f2   :  { %v148_v47 = vsub.f32 1.0, %v147_v46 }
 0x2f4   :  { %v149_v48 = vmul.f32 %v1739_v45, %v148_v47 }
 0x2f6   :  { %v150_v49 = vadd.f32 %v1739_v45, %v149_v48  ;;  %v330_v48 = vsel %vm329_vm6, 1, %v1902_v24 }
 0x2f8   :  { %v154_v52 = vsel %vm153_vm11, %v1739_v45, %v150_v49  ;;  %v405_v49 = vsel %vm404_vm7, 1, %v1902_v24 }
 0x2f9   :  { %v159_v55 = vsel %vm156_vm12, %v158_v53, %v154_v52 }
 0x2fa   :  { %v162_v58 = vmul.f32 %v159_v55, %v111_v57 }
 0x33f   :  { %v165_v54 = vpop.permute.xlu2 %164 }
 0x340   :  { %v167_v56 = vmul.f32 %v165_v54, %v159_v55 }
 0x342   :  { %169 = vrot.lane.b32.xlu0 %v167_v56, %s1901_s19 }
 0x347   :  { %v183_v62 = vpop.permute.xlu2 %182 }
 0x348   :  { %vm184_vm13 = vcmp.eq.s32.totalorder %v183_v62, 1 }
 0x3b4   :  { %v170_v59 = vpop.permute.xlu0 %169 }
 0x3b5   :  { %v172_v60 = vadd.f32 %v170_v59, %v162_v58 }
 0x3b7   :  { %1740 = vtanh.f32 %v172_v60  ;;  %v186_v30 = vsel %vm184_vm13, %v172_v60, %v111_v57 }
 0x3bd   :  { %v1741_v61 = vpop.eup %1740 }
 0x3be   :  { %175 = vrot.lane.b32.xlu1 %v1741_v61, %s1903_s22 }
 0x430   :  { %v176_v63 = vpop.permute.xlu1 %175 }
 0x431   :  { %v178_v2 = vmul.f32 %v176_v63, %v159_v55 }
 0x433   :  { %v185_v4 = vsel %vm184_vm13, %v178_v2, %v110_v34 }
 0x434   :  { %190 = vrot.lane.b32.xlu0 %v185_v4, %s1900_s18 }
 0x4a6   :  { %v191_v7 = vpop.permute.xlu0 %190 }
 0x4a7   :  { %v193_v8 = vsel %vm38_vm0, %v1656_v6, %v191_v7 }
 0x4a8   :  { %1657 = vmatmul.msk.f32.vlgmr.msrb.gmra.mxu2 %vm43_vm1, %v193_v8 }
 0x4a9   :  { %810 = vmatpush.msrb.mxu2 %v1959_v0 }
 0x4ab   :  { %811 = vmatpush.msrb.mxu2 %v1964_v1 }
 0x4ad   :  { %812 = vmatpush.msrb.mxu2 %v1974_v3 }
 0x52b   :  { %v214_v9 = vpop.f32.mrf.mxu2 }
 0x52c   :  { %v215_v10 = vadd.f32 %v2006_v5, %v214_v9 }
 0x52e   :  { %1742 = vtanh.f32 %v215_v10  ;;  %v1658_v13 = vmul.f32 -1.442695, %v215_v10 }
 0x530   :  { %1744 = vpow2.f32 %v1658_v13 }
 0x534   :  { %v1743_v11 = vpop.eup %1742 }
 0x535   :  { %239 = vrot.lane.b32.xlu1 %v1743_v11, %s1900_s18  ;;  %v1662_v11 = vld [vmem:[%s2361_s1 + $0x20] sm:$0x1f] }
 0x536   :  { %v1745_v14 = vpop.eup %1744 }
 0x537   :  { %v220_v15 = vadd.f32 1.0, %v1745_v14 }
 0x539   :  { %1746 = vrcp.f32 %v220_v15  ;;  %v232_v21 = vand.u32 2147483648, %v220_v15  ;;  %vm226_vm2 = vweird.f32 %v220_v15  ;;  %v230_v22 = vand.u32 2147483647, %v220_v15 }
 0x53b   :  { %v233_v25 = vor.u32 1.1754944e-38, %v232_v21  ;;  %vm231_vm4 = vcmp.eq.f32.partialorder %v230_v22, 8.507059e+37 }
 0x53d   :  { %257 = vperm.xlu1 %1721, %v255_v12  }
 0x53f   :  { %v1747_v16 = vpop.eup %1746 }
 0x540   :  { %v222_v17 = vmul.f32 %v1747_v16, %v220_v15  ;;  %vm227_vm15 = vweird.f32 %v1747_v16 }
 0x541   :  { %vm228_vm3 = vmor %vm226_vm2, %vm227_vm15 }
 0x542   :  { %v223_v18 = vsub.f32 1.0, %v222_v17 }
 0x544   :  { %v224_v19 = vmul.f32 %v1747_v16, %v223_v18 }
 0x546   :  { %v225_v20 = vadd.f32 %v1747_v16, %v224_v19 }
 0x548   :  { %v229_v23 = vsel %vm228_vm3, %v1747_v16, %v225_v20 }
 0x549   :  { %v234_v27 = vsel %vm231_vm4, %v233_v25, %v229_v23  ;;  %vm479_vm4 = vcmp.gt.s32.totalorder %v2017_v29, 5 }
 0x54a   :  { %v237_v31 = vmul.f32 %v234_v27, %v186_v30 }
 0x5a7   :  { %v240_v26 = vpop.permute.xlu1 %239 }
 0x5a8   :  { %v242_v28 = vmul.f32 %v240_v26, %v234_v27 }
 0x5aa   :  { %244 = vrot.lane.b32.xlu2 %v242_v28, %s1901_s19 }
 0x5af   :  { %v258_v35 = vpop.permute.xlu1 %257 }
 0x5b0   :  { %vm259_vm5 = vcmp.eq.s32.totalorder %v258_v35, 1 }
 0x604   :  { %v245_v32 = vpop.permute.xlu2 %244 }
 0x605   :  { %v247_v33 = vadd.f32 %v245_v32, %v237_v31 }
 0x607   :  { %1748 = vtanh.f32 %v247_v33  ;;  %v261_v62 = vsel %vm259_vm5, %v247_v33, %v186_v30 }
 0x60d   :  { %v1749_v34 = vpop.eup %1748 }
 0x60e   :  { %250 = vrot.lane.b32.xlu0 %v1749_v34, %s1903_s22 }
 0x680   :  { %v251_v36 = vpop.permute.xlu0 %250 }
 0x681   :  { %v253_v37 = vmul.f32 %v251_v36, %v234_v27 }
 0x683   :  { %v260_v38 = vsel %vm259_vm5, %v253_v37, %v185_v4 }
 0x684   :  { %265 = vrot.lane.b32.xlu2 %v260_v38, %s1900_s18 }
 0x6de   :  { %v266_v40 = vpop.permute.xlu2 %265 }
 0x6df   :  { %v268_v41 = vsel %vm38_vm0, %v1659_v39, %v266_v40 }
 0x6e0   :  { %1660 = vmatmul.msk.f32.vlgmr.msra.gmra.mxu3 %vm43_vm1, %v268_v41 }
 0x6e1   :  { %885 = vmatpush.msra.mxu3 %v1959_v0 }
 0x6e3   :  { %886 = vmatpush.msra.mxu3 %v1964_v1 }
 0x6e5   :  { %887 = vmatpush.msra.mxu3 %v1974_v3 }
 0x763   :  { %v289_v42 = vpop.f32.mrf.mxu3 }
 0x764   :  { %v290_v43 = vadd.f32 %v2006_v5, %v289_v42 }
 0x766   :  { %1750 = vtanh.f32 %v290_v43  ;;  %v1661_v45 = vmul.f32 -1.442695, %v290_v43  ;;  %v1665_v43 = vld [vmem:[%s2361_s1 + $0x28] sm:$0x1f] }
 0x768   :  { %1752 = vpow2.f32 %v1661_v45 }
 0x76c   :  { %v1751_v44 = vpop.eup %1750 }
 0x76d   :  { %314 = vrot.lane.b32.xlu0 %v1751_v44, %s1900_s18 }
 0x76e   :  { %v1753_v46 = vpop.eup %1752 }
 0x76f   :  { %v295_v47 = vadd.f32 1.0, %v1753_v46 }
 0x771   :  { %1754 = vrcp.f32 %v295_v47  ;;  %v307_v55 = vand.u32 2147483648, %v295_v47  ;;  %vm301_vm9 = vweird.f32 %v295_v47  ;;  %v305_v56 = vand.u32 2147483647, %v295_v47 }
 0x773   :  { %v308_v58 = vor.u32 1.1754944e-38, %v307_v55  ;;  %vm306_vm11 = vcmp.eq.f32.partialorder %v305_v56, 8.507059e+37 }
 0x775   :  { %332 = vperm.xlu0 %1723, %v330_v48  }
 0x777   :  { %v1755_v50 = vpop.eup %1754 }
 0x778   :  { %v297_v51 = vmul.f32 %v1755_v50, %v295_v47  ;;  %vm302_vm8 = vweird.f32 %v1755_v50 }
 0x779   :  { %vm303_vm10 = vmor %vm301_vm9, %vm302_vm8 }
 0x77a   :  { %v298_v52 = vsub.f32 1.0, %v297_v51 }
 0x77c   :  { %v299_v53 = vmul.f32 %v1755_v50, %v298_v52 }
 0x77d   :  { %407 = vperm.xlu0 %1723, %v405_v49   ;;  %v480_v49 = vsel %vm479_vm4, 1, %v1902_v24 }
 0x77e   :  { %v300_v54 = vadd.f32 %v1755_v50, %v299_v53 }
 0x780   :  { %v304_v57 = vsel %vm303_vm10, %v1755_v50, %v300_v54  ;;  %vm554_vm10 = vcmp.gt.s32.totalorder %v2017_v29, 6 }
 0x781   :  { %v309_v60 = vsel %vm306_vm11, %v308_v58, %v304_v57 }
 0x782   :  { %v312_v63 = vmul.f32 %v309_v60, %v261_v62 }
 0x7df   :  { %v315_v59 = vpop.permute.xlu0 %314 }
 0x7e0   :  { %v317_v61 = vmul.f32 %v315_v59, %v309_v60 }
 0x7e2   :  { %319 = vrot.lane.b32.xlu1 %v317_v61, %s1901_s19 }
 0x7e7   :  { %v333_v7 = vpop.permute.xlu0 %332 }
 0x7e8   :  { %vm334_vm12 = vcmp.eq.s32.totalorder %v333_v7, 1 }
 0x7ef   :  { %v408_v39 = vpop.permute.xlu0 %407 }
 0x7f0   :  { %vm409_vm3 = vcmp.eq.s32.totalorder %v408_v39, 1 }
 0x854   :  { %v320_v2 = vpop.permute.xlu1 %319 }
 0x855   :  { %v322_v4 = vadd.f32 %v320_v2, %v312_v63 }
 0x857   :  { %1756 = vtanh.f32 %v322_v4  ;;  %v336_v34 = vsel %vm334_vm12, %v322_v4, %v261_v62 }
 0x85d   :  { %v1757_v6 = vpop.eup %1756 }
 0x85e   :  { %325 = vrot.lane.b32.xlu2 %v1757_v6, %s1903_s22 }
 0x8b8   :  { %v326_v8 = vpop.permute.xlu2 %325 }
 0x8b9   :  { %v328_v9 = vmul.f32 %v326_v8, %v309_v60 }
 0x8bb   :  { %v335_v10 = vsel %vm334_vm12, %v328_v9, %v260_v38 }
 0x8bc   :  { %340 = vrot.lane.b32.xlu1 %v335_v10, %s1900_s18 }
 0x92e   :  { %v341_v12 = vpop.permute.xlu1 %340 }
 0x92f   :  { %v343_v13 = vsel %vm38_vm0, %v1662_v11, %v341_v12 }
 0x930   :  { %1663 = vmatmul.msk.f32.vlgmr.msra.gmra.mxu0 %vm43_vm1, %v343_v13 }
 0x931   :  { %960 = vmatpush.msra.mxu0 %v1959_v0 }
 0x933   :  { %961 = vmatpush.msra.mxu0 %v1964_v1 }
 0x935   :  { %962 = vmatpush.msra.mxu0 %v1974_v3 }
 0x9ad   :  { %v364_v14 = vpop.f32.mrf.mxu0 }
 0x9ae   :  { %v365_v15 = vadd.f32 %v2006_v5, %v364_v14  ;;  %v1668_v14 = vld [vmem:[%s2361_s1 + $0x30] sm:$0x1f] }
 0x9b0   :  { %1758 = vtanh.f32 %v365_v15  ;;  %v1664_v17 = vmul.f32 -1.442695, %v365_v15 }
 0x9b2   :  { %1760 = vpow2.f32 %v1664_v17 }
 0x9b6   :  { %v1759_v16 = vpop.eup %1758 }
 0x9b7   :  { %389 = vrot.lane.b32.xlu2 %v1759_v16, %s1900_s18 }
 0x9b8   :  { %v1761_v18 = vpop.eup %1760 }
 0x9b9   :  { %v370_v19 = vadd.f32 1.0, %v1761_v18 }
 0x9bb   :  { %1762 = vrcp.f32 %v370_v19  ;;  %v382_v26 = vand.u32 2147483648, %v370_v19  ;;  %vm376_vm14 = vweird.f32 %v370_v19  ;;  %v380_v27 = vand.u32 2147483647, %v370_v19 }
 0x9bd   :  { %v383_v30 = vor.u32 1.1754944e-38, %v382_v26  ;;  %vm381_vm2 = vcmp.eq.f32.partialorder %v380_v27, 8.507059e+37 }
 0x9c1   :  { %v1763_v20 = vpop.eup %1762 }
 0x9c2   :  { %v372_v21 = vmul.f32 %v1763_v20, %v370_v19  ;;  %vm377_vm13 = vweird.f32 %v1763_v20 }
 0x9c3   :  { %vm378_vm15 = vmor %vm376_vm14, %vm377_vm13 }
 0x9c4   :  { %v373_v22 = vsub.f32 1.0, %v372_v21 }
 0x9c6   :  { %v374_v23 = vmul.f32 %v1763_v20, %v373_v22 }
 0x9c8   :  { %v375_v25 = vadd.f32 %v1763_v20, %v374_v23 }
 0x9ca   :  { %v379_v28 = vsel %vm378_vm15, %v1763_v20, %v375_v25  ;;  %v555_v20 = vsel %vm554_vm10, 1, %v1902_v24 }
 0x9cb   :  { %v384_v32 = vsel %vm381_vm2, %v383_v30, %v379_v28  ;;  %vm629_vm2 = vcmp.gt.s32.totalorder %v2017_v29, 7 }
 0x9cc   :  { %v387_v35 = vmul.f32 %v384_v32, %v336_v34 }
 0xa11   :  { %v390_v31 = vpop.permute.xlu2 %389 }
 0xa12   :  { %v392_v33 = vmul.f32 %v390_v31, %v384_v32 }
 0xa14   :  { %394 = vrot.lane.b32.xlu1 %v392_v33, %s1901_s19 }
 0xa86   :  { %v395_v36 = vpop.permute.xlu1 %394 }
 0xa87   :  { %v397_v37 = vadd.f32 %v395_v36, %v387_v35 }
 0xa89   :  { %1764 = vtanh.f32 %v397_v37  ;;  %v411_v4 = vsel %vm409_vm3, %v397_v37, %v336_v34 }
 0xa8f   :  { %v1765_v38 = vpop.eup %1764 }
 0xa90   :  { %400 = vrot.lane.b32.xlu2 %v1765_v38, %s1903_s22 }
 0xaea   :  { %v401_v40 = vpop.permute.xlu2 %400 }
 0xaeb   :  { %v403_v41 = vmul.f32 %v401_v40, %v384_v32 }
 0xaed   :  { %v410_v42 = vsel %vm409_vm3, %v403_v41, %v335_v10 }
 0xaee   :  { %415 = vrot.lane.b32.xlu1 %v410_v42, %s1900_s18 }
 0xb60   :  { %v416_v44 = vpop.permute.xlu1 %415 }
 0xb61   :  { %v418_v45 = vsel %vm38_vm0, %v1665_v43, %v416_v44 }
 0xb62   :  { %1666 = vmatmul.msk.f32.vlgmr.msrb.gmra.mxu1 %vm43_vm1, %v418_v45 }
 0xb63   :  { %1035 = vmatpush.msrb.mxu1 %v1959_v0 }
 0xb65   :  { %1036 = vmatpush.msrb.mxu1 %v1964_v1 }
 0xb67   :  { %1037 = vmatpush.msrb.mxu1 %v1974_v3 }
 0xbdf   :  { %v439_v46 = vpop.f32.mrf.mxu1 }
 0xbe0   :  { %v440_v47 = vadd.f32 %v2006_v5, %v439_v46 }
 0xbe2   :  { %1766 = vtanh.f32 %v440_v47  ;;  %v1667_v50 = vmul.f32 -1.442695, %v440_v47  ;;  %v1671_v47 = vld [vmem:[%s2361_s1 + $0x38] sm:$0x1f] }
 0xbe4   :  { %1768 = vpow2.f32 %v1667_v50 }
 0xbe8   :  { %v1767_v48 = vpop.eup %1766 }
 0xbe9   :  { %464 = vrot.lane.b32.xlu2 %v1767_v48, %s1900_s18 }
 0xbea   :  { %v1769_v51 = vpop.eup %1768 }
 0xbeb   :  { %v445_v52 = vadd.f32 1.0, %v1769_v51 }
 0xbed   :  { %1770 = vrcp.f32 %v445_v52  ;;  %v457_v58 = vand.u32 2147483648, %v445_v52  ;;  %vm451_vm6 = vweird.f32 %v445_v52  ;;  %v455_v59 = vand.u32 2147483647, %v445_v52 }
 0xbef   :  { %v458_v61 = vor.u32 1.1754944e-38, %v457_v58  ;;  %vm456_vm8 = vcmp.eq.f32.partialorder %v455_v59, 8.507059e+37 }
 0xbf1   :  { %482 = vperm.xlu2 %1722, %v480_v49  }
 0xbf3   :  { %v1771_v53 = vpop.eup %1770 }
 0xbf4   :  { %v447_v54 = vmul.f32 %v1771_v53, %v445_v52  ;;  %vm452_vm5 = vweird.f32 %v1771_v53 }
 0xbf5   :  { %vm453_vm7 = vmor %vm451_vm6, %vm452_vm5 }
 0xbf6   :  { %v448_v55 = vsub.f32 1.0, %v447_v54 }
 0xbf8   :  { %v449_v56 = vmul.f32 %v1771_v53, %v448_v55 }
 0xbfa   :  { %v450_v57 = vadd.f32 %v1771_v53, %v449_v56 }
 0xbfc   :  { %v454_v60 = vsel %vm453_vm7, %v1771_v53, %v450_v57  ;;  %v630_v53 = vsel %vm629_vm2, 1, %v1902_v24 }
 0xbfd   :  { %v459_v63 = vsel %vm456_vm8, %v458_v61, %v454_v60  ;;  %vm704_vm8 = vcmp.gt.s32.totalorder %v2017_v29, 8 }
 0xbfe   :  { %v462_v6 = vmul.f32 %v459_v63, %v411_v4 }
 0xc43   :  { %v465_v62 = vpop.permute.xlu2 %464 }
 0xc44   :  { %v467_v2 = vmul.f32 %v465_v62, %v459_v63 }
 0xc46   :  { %469 = vrot.lane.b32.xlu0 %v467_v2, %s1901_s19 }
 0xc4b   :  { %v483_v10 = vpop.permute.xlu2 %482 }
 0xc4c   :  { %vm484_vm9 = vcmp.eq.s32.totalorder %v483_v10, 1 }
 0xcb8   :  { %v470_v7 = vpop.permute.xlu0 %469 }
 0xcb9   :  { %v472_v8 = vadd.f32 %v470_v7, %v462_v6 }
 0xcbb   :  { %1772 = vtanh.f32 %v472_v8  ;;  %v486_v38 = vsel %vm484_vm9, %v472_v8, %v411_v4 }
 0xcc1   :  { %v1773_v9 = vpop.eup %1772 }
 0xcc2   :  { %475 = vrot.lane.b32.xlu1 %v1773_v9, %s1903_s22 }
 0xd34   :  { %v476_v11 = vpop.permute.xlu1 %475 }
 0xd35   :  { %v478_v12 = vmul.f32 %v476_v11, %v459_v63 }
 0xd37   :  { %v485_v13 = vsel %vm484_vm9, %v478_v12, %v410_v42 }
 0xd38   :  { %490 = vrot.lane.b32.xlu0 %v485_v13, %s1900_s18 }
 0xdaa   :  { %v491_v15 = vpop.permute.xlu0 %490 }
 0xdab   :  { %v493_v16 = vsel %vm38_vm0, %v1668_v14, %v491_v15  ;;  %v1674_v15 = vld [vmem:[%s2361_s1 + $0x40] sm:$0x1f] }
 0xdac   :  { %1669 = vmatmul.msk.f32.vlgmr.msra.gmra.mxu2 %vm43_vm1, %v493_v16 }
 0xdad   :  { %1110 = vmatpush.msra.mxu2 %v1959_v0 }
 0xdaf   :  { %1111 = vmatpush.msra.mxu2 %v1964_v1 }
 0xdb1   :  { %1112 = vmatpush.msra.mxu2 %v1974_v3 }
 0xe2f   :  { %v514_v17 = vpop.f32.mrf.mxu2 }
 0xe30   :  { %v515_v18 = vadd.f32 %v2006_v5, %v514_v17 }
 0xe32   :  { %1774 = vtanh.f32 %v515_v18  ;;  %v1670_v21 = vmul.f32 -1.442695, %v515_v18 }
 0xe34   :  { %1776 = vpow2.f32 %v1670_v21  ;;  %v705_v21 = vsel %vm704_vm8, 1, %v1902_v24 }
 0xe38   :  { %v1775_v19 = vpop.eup %1774 }
 0xe39   :  { %539 = vrot.lane.b32.xlu1 %v1775_v19, %s1900_s18 }
 0xe3a   :  { %v1777_v22 = vpop.eup %1776 }
 0xe3b   :  { %v520_v23 = vadd.f32 1.0, %v1777_v22 }
 0xe3d   :  { %1778 = vrcp.f32 %v520_v23  ;;  %v532_v31 = vand.u32 2147483648, %v520_v23  ;;  %vm526_vm12 = vweird.f32 %v520_v23  ;;  %v530_v32 = vand.u32 2147483647, %v520_v23 }
 0xe3f   :  { %v533_v34 = vor.u32 1.1754944e-38, %v532_v31  ;;  %vm531_vm14 = vcmp.eq.f32.partialorder %v530_v32, 8.507059e+37 }
 0xe41   :  { %557 = vperm.xlu1 %1721, %v555_v20  }
 0xe43   :  { %v1779_v25 = vpop.eup %1778 }
 0xe44   :  { %v522_v26 = vmul.f32 %v1779_v25, %v520_v23  ;;  %vm527_vm11 = vweird.f32 %v1779_v25 }
 0xe45   :  { %vm528_vm13 = vmor %vm526_vm12, %vm527_vm11 }
 0xe46   :  { %v523_v27 = vsub.f32 1.0, %v522_v26 }
 0xe48   :  { %v524_v28 = vmul.f32 %v1779_v25, %v523_v27 }
 0xe4a   :  { %v525_v30 = vadd.f32 %v1779_v25, %v524_v28 }
 0xe4c   :  { %v529_v33 = vsel %vm528_vm13, %v1779_v25, %v525_v30 }
 0xe4d   :  { %v534_v36 = vsel %vm531_vm14, %v533_v34, %v529_v33  ;;  %vm779_vm14 = vcmp.gt.s32.totalorder %v2017_v29, 9 }
 0xe4e   :  { %v537_v39 = vmul.f32 %v534_v36, %v486_v38 }
 0xeab   :  { %v540_v35 = vpop.permute.xlu1 %539 }
 0xeac   :  { %v542_v37 = vmul.f32 %v540_v35, %v534_v36 }
 0xeae   :  { %544 = vrot.lane.b32.xlu2 %v542_v37, %s1901_s19 }
 0xeb3   :  { %v558_v43 = vpop.permute.xlu1 %557 }
 0xeb4   :  { %vm559_vm15 = vcmp.eq.s32.totalorder %v558_v43, 1 }
 0xf08   :  { %v545_v40 = vpop.permute.xlu2 %544 }
 0xf09   :  { %v547_v41 = vadd.f32 %v545_v40, %v537_v39 }
 0xf0b   :  { %1780 = vtanh.f32 %v547_v41  ;;  %v561_v6 = vsel %vm559_vm15, %v547_v41, %v486_v38 }
 0xf11   :  { %v1781_v42 = vpop.eup %1780 }
 0xf12   :  { %550 = vrot.lane.b32.xlu0 %v1781_v42, %s1903_s22 }
 0xf84   :  { %v551_v44 = vpop.permute.xlu0 %550 }
 0xf85   :  { %v553_v45 = vmul.f32 %v551_v44, %v534_v36 }
 0xf87   :  { %v560_v46 = vsel %vm559_vm15, %v553_v45, %v485_v13 }
 0xf88   :  { %565 = vrot.lane.b32.xlu2 %v560_v46, %s1900_s18 }
 0xfe2   :  { %v566_v48 = vpop.permute.xlu2 %565 }
 0xfe3   :  { %v568_v49 = vsel %vm38_vm0, %v1671_v47, %v566_v48  ;;  %v1677_v48 = vld [vmem:[%s2361_s1 + $0x48] sm:$0x1f] }
 0xfe4   :  { %1672 = vmatmul.msk.f32.vlgmr.msrb.gmra.mxu3 %vm43_vm1, %v568_v49 }
 0xfe5   :  { %1185 = vmatpush.msrb.mxu3 %v1959_v0 }
 0xfe7   :  { %1186 = vmatpush.msrb.mxu3 %v1964_v1 }
 0xfe9   :  { %1187 = vmatpush.msrb.mxu3 %v1974_v3 }
0x1067   :  { %v589_v50 = vpop.f32.mrf.mxu3 }
0x1068   :  { %v590_v51 = vadd.f32 %v2006_v5, %v589_v50 }
0x106a   :  { %1782 = vtanh.f32 %v590_v51  ;;  %v1673_v54 = vmul.f32 -1.442695, %v590_v51 }
0x106c   :  { %1784 = vpow2.f32 %v1673_v54  ;;  %v780_v54 = vsel %vm779_vm14, 1, %v1902_v24 }
0x1070   :  { %v1783_v52 = vpop.eup %1782 }
0x1071   :  { %614 = vrot.lane.b32.xlu0 %v1783_v52, %s1900_s18 }
0x1072   :  { %v1785_v55 = vpop.eup %1784 }
0x1073   :  { %v595_v0 = vadd.f32 1.0, %v1785_v55 }
0x1075   :  { %1786 = vrcp.f32 %v595_v0  ;;  %v607_v59 = vand.u32 2147483648, %v595_v0  ;;  %vm601_vm4 = vweird.f32 %v595_v0  ;;  %v605_v60 = vand.u32 2147483647, %v595_v0 }
0x1077   :  { %v608_v62 = vor.u32 1.1754944e-38, %v607_v59  ;;  %vm606_vm6 = vcmp.eq.f32.partialorder %v605_v60, 8.507059e+37 }
0x1079   :  { %632 = vperm.xlu0 %1723, %v630_v53  }
0x107b   :  { %v1787_v1 = vpop.eup %1786 }
0x107c   :  { %v597_v56 = vmul.f32 %v1787_v1, %v595_v0  ;;  %vm602_vm3 = vweird.f32 %v1787_v1 }
0x107d   :  { %vm603_vm5 = vmor %vm601_vm4, %vm602_vm3 }
0x107e   :  { %v598_v3 = vsub.f32 1.0, %v597_v56 }
0x1080   :  { %v599_v57 = vmul.f32 %v1787_v1, %v598_v3 }
0x1082   :  { %v600_v58 = vadd.f32 %v1787_v1, %v599_v57 }
0x1084   :  { %v604_v61 = vsel %vm603_vm5, %v1787_v1, %v600_v58 }
0x1085   :  { %v609_v2 = vsel %vm606_vm6, %v608_v62, %v604_v61  ;;  %vm854_vm6 = vcmp.gt.s32.totalorder %v2017_v29, 10 }
0x1086   :  { %v612_v7 = vmul.f32 %v609_v2, %v561_v6 }
0x10e3   :  { %v615_v63 = vpop.permute.xlu0 %614 }
0x10e4   :  { %v617_v4 = vmul.f32 %v615_v63, %v609_v2 }
0x10e6   :  { %619 = vrot.lane.b32.xlu1 %v617_v4, %s1901_s19 }
0x10eb   :  { %v633_v11 = vpop.permute.xlu0 %632 }
0x10ec   :  { %vm634_vm7 = vcmp.eq.s32.totalorder %v633_v11, 1 }
0x1158   :  { %v620_v8 = vpop.permute.xlu1 %619 }
0x1159   :  { %v622_v9 = vadd.f32 %v620_v8, %v612_v7 }
0x115b   :  { %1788 = vtanh.f32 %v622_v9  ;;  %v636_v39 = vsel %vm634_vm7, %v622_v9, %v561_v6 }
0x1161   :  { %v1789_v10 = vpop.eup %1788 }
0x1162   :  { %625 = vrot.lane.b32.xlu2 %v1789_v10, %s1903_s22 }
0x11bc   :  { %v626_v12 = vpop.permute.xlu2 %625 }
0x11bd   :  { %v628_v13 = vmul.f32 %v626_v12, %v609_v2 }
0x11bf   :  { %v635_v14 = vsel %vm634_vm7, %v628_v13, %v560_v46 }
0x11c0   :  { %640 = vrot.lane.b32.xlu1 %v635_v14, %s1900_s18 }
0x1232   :  { %v641_v16 = vpop.permute.xlu1 %640 }
0x1233   :  { %v643_v17 = vsel %vm38_vm0, %v1674_v15, %v641_v16  ;;  %v1680_v16 = vld [vmem:[%s2361_s1 + $0x50] sm:$0x1f] }
0x1234   :  { %1675 = vmatmul.msk.f32.vlgmr.msrb.gmra.mxu0 %vm43_vm1, %v643_v17 }
0x12b1   :  { %v664_v18 = vpop.f32.mrf.mxu0 }
0x12b2   :  { %v665_v19 = vadd.f32 %v2006_v5, %v664_v18 }
0x12b4   :  { %1790 = vtanh.f32 %v665_v19  ;;  %v1676_v22 = vmul.f32 -1.442695, %v665_v19 }
0x12b6   :  { %1792 = vpow2.f32 %v1676_v22  ;;  %v855_v22 = vsel %vm854_vm6, 1, %v1902_v24 }
0x12ba   :  { %v1791_v20 = vpop.eup %1790 }
0x12bb   :  { %689 = vrot.lane.b32.xlu2 %v1791_v20, %s1900_s18 }
0x12bc   :  { %v1793_v23 = vpop.eup %1792 }
0x12bd   :  { %v670_v25 = vadd.f32 1.0, %v1793_v23 }
0x12bf   :  { %1794 = vrcp.f32 %v670_v25  ;;  %v682_v32 = vand.u32 2147483648, %v670_v25  ;;  %vm676_vm10 = vweird.f32 %v670_v25  ;;  %v680_v33 = vand.u32 2147483647, %v670_v25 }
0x12c1   :  { %v683_v35 = vor.u32 1.1754944e-38, %v682_v32  ;;  %vm681_vm12 = vcmp.eq.f32.partialorder %v680_v33, 8.507059e+37 }
0x12c3   :  { %707 = vperm.xlu2 %1722, %v705_v21  }
0x12c5   :  { %v1795_v26 = vpop.eup %1794 }
0x12c6   :  { %v672_v27 = vmul.f32 %v1795_v26, %v670_v25  ;;  %vm677_vm9 = vweird.f32 %v1795_v26 }
0x12c7   :  { %vm678_vm11 = vmor %vm676_vm10, %vm677_vm9 }
0x12c8   :  { %v673_v28 = vsub.f32 1.0, %v672_v27 }
0x12ca   :  { %v674_v30 = vmul.f32 %v1795_v26, %v673_v28 }
0x12cc   :  { %v675_v31 = vadd.f32 %v1795_v26, %v674_v30 }
0x12ce   :  { %v679_v34 = vsel %vm678_vm11, %v1795_v26, %v675_v31 }
0x12cf   :  { %v684_v37 = vsel %vm681_vm12, %v683_v35, %v679_v34  ;;  %vm929_vm12 = vcmp.gt.s32.totalorder %v2017_v29, 11 }
0x12d0   :  { %v687_v40 = vmul.f32 %v684_v37, %v636_v39 }
0x1315   :  { %v690_v36 = vpop.permute.xlu2 %689 }
0x1316   :  { %v692_v38 = vmul.f32 %v690_v36, %v684_v37 }
0x1318   :  { %694 = vrot.lane.b32.xlu0 %v692_v38, %s1901_s19 }
0x131d   :  { %v708_v44 = vpop.permute.xlu2 %707 }
0x131e   :  { %vm709_vm13 = vcmp.eq.s32.totalorder %v708_v44, 1 }
0x138a   :  { %v695_v41 = vpop.permute.xlu0 %694 }
0x138b   :  { %v697_v42 = vadd.f32 %v695_v41, %v687_v40 }
0x138d   :  { %1796 = vtanh.f32 %v697_v42  ;;  %v711_v7 = vsel %vm709_vm13, %v697_v42, %v636_v39 }
0x1393   :  { %v1797_v43 = vpop.eup %1796 }
0x1394   :  { %700 = vrot.lane.b32.xlu1 %v1797_v43, %s1903_s22 }
0x1406   :  { %v701_v45 = vpop.permute.xlu1 %700 }
0x1407   :  { %v703_v46 = vmul.f32 %v701_v45, %v684_v37 }
0x1409   :  { %v710_v47 = vsel %vm709_vm13, %v703_v46, %v635_v14 }
0x140a   :  { %715 = vrot.lane.b32.xlu0 %v710_v47, %s1900_s18 }
0x147c   :  { %v716_v49 = vpop.permute.xlu0 %715 }
0x147d   :  { %v718_v50 = vsel %vm38_vm0, %v1677_v48, %v716_v49  ;;  %v1683_v48 = vld [vmem:[%s2361_s1 + $0x58] sm:$0x1f] }
0x147e   :  { %1678 = vmatmul.msk.f32.vlgmr.msra.gmra.mxu1 %vm43_vm1, %v718_v50 }
0x14fb   :  { %v739_v51 = vpop.f32.mrf.mxu1 }
0x14fc   :  { %v740_v52 = vadd.f32 %v2006_v5, %v739_v51 }
0x14fe   :  { %1798 = vtanh.f32 %v740_v52  ;;  %v1679_v55 = vmul.f32 -1.442695, %v740_v52  ;;  %v2193_v52 = vld [vmem:[%s2362_s4] ss:$0 sm:$0xff] }
0x1500   :  { %1800 = vpow2.f32 %v1679_v55  ;;  %v930_v55 = vsel %vm929_vm12, 1, %v1902_v24 }
0x1504   :  { %v1799_v53 = vpop.eup %1798 }
0x1505   :  { %764 = vrot.lane.b32.xlu1 %v1799_v53, %s1900_s18 }
0x1506   :  { %v1801_v0 = vpop.eup %1800 }
0x1507   :  { %v745_v1 = vadd.f32 1.0, %v1801_v0 }
0x1509   :  { %1802 = vrcp.f32 %v745_v1  ;;  %v757_v60 = vand.u32 2147483648, %v745_v1  ;;  %vm751_vm2 = vweird.f32 %v745_v1  ;;  %v755_v61 = vand.u32 2147483647, %v745_v1 }
0x150b   :  { %v758_v63 = vor.u32 1.1754944e-38, %v757_v60  ;;  %vm756_vm4 = vcmp.eq.f32.partialorder %v755_v61, 8.507059e+37 }
0x150d   :  { %782 = vperm.xlu1 %1721, %v780_v54  }
0x150f   :  { %v1803_v56 = vpop.eup %1802 }
0x1510   :  { %v747_v3 = vmul.f32 %v1803_v56, %v745_v1  ;;  %vm752_vm15 = vweird.f32 %v1803_v56 }
0x1511   :  { %vm753_vm3 = vmor %vm751_vm2, %vm752_vm15 }
0x1512   :  { %v748_v57 = vsub.f32 1.0, %v747_v3 }
0x1514   :  { %v749_v58 = vmul.f32 %v1803_v56, %v748_v57 }
0x1516   :  { %v750_v59 = vadd.f32 %v1803_v56, %v749_v58 }
0x1518   :  { %v754_v62 = vsel %vm753_vm3, %v1803_v56, %v750_v59 }
0x1519   :  { %v759_v4 = vsel %vm756_vm4, %v758_v63, %v754_v62 }
0x151a   :  { %v762_v8 = vmul.f32 %v759_v4, %v711_v7 }
0x1577   :  { %v765_v2 = vpop.permute.xlu1 %764 }
0x1578   :  { %v767_v6 = vmul.f32 %v765_v2, %v759_v4 }
0x157a   :  { %769 = vrot.lane.b32.xlu2 %v767_v6, %s1901_s19 }
0x157f   :  { %v783_v12 = vpop.permute.xlu1 %782 }
0x1580   :  { %vm784_vm5 = vcmp.eq.s32.totalorder %v783_v12, 1 }
0x15d4   :  { %v770_v9 = vpop.permute.xlu2 %769 }
0x15d5   :  { %v772_v10 = vadd.f32 %v770_v9, %v762_v8 }
0x15d7   :  { %1804 = vtanh.f32 %v772_v10  ;;  %v786_v39 = vsel %vm784_vm5, %v772_v10, %v711_v7 }
0x15dd   :  { %v1805_v11 = vpop.eup %1804 }
0x15de   :  { %775 = vrot.lane.b32.xlu0 %v1805_v11, %s1903_s22 }
0x1650   :  { %v776_v13 = vpop.permute.xlu0 %775 }
0x1651   :  { %v778_v14 = vmul.f32 %v776_v13, %v759_v4 }
0x1653   :  { %v785_v15 = vsel %vm784_vm5, %v778_v14, %v710_v47 }
0x1654   :  { %790 = vrot.lane.b32.xlu2 %v785_v15, %s1900_s18 }
0x16ae   :  { %v791_v17 = vpop.permute.xlu2 %790 }
0x16af   :  { %v793_v18 = vsel %vm38_vm0, %v1680_v16, %v791_v17  ;;  %v1686_v16 = vld [vmem:[%s2361_s1 + $0x60] sm:$0x1f] }
0x16b0   :  { %1681 = vmatmul.msk.f32.vlgmr.msrb.gmra.mxu2 %vm43_vm1, %v793_v18 }
0x1733   :  { %v814_v19 = vpop.f32.mrf.mxu2 }
0x1734   :  { %v815_v20 = vadd.f32 %v2006_v5, %v814_v19 }
0x1736   :  { %1806 = vtanh.f32 %v815_v20  ;;  %v1682_v23 = vmul.f32 -1.442695, %v815_v20 }
0x1738   :  { %1808 = vpow2.f32 %v1682_v23 }
0x173c   :  { %v1807_v21 = vpop.eup %1806 }
0x173d   :  { %839 = vrot.lane.b32.xlu0 %v1807_v21, %s1900_s18 }
0x173e   :  { %v1809_v25 = vpop.eup %1808 }
0x173f   :  { %v820_v26 = vadd.f32 1.0, %v1809_v25 }
0x1741   :  { %1810 = vrcp.f32 %v820_v26  ;;  %v832_v5 = vand.u32 2147483648, %v820_v26  ;;  %vm826_vm8 = vweird.f32 %v820_v26  ;;  %v830_v33 = vand.u32 2147483647, %v820_v26 }
0x1743   :  { %v833_v35 = vor.u32 1.1754944e-38, %v832_v5  ;;  %vm831_vm10 = vcmp.eq.f32.partialorder %v830_v33, 8.507059e+37 }
0x1745   :  { %857 = vperm.xlu0 %1723, %v855_v22   ;;  %v2214_v22 = vld [vmem:[%s2363_s0] sm:$0x1f] }
0x1746   :  { %vm1004_vm4 = vcmp.gt.s32.totalorder %v2214_v22, 12 }
0x1747   :  { %v1811_v27 = vpop.eup %1810  ;;  %v1005_v23 = vsel %vm1004_vm4, 1, %v1902_v24 }
0x1748   :  { %v822_v28 = vmul.f32 %v1811_v27, %v820_v26  ;;  %vm827_vm7 = vweird.f32 %v1811_v27 }
0x1749   :  { %vm828_vm9 = vmor %vm826_vm8, %vm827_vm7 }
0x174a   :  { %v823_v30 = vsub.f32 1.0, %v822_v28 }
0x174c   :  { %v824_v31 = vmul.f32 %v1811_v27, %v823_v30 }
0x174e   :  { %v825_v32 = vadd.f32 %v1811_v27, %v824_v31 }
0x1750   :  { %v829_v34 = vsel %vm828_vm9, %v1811_v27, %v825_v32 }
0x1751   :  { %v834_v37 = vsel %vm831_vm10, %v833_v35, %v829_v34  ;;  %vm1079_vm10 = vcmp.gt.s32.totalorder %v2214_v22, 13 }
0x1752   :  { %v837_v40 = vmul.f32 %v834_v37, %v786_v39 }
0x17af   :  { %v840_v36 = vpop.permute.xlu0 %839 }
0x17b0   :  { %v842_v38 = vmul.f32 %v840_v36, %v834_v37 }
0x17b2   :  { %844 = vrot.lane.b32.xlu1 %v842_v38, %s1901_s19 }
0x17b7   :  { %v858_v44 = vpop.permute.xlu0 %857 }
0x17b8   :  { %vm859_vm11 = vcmp.eq.s32.totalorder %v858_v44, 1 }
0x1824   :  { %v845_v41 = vpop.permute.xlu1 %844 }
0x1825   :  { %v847_v42 = vadd.f32 %v845_v41, %v837_v40 }
0x1827   :  { %1812 = vtanh.f32 %v847_v42  ;;  %v861_v7 = vsel %vm859_vm11, %v847_v42, %v786_v39 }
0x182d   :  { %v1813_v43 = vpop.eup %1812 }
0x182e   :  { %850 = vrot.lane.b32.xlu2 %v1813_v43, %s1903_s22 }
0x1888   :  { %v851_v45 = vpop.permute.xlu2 %850 }
0x1889   :  { %v853_v46 = vmul.f32 %v851_v45, %v834_v37 }
0x188b   :  { %v860_v47 = vsel %vm859_vm11, %v853_v46, %v785_v15 }
0x188c   :  { %865 = vrot.lane.b32.xlu1 %v860_v47, %s1900_s18 }
0x18fe   :  { %v866_v49 = vpop.permute.xlu1 %865 }
0x18ff   :  { %v868_v50 = vsel %vm38_vm0, %v1683_v48, %v866_v49  ;;  %v1689_v49 = vld [vmem:[%s2361_s1 + $0x68] sm:$0x1f] }
0x1900   :  { %1684 = vmatmul.msk.f32.vlgmr.msra.gmra.mxu3 %vm43_vm1, %v868_v50 }
0x1983   :  { %v889_v51 = vpop.f32.mrf.mxu3 }
0x1984   :  { %v890_v53 = vadd.f32 %v2193_v52, %v889_v51 }
0x1986   :  { %1814 = vtanh.f32 %v890_v53  ;;  %v1685_v0 = vmul.f32 -1.442695, %v890_v53 }
0x1988   :  { %1816 = vpow2.f32 %v1685_v0  ;;  %v1080_v0 = vsel %vm1079_vm10, 1, %v1902_v24 }
0x198c   :  { %v1815_v54 = vpop.eup %1814 }
0x198d   :  { %914 = vrot.lane.b32.xlu2 %v1815_v54, %s1900_s18 }
0x198e   :  { %v1817_v1 = vpop.eup %1816 }
0x198f   :  { %v895_v56 = vadd.f32 1.0, %v1817_v1 }
0x1991   :  { %1818 = vrcp.f32 %v895_v56  ;;  %v907_v61 = vand.u32 2147483648, %v895_v56  ;;  %vm901_vm14 = vweird.f32 %v895_v56  ;;  %v905_v62 = vand.u32 2147483647, %v895_v56 }
0x1993   :  { %v908_v29 = vor.u32 1.1754944e-38, %v907_v61  ;;  %vm906_vm2 = vcmp.eq.f32.partialorder %v905_v62, 8.507059e+37 }
0x1995   :  { %932 = vperm.xlu2 %1722, %v930_v55  }
0x1997   :  { %v1819_v3 = vpop.eup %1818 }
0x1998   :  { %v897_v57 = vmul.f32 %v1819_v3, %v895_v56  ;;  %vm902_vm13 = vweird.f32 %v1819_v3 }
0x1999   :  { %vm903_vm15 = vmor %vm901_vm14, %vm902_vm13 }
0x199a   :  { %v898_v58 = vsub.f32 1.0, %v897_v57 }
0x199c   :  { %v899_v59 = vmul.f32 %v1819_v3, %v898_v58 }
0x199e   :  { %v900_v60 = vadd.f32 %v1819_v3, %v899_v59 }
0x19a0   :  { %v904_v63 = vsel %vm903_vm15, %v1819_v3, %v900_v60 }
0x19a1   :  { %v909_v4 = vsel %vm906_vm2, %v908_v29, %v904_v63  ;;  %vm1154_vm2 = vcmp.gt.s32.totalorder %v2214_v22, 14 }
0x19a2   :  { %v912_v8 = vmul.f32 %v909_v4, %v861_v7 }
0x19e7   :  { %v915_v2 = vpop.permute.xlu2 %914 }
0x19e8   :  { %v917_v6 = vmul.f32 %v915_v2, %v909_v4 }
0x19ea   :  { %919 = vrot.lane.b32.xlu0 %v917_v6, %s1901_s19 }
0x19ef   :  { %v933_v12 = vpop.permute.xlu2 %932 }
0x19f0   :  { %vm934_vm3 = vcmp.eq.s32.totalorder %v933_v12, 1 }
0x1a5c   :  { %v920_v9 = vpop.permute.xlu0 %919 }
0x1a5d   :  { %v922_v10 = vadd.f32 %v920_v9, %v912_v8 }
0x1a5f   :  { %1820 = vtanh.f32 %v922_v10  ;;  %v936_v40 = vsel %vm934_vm3, %v922_v10, %v861_v7 }
0x1a65   :  { %v1821_v11 = vpop.eup %1820 }
0x1a66   :  { %925 = vrot.lane.b32.xlu1 %v1821_v11, %s1903_s22 }
0x1ad8   :  { %v926_v13 = vpop.permute.xlu1 %925 }
0x1ad9   :  { %v928_v14 = vmul.f32 %v926_v13, %v909_v4 }
0x1adb   :  { %v935_v15 = vsel %vm934_vm3, %v928_v14, %v860_v47 }
0x1adc   :  { %940 = vrot.lane.b32.xlu0 %v935_v15, %s1900_s18 }
0x1b4e   :  { %v941_v17 = vpop.permute.xlu0 %940 }
0x1b4f   :  { %v943_v18 = vsel %vm38_vm0, %v1686_v16, %v941_v17  ;;  %v1692_v17 = vld [vmem:[%s2361_s1 + $0x70] sm:$0x1f] }
0x1b50   :  { %1687 = vmatmul.msk.f32.vlgmr.msra.gmra.mxu0 %vm43_vm1, %v943_v18 }
0x1bcd   :  { %v964_v19 = vpop.f32.mrf.mxu0 }
0x1bce   :  { %v965_v20 = vadd.f32 %v2193_v52, %v964_v19 }
0x1bd0   :  { %1822 = vtanh.f32 %v965_v20  ;;  %v1688_v25 = vmul.f32 -1.442695, %v965_v20 }
0x1bd2   :  { %1824 = vpow2.f32 %v1688_v25  ;;  %v1155_v25 = vsel %vm1154_vm2, 1, %v1902_v24 }
0x1bd6   :  { %v1823_v21 = vpop.eup %1822 }
0x1bd7   :  { %989 = vrot.lane.b32.xlu1 %v1823_v21, %s1900_s18 }
0x1bd8   :  { %v1825_v26 = vpop.eup %1824 }
0x1bd9   :  { %v970_v27 = vadd.f32 1.0, %v1825_v26 }
0x1bdb   :  { %1826 = vrcp.f32 %v970_v27  ;;  %v982_v33 = vand.u32 2147483648, %v970_v27  ;;  %vm976_vm6 = vweird.f32 %v970_v27  ;;  %v980_v34 = vand.u32 2147483647, %v970_v27 }
0x1bdd   :  { %v983_v36 = vor.u32 1.1754944e-38, %v982_v33  ;;  %vm981_vm8 = vcmp.eq.f32.partialorder %v980_v34, 8.507059e+37 }
0x1bdf   :  { %1007 = vperm.xlu1 %1721, %v1005_v23  }
0x1be1   :  { %v1827_v28 = vpop.eup %1826 }
0x1be2   :  { %v972_v30 = vmul.f32 %v1827_v28, %v970_v27  ;;  %vm977_vm5 = vweird.f32 %v1827_v28 }
0x1be3   :  { %vm978_vm7 = vmor %vm976_vm6, %vm977_vm5 }
0x1be4   :  { %v973_v31 = vsub.f32 1.0, %v972_v30 }
0x1be6   :  { %v974_v32 = vmul.f32 %v1827_v28, %v973_v31 }
0x1be8   :  { %v975_v5 = vadd.f32 %v1827_v28, %v974_v32 }
0x1bea   :  { %v979_v35 = vsel %vm978_vm7, %v1827_v28, %v975_v5 }
0x1beb   :  { %v984_v38 = vsel %vm981_vm8, %v983_v36, %v979_v35  ;;  %vm1229_vm8 = vcmp.gt.s32.totalorder %v2214_v22, 15 }
0x1bec   :  { %v987_v41 = vmul.f32 %v984_v38, %v936_v40 }
0x1c49   :  { %v990_v37 = vpop.permute.xlu1 %989 }
0x1c4a   :  { %v992_v39 = vmul.f32 %v990_v37, %v984_v38 }
0x1c4c   :  { %994 = vrot.lane.b32.xlu2 %v992_v39, %s1901_s19 }
0x1c51   :  { %v1008_v45 = vpop.permute.xlu1 %1007 }
0x1c52   :  { %vm1009_vm9 = vcmp.eq.s32.totalorder %v1008_v45, 1 }
0x1ca6   :  { %v995_v42 = vpop.permute.xlu2 %994 }
0x1ca7   :  { %v997_v43 = vadd.f32 %v995_v42, %v987_v41 }
0x1ca9   :  { %1828 = vtanh.f32 %v997_v43  ;;  %v1011_v8 = vsel %vm1009_vm9, %v997_v43, %v936_v40 }
0x1caf   :  { %v1829_v44 = vpop.eup %1828 }
0x1cb0   :  { %1000 = vrot.lane.b32.xlu0 %v1829_v44, %s1903_s22 }
0x1d22   :  { %v1001_v46 = vpop.permute.xlu0 %1000 }
0x1d23   :  { %v1003_v47 = vmul.f32 %v1001_v46, %v984_v38 }
0x1d25   :  { %v1010_v48 = vsel %vm1009_vm9, %v1003_v47, %v935_v15 }
0x1d26   :  { %1015 = vrot.lane.b32.xlu2 %v1010_v48, %s1900_s18 }
0x1d80   :  { %v1016_v50 = vpop.permute.xlu2 %1015 }
0x1d81   :  { %v1018_v51 = vsel %vm38_vm0, %v1689_v49, %v1016_v50  ;;  %v1695_v50 = vld [vmem:[%s2361_s1 + $0x78] sm:$0x1f] }
0x1d82   :  { %1690 = vmatmul.msk.f32.vlgmr.msrb.gmra.mxu1 %vm43_vm1, %v1018_v51 }
0x1dff   :  { %v1039_v53 = vpop.f32.mrf.mxu1 }
0x1e00   :  { %v1040_v54 = vadd.f32 %v2193_v52, %v1039_v53 }
0x1e02   :  { %1830 = vtanh.f32 %v1040_v54  ;;  %v1691_v1 = vmul.f32 -1.442695, %v1040_v54 }
0x1e04   :  { %1832 = vpow2.f32 %v1691_v1  ;;  %v1230_v1 = vsel %vm1229_vm8, 1, %v1902_v24 }
0x1e08   :  { %v1831_v55 = vpop.eup %1830 }
0x1e09   :  { %1064 = vrot.lane.b32.xlu0 %v1831_v55, %s1900_s18 }
0x1e0a   :  { %v1833_v56 = vpop.eup %1832 }
0x1e0b   :  { %v1045_v3 = vadd.f32 1.0, %v1833_v56 }
0x1e0d   :  { %1834 = vrcp.f32 %v1045_v3  ;;  %v1057_v62 = vand.u32 2147483648, %v1045_v3  ;;  %vm1051_vm12 = vweird.f32 %v1045_v3  ;;  %v1055_v63 = vand.u32 2147483647, %v1045_v3 }
0x1e0f   :  { %v1058_v2 = vor.u32 1.1754944e-38, %v1057_v62  ;;  %vm1056_vm14 = vcmp.eq.f32.partialorder %v1055_v63, 8.507059e+37 }
0x1e11   :  { %1082 = vperm.xlu0 %1723, %v1080_v0  }
0x1e13   :  { %v1835_v57 = vpop.eup %1834 }
0x1e14   :  { %v1047_v58 = vmul.f32 %v1835_v57, %v1045_v3  ;;  %vm1052_vm11 = vweird.f32 %v1835_v57 }
0x1e15   :  { %vm1053_vm13 = vmor %vm1051_vm12, %vm1052_vm11 }
0x1e16   :  { %v1048_v59 = vsub.f32 1.0, %v1047_v58 }
0x1e18   :  { %v1049_v60 = vmul.f32 %v1835_v57, %v1048_v59 }
0x1e1a   :  { %v1050_v61 = vadd.f32 %v1835_v57, %v1049_v60 }
0x1e1c   :  { %v1054_v29 = vsel %vm1053_vm13, %v1835_v57, %v1050_v61  ;;  %vm1253_vm13 = vcmask 1043456  }
0x1e1d   :  { %v1059_v6 = vsel %vm1056_vm14, %v1058_v2, %v1054_v29 }
0x1e1e   :  { %v1062_v9 = vmul.f32 %v1059_v6, %v1011_v8 }
0x1e7b   :  { %v1065_v4 = vpop.permute.xlu0 %1064 }
0x1e7c   :  { %v1067_v7 = vmul.f32 %v1065_v4, %v1059_v6 }
0x1e7e   :  { %1069 = vrot.lane.b32.xlu1 %v1067_v7, %s1901_s19 }
0x1e83   :  { %v1083_v13 = vpop.permute.xlu0 %1082 }
0x1e84   :  { %vm1084_vm15 = vcmp.eq.s32.totalorder %v1083_v13, 1  ;;  %v1244_v13 = vld [vmem:[%s2364_s5 + $0x10] sm:$0xff] }
0x1ef0   :  { %v1070_v10 = vpop.permute.xlu1 %1069 }
0x1ef1   :  { %v1072_v11 = vadd.f32 %v1070_v10, %v1062_v9 }
0x1ef3   :  { %1836 = vtanh.f32 %v1072_v11  ;;  %v1086_v41 = vsel %vm1084_vm15, %v1072_v11, %v1011_v8  ;;  %v1246_v11 = vld [vmem:[%s2364_s5 + $0x20] sm:$0xf] }
0x1ef4   :  { %1698 = vmatpush.msk.msrb.mxu0 %vm1253_vm13, %v1246_v11  ;;  %1701 = vmatpush.msk.msra.mxu1 %vm1253_vm13, %v1246_v11 }
0x1ef5   :  { %1704 = vmatpush.msk.msrb.mxu2 %vm1253_vm13, %v1246_v11  ;;  %1707 = vmatpush.msk.msra.mxu3 %vm1253_vm13, %v1246_v11 }
0x1ef9   :  { %v1837_v12 = vpop.eup %1836 }
0x1efa   :  { %1075 = vrot.lane.b32.xlu2 %v1837_v12, %s1903_s22  ;;  %v1245_v12 = vld [vmem:[%s2364_s5 + $0x18] sm:$0xff] }
0x1efb   :  { %1269 = vmatpush.msrb.mxu0 %v1245_v12  ;;  %1336 = vmatpush.msra.mxu1 %v1245_v12 }
0x1efc   :  { %1403 = vmatpush.msrb.mxu2 %v1245_v12  ;;  %1470 = vmatpush.msra.mxu3 %v1245_v12 }
0x1efd   :  { %1270 = vmatpush.msrb.mxu0 %v1244_v13  ;;  %1337 = vmatpush.msra.mxu1 %v1244_v13 }
0x1efe   :  { %1404 = vmatpush.msrb.mxu2 %v1244_v13  ;;  %1471 = vmatpush.msra.mxu3 %v1244_v13 }
0x1f54   :  { %v1076_v14 = vpop.permute.xlu2 %1075 }
0x1f55   :  { %v1078_v15 = vmul.f32 %v1076_v14, %v1059_v6  ;;  %v1243_v14 = vld [vmem:[%s2364_s5 + $0x8] sm:$0xff] }
0x1f56   :  { %1271 = vmatpush.msrb.mxu0 %v1243_v14  ;;  %1338 = vmatpush.msra.mxu1 %v1243_v14 }
0x1f57   :  { %v1085_v16 = vsel %vm1084_vm15, %v1078_v15, %v1010_v48  ;;  %1405 = vmatpush.msrb.mxu2 %v1243_v14  ;;  %1472 = vmatpush.msra.mxu3 %v1243_v14  ;;  %vm1249_vm15 = vcmask 293888  }
0x1f58   :  { %1090 = vrot.lane.b32.xlu1 %v1085_v16, %s1900_s18 }
0x1fca   :  { %v1091_v18 = vpop.permute.xlu1 %1090 }
0x1fcb   :  { %v1093_v19 = vsel %vm38_vm0, %v1692_v17, %v1091_v18 }
0x1fcc   :  { %1693 = vmatmul.msk.f32.vlgmr.msra.gmra.mxu2 %vm43_vm1, %v1093_v19  ;;  %v1242_v19 = vld [vmem:[%s2364_s5] sm:$0xff] }
0x1fcd   :  { %1272 = vmatpush.msrb.mxu0 %v1242_v19  ;;  %1339 = vmatpush.msra.mxu1 %v1242_v19 }
0x1fce   :  { %1406 = vmatpush.msrb.mxu2 %v1242_v19  ;;  %1473 = vmatpush.msra.mxu3 %v1242_v19 }
0x1fcf   :  { %1710 = vmatpush.msk.msra.mxu0 %vm1253_vm13, %v1246_v11 }
0x1fd1   :  { %1537 = vmatpush.msra.mxu0 %v1245_v12 }
0x1fd3   :  { %1538 = vmatpush.msra.mxu0 %v1244_v13 }
0x1fd5   :  { %1539 = vmatpush.msra.mxu0 %v1243_v14 }
0x1fd7   :  { %1540 = vmatpush.msra.mxu0 %v1242_v19 }
0x204f   :  { %v1114_v20 = vpop.f32.mrf.mxu2 }
0x2050   :  { %v1115_v21 = vadd.f32 %v2193_v52, %v1114_v20  ;;  %v1236_v20 = vld [vmem:[%s2365_s2] sm:$0x1f]  ;;  %s1904_s2 = smov 116  }
0x2052   :  { %1838 = vtanh.f32 %v1115_v21  ;;  %v1694_v26 = vmul.f32 -1.442695, %v1115_v21 }
0x2054   :  { %1840 = vpow2.f32 %v1694_v26  ;;  %v2300_v26 = vld [vmem:[%s2366_s6] sm:$0x1] }
0x2058   :  { %v1839_v23 = vpop.eup %1838 }
0x2059   :  { %1139 = vrot.lane.b32.xlu2 %v1839_v23, %s1900_s18 }
0x205a   :  { %v1841_v27 = vpop.eup %1840 }
0x205b   :  { %v1120_v28 = vadd.f32 1.0, %v1841_v27 }
0x205d   :  { %1842 = vrcp.f32 %v1120_v28  ;;  %v1132_v34 = vand.u32 2147483648, %v1120_v28  ;;  %vm1126_vm4 = vweird.f32 %v1120_v28  ;;  %v1130_v35 = vand.u32 2147483647, %v1120_v28 }
0x205f   :  { %v1133_v37 = vor.u32 1.1754944e-38, %v1132_v34  ;;  %vm1131_vm6 = vcmp.eq.f32.partialorder %v1130_v35, 8.507059e+37 }
0x2061   :  { %1157 = vperm.xlu2 %1722, %v1155_v25  }
0x2063   :  { %v1843_v30 = vpop.eup %1842 }
0x2064   :  { %v1122_v31 = vmul.f32 %v1843_v30, %v1120_v28  ;;  %vm1127_vm3 = vweird.f32 %v1843_v30 }
0x2065   :  { %vm1128_vm5 = vmor %vm1126_vm4, %vm1127_vm3 }
0x2066   :  { %v1123_v32 = vsub.f32 1.0, %v1122_v31 }
0x2068   :  { %v1124_v5 = vmul.f32 %v1843_v30, %v1123_v32 }
0x206a   :  { %v1125_v33 = vadd.f32 %v1843_v30, %v1124_v5 }
0x206c   :  { %v1129_v36 = vsel %vm1128_vm5, %v1843_v30, %v1125_v33 }
0x206d   :  { %v1134_v39 = vsel %vm1131_vm6, %v1133_v37, %v1129_v36 }
0x206e   :  { %v1137_v42 = vmul.f32 %v1134_v39, %v1086_v41 }
0x20b3   :  { %v1140_v38 = vpop.permute.xlu2 %1139 }
0x20b4   :  { %v1142_v40 = vmul.f32 %v1140_v38, %v1134_v39 }
0x20b6   :  { %1144 = vrot.lane.b32.xlu0 %v1142_v40, %s1901_s19 }
0x20bb   :  { %v1158_v46 = vpop.permute.xlu2 %1157 }
0x20bc   :  { %vm1159_vm7 = vcmp.eq.s32.totalorder %v1158_v46, 1 }
0x2128   :  { %v1145_v43 = vpop.permute.xlu0 %1144 }
0x2129   :  { %v1147_v44 = vadd.f32 %v1145_v43, %v1137_v42 }
0x212b   :  { %1844 = vtanh.f32 %v1147_v44  ;;  %v1161_v6 = vsel %vm1159_vm7, %v1147_v44, %v1086_v41 }
0x2131   :  { %v1845_v45 = vpop.eup %1844 }
0x2132   :  { %1150 = vrot.lane.b32.xlu1 %v1845_v45, %s1903_s22 }
0x21a4   :  { %v1151_v47 = vpop.permute.xlu1 %1150 }
0x21a5   :  { %v1153_v48 = vmul.f32 %v1151_v47, %v1134_v39 }
0x21a7   :  { %v2250_v49 = vsel %vm1159_vm7, %v1153_v48, %v1085_v16 }
0x21a8   :  { %1165 = vrot.lane.b32.xlu0 %v2250_v49, %s1900_s18 }
0x221a   :  { %v1166_v51 = vpop.permute.xlu0 %1165 }
0x221b   :  { %v1168_v53 = vsel %vm38_vm0, %v1695_v50, %v1166_v51 }
0x221c   :  { %1696 = vmatmul.msk.f32.vlgmr.msrb.gmra.mxu3 %vm43_vm1, %v1168_v53 }
0x229f   :  { %v1189_v54 = vpop.f32.mrf.mxu3 }
0x22a0   :  { %v1190_v55 = vadd.f32 %v2193_v52, %v1189_v54 }
0x22a2   :  { %1846 = vtanh.f32 %v1190_v55  ;;  %v1697_v56 = vmul.f32 -1.442695, %v1190_v55 }
0x22a4   :  { %1848 = vpow2.f32 %v1697_v56 }
0x22a8   :  { %v1847_v0 = vpop.eup %1846 }
0x22a9   :  { %1214 = vrot.lane.b32.xlu1 %v1847_v0, %s1900_s18 }
0x22aa   :  { %v1849_v3 = vpop.eup %1848 }
0x22ab   :  { %v1195_v57 = vadd.f32 1.0, %v1849_v3 }
0x22ad   :  { %1850 = vrcp.f32 %v1195_v57  ;;  %v1207_v52 = vand.u32 2147483648, %v1195_v57  ;;  %vm1201_vm10 = vweird.f32 %v1195_v57  ;;  %v1205_v63 = vand.u32 2147483647, %v1195_v57 }
0x22af   :  { %v1208_v22 = vor.u32 1.1754944e-38, %v1207_v52  ;;  %vm1206_vm12 = vcmp.eq.f32.partialorder %v1205_v63, 8.507059e+37 }
0x22b1   :  { %1232 = vperm.xlu1 %1721, %v1230_v1  }
0x22b3   :  { %v1851_v58 = vpop.eup %1850 }
0x22b4   :  { %v1197_v59 = vmul.f32 %v1851_v58, %v1195_v57  ;;  %vm1202_vm9 = vweird.f32 %v1851_v58 }
0x22b5   :  { %vm1203_vm11 = vmor %vm1201_vm10, %vm1202_vm9 }
0x22b6   :  { %v1198_v60 = vsub.f32 1.0, %v1197_v59 }
0x22b8   :  { %v1199_v61 = vmul.f32 %v1851_v58, %v1198_v60 }
0x22ba   :  { %v1200_v62 = vadd.f32 %v1851_v58, %v1199_v61 }
0x22bc   :  { %v1204_v29 = vsel %vm1203_vm11, %v1851_v58, %v1200_v62 }
0x22bd   :  { %v1209_v2 = vsel %vm1206_vm12, %v1208_v22, %v1204_v29 }
0x22be   :  { %v1212_v7 = vmul.f32 %v1209_v2, %v1161_v6 }
0x231b   :  { %v1215_v24 = vpop.permute.xlu1 %1214 }
0x231c   :  { %v1217_v4 = vmul.f32 %v1215_v24, %v1209_v2 }
0x231e   :  { %1219 = vrot.lane.b32.xlu2 %v1217_v4, %s1901_s19 }
0x2323   :  { %v1233_v15 = vpop.permute.xlu1 %1232 }
0x2324   :  { %vm1234_vm14 = vcmp.eq.s32.totalorder %v1233_v15, 1 }
0x2378   :  { %v1220_v8 = vpop.permute.xlu2 %1219 }
0x2379   :  { %v1222_v9 = vadd.f32 %v1220_v8, %v1212_v7 }
0x237b   :  { %1852 = vtanh.f32 %v1222_v9 }
0x2381   :  { %v1853_v10 = vpop.eup %1852 }
0x2382   :  { %1225 = vrot.lane.b32.xlu0 %v1853_v10, %s1903_s22 }
0x23f4   :  { %v1226_v16 = vpop.permute.xlu0 %1225 }
0x23f5   :  { %v1228_v17 = vmul.f32 %v1226_v16, %v1209_v2 }
0x23f7   :  { %v1235_v18 = vsel %vm1234_vm14, %v1228_v17, %v2250_v49 }
0x23f8   :  { %1238 = vrot.lane.b32.xlu2 %v1235_v18, %s1900_s18 }
0x2452   :  { %v1239_v21 = vpop.permute.xlu2 %1238 }
0x2453   :  { %v2292_v23 = vsel %vm38_vm0, %v1236_v20, %v1239_v21 }
0x2454   :  { %v1248_v25 = vsel %vm43_vm1, %v2292_v23, 0.0 }
0x2455   :  { %1699 = vmatmul.msk.f32.vlgmr.msrb.gmra.mxu0 %vm1249_vm15, %v1248_v25 }
0x24d2   :  { %v1274_v27 = vpop.f32.mrf.mxu0 }
0x24d3   :  { %v1275_v28 = vadd.f32 %v1274_v27, %v2300_v26 }
0x24d5   :  { %1854 = vtanh.f32 %v1275_v28  ;;  %v1700_v31 = vmul.f32 -1.442695, %v1275_v28 }
0x24d7   :  { %1856 = vpow2.f32 %v1700_v31 }
0x24db   :  { %v1855_v30 = vpop.eup %1854 }
0x24dc   :  { %1299 = vrot.lane.b32.xlu0 %v1855_v30, %s1900_s18 }
0x24dd   :  { %v1857_v32 = vpop.eup %1856 }
0x24de   :  { %v1280_v5 = vadd.f32 1.0, %v1857_v32 }
0x24e0   :  { %1858 = vrcp.f32 %v1280_v5  ;;  %v1292_v38 = vand.u32 2147483648, %v1280_v5  ;;  %vm1286_vm3 = vweird.f32 %v1280_v5  ;;  %v1290_v39 = vand.u32 2147483647, %v1280_v5 }
0x24e2   :  { %v1293_v41 = vor.u32 1.1754944e-38, %v1292_v38  ;;  %vm1291_vm5 = vcmp.eq.f32.partialorder %v1290_v39, 8.507059e+37 }
0x24e6   :  { %v1859_v33 = vpop.eup %1858 }
0x24e7   :  { %v1282_v34 = vmul.f32 %v1859_v33, %v1280_v5  ;;  %vm1287_vm2 = vweird.f32 %v1859_v33 }
0x24e8   :  { %vm1288_vm4 = vmor %vm1286_vm3, %vm1287_vm2  ;;  %vm1591_vm2 = vcmask 1040384   ;;  %vm1593_vm3 = vcmask 1041408  }
0x24e9   :  { %v1283_v35 = vsub.f32 1.0, %v1282_v34 }
0x24eb   :  { %v1284_v36 = vmul.f32 %v1859_v33, %v1283_v35 }
0x24ed   :  { %v1285_v37 = vadd.f32 %v1859_v33, %v1284_v36 }
0x24ef   :  { %v1289_v40 = vsel %vm1288_vm4, %v1859_v33, %v1285_v37 }
0x24f0   :  { %v1294_v43 = vsel %vm1291_vm5, %v1293_v41, %v1289_v40 }
0x24f1   :  { %v1297_v45 = vmul.f32 0.0, %v1294_v43 }
0x254e   :  { %v1300_v42 = vpop.permute.xlu0 %1299 }
0x254f   :  { %v1302_v44 = vmul.f32 %v1300_v42, %v1294_v43 }
0x2551   :  { %1304 = vrot.lane.b32.xlu1 %v1302_v44, %s1901_s19 }
0x25c3   :  { %v1305_v46 = vpop.permute.xlu1 %1304 }
0x25c4   :  { %v1307_v47 = vadd.f32 %v1305_v46, %v1297_v45 }
0x25c6   :  { %1860 = vtanh.f32 %v1307_v47 }
0x25cc   :  { %v1861_v48 = vpop.eup %1860 }
0x25cd   :  { %1310 = vrot.lane.b32.xlu2 %v1861_v48, %s1903_s22 }
0x2627   :  { %v1311_v49 = vpop.permute.xlu2 %1310 }
0x2628   :  { %v2306_v50 = vmul.f32 %v1311_v49, %v1294_v43 }
0x262a   :  { %v1315_v51 = vrot.slane %v2306_v50, 7 }
0x262c   :  { %1316 = vrot.lane.b32.xlu0 %v1315_v51, %s1904_s2 }
0x269e   :  { %v1317_v53 = vpop.permute.xlu0 %1316 }
0x269f   :  { %v1319_v54 = vsel %vm43_vm1, %v2292_v23, %v1317_v53 }
0x26a0   :  { %v1321_v55 = vrot.slane %v1319_v54, 1 }
0x26a2   :  { %1702 = vmatmul.msk.f32.vlgmr.msra.gmra.mxu1 %vm1249_vm15, %v1321_v55 }
0x271f   :  { %v1341_v0 = vpop.f32.mrf.mxu1 }
0x2720   :  { %v1342_v1 = vadd.f32 %v1341_v0, %v2300_v26 }
0x2722   :  { %1862 = vtanh.f32 %v1342_v1  ;;  %v1703_v3 = vmul.f32 -1.442695, %v1342_v1 }
0x2724   :  { %1864 = vpow2.f32 %v1703_v3 }
0x2728   :  { %v1863_v56 = vpop.eup %1862 }
0x2729   :  { %1366 = vrot.lane.b32.xlu1 %v1863_v56, %s1900_s18 }
0x272a   :  { %v1865_v57 = vpop.eup %1864 }
0x272b   :  { %v1347_v58 = vadd.f32 1.0, %v1865_v57 }
0x272d   :  { %1866 = vrcp.f32 %v1347_v58  ;;  %v1359_v63 = vand.u32 2147483648, %v1347_v58  ;;  %vm1353_vm7 = vweird.f32 %v1347_v58  ;;  %v1357_v29 = vand.u32 2147483647, %v1347_v58 }
0x272f   :  { %v1360_v24 = vor.u32 1.1754944e-38, %v1359_v63  ;;  %vm1358_vm9 = vcmp.eq.f32.partialorder %v1357_v29, 8.507059e+37 }
0x2733   :  { %v1867_v59 = vpop.eup %1866 }
0x2734   :  { %v1349_v60 = vmul.f32 %v1867_v59, %v1347_v58  ;;  %vm1354_vm6 = vweird.f32 %v1867_v59 }
0x2735   :  { %vm1355_vm8 = vmor %vm1353_vm7, %vm1354_vm6 }
0x2736   :  { %v1350_v61 = vsub.f32 1.0, %v1349_v60 }
0x2738   :  { %v1351_v62 = vmul.f32 %v1867_v59, %v1350_v61 }
0x273a   :  { %v1352_v52 = vadd.f32 %v1867_v59, %v1351_v62 }
0x273c   :  { %v1356_v22 = vsel %vm1355_vm8, %v1867_v59, %v1352_v52  ;;  %vm1595_vm8 = vcmask 1042432  }
0x273d   :  { %v1361_v4 = vsel %vm1358_vm9, %v1360_v24, %v1356_v22 }
0x273e   :  { %v1364_v7 = vmul.f32 %v1361_v4, %v1307_v47 }
0x279b   :  { %v1367_v2 = vpop.permute.xlu1 %1366 }
0x279c   :  { %v1369_v6 = vmul.f32 %v1367_v2, %v1361_v4 }
0x279e   :  { %1371 = vrot.lane.b32.xlu2 %v1369_v6, %s1901_s19 }
0x27f8   :  { %v1372_v8 = vpop.permute.xlu2 %1371 }
0x27f9   :  { %v1374_v9 = vadd.f32 %v1372_v8, %v1364_v7 }
0x27fb   :  { %1868 = vtanh.f32 %v1374_v9 }
0x2801   :  { %v1869_v10 = vpop.eup %1868 }
0x2802   :  { %1377 = vrot.lane.b32.xlu0 %v1869_v10, %s1903_s22 }
0x2874   :  { %v1378_v11 = vpop.permute.xlu0 %1377 }
0x2875   :  { %v1380_v12 = vmul.f32 %v1378_v11, %v1361_v4 }
0x2877   :  { %v1382_v13 = vrot.slane %v1380_v12, 6  ;;  %v1582_v43 = vrot.slane %v1380_v12, 7 }
0x2879   :  { %1383 = vrot.lane.b32.xlu1 %v1382_v13, %s1904_s2  ;;  %v1592_v48 = vsel %vm1591_vm2, %v2306_v50, %v1582_v43 }
0x28eb   :  { %v1384_v14 = vpop.permute.xlu1 %1383 }
0x28ec   :  { %v1386_v15 = vsel %vm43_vm1, %v2292_v23, %v1384_v14 }
0x28ed   :  { %v1388_v16 = vrot.slane %v1386_v15, 2 }
0x28ef   :  { %1705 = vmatmul.msk.f32.vlgmr.msrb.gmra.mxu2 %vm1249_vm15, %v1388_v16 }
0x2972   :  { %v1408_v17 = vpop.f32.mrf.mxu2 }
0x2973   :  { %v1409_v18 = vadd.f32 %v1408_v17, %v2300_v26 }
0x2975   :  { %1870 = vtanh.f32 %v1409_v18  ;;  %v1706_v20 = vmul.f32 -1.442695, %v1409_v18 }
0x2977   :  { %1872 = vpow2.f32 %v1706_v20 }
0x297b   :  { %v1871_v19 = vpop.eup %1870 }
0x297c   :  { %1433 = vrot.lane.b32.xlu2 %v1871_v19, %s1900_s18 }
0x297d   :  { %v1873_v21 = vpop.eup %1872 }
0x297e   :  { %v1414_v25 = vadd.f32 1.0, %v1873_v21 }
0x2980   :  { %1874 = vrcp.f32 %v1414_v25  ;;  %v1426_v5 = vand.u32 2147483648, %v1414_v25  ;;  %vm1420_vm11 = vweird.f32 %v1414_v25  ;;  %v1424_v33 = vand.u32 2147483647, %v1414_v25 }
0x2982   :  { %v1427_v35 = vor.u32 1.1754944e-38, %v1426_v5  ;;  %vm1425_vm14 = vcmp.eq.f32.partialorder %v1424_v33, 8.507059e+37 }
0x2986   :  { %v1875_v27 = vpop.eup %1874 }
0x2987   :  { %v1416_v28 = vmul.f32 %v1875_v27, %v1414_v25  ;;  %vm1421_vm10 = vweird.f32 %v1875_v27 }
0x2988   :  { %vm1422_vm12 = vmor %vm1420_vm11, %vm1421_vm10  ;;  %vm1632_vm11 = vcmask 20480  }
0x2989   :  { %v1417_v30 = vsub.f32 1.0, %v1416_v28 }
0x298b   :  { %v1418_v31 = vmul.f32 %v1875_v27, %v1417_v30 }
0x298d   :  { %v1419_v32 = vadd.f32 %v1875_v27, %v1418_v31 }
0x298f   :  { %v1423_v34 = vsel %vm1422_vm12, %v1875_v27, %v1419_v32 }
0x2990   :  { %v1428_v37 = vsel %vm1425_vm14, %v1427_v35, %v1423_v34 }
0x2991   :  { %v1431_v39 = vmul.f32 %v1428_v37, %v1374_v9 }
0x29d6   :  { %v1434_v36 = vpop.permute.xlu2 %1433 }
0x29d7   :  { %v1436_v38 = vmul.f32 %v1434_v36, %v1428_v37 }
0x29d9   :  { %1438 = vrot.lane.b32.xlu0 %v1436_v38, %s1901_s19 }
0x2a4b   :  { %v1439_v40 = vpop.permute.xlu0 %1438 }
0x2a4c   :  { %v1441_v41 = vadd.f32 %v1439_v40, %v1431_v39 }
0x2a4e   :  { %1876 = vtanh.f32 %v1441_v41 }
0x2a54   :  { %v1877_v42 = vpop.eup %1876 }
0x2a55   :  { %1444 = vrot.lane.b32.xlu1 %v1877_v42, %s1903_s22  ;;  %v1598_v42 = vld [vmem:[%s2367_s7] sm:$0xff] }
0x2ac7   :  { %v1445_v44 = vpop.permute.xlu1 %1444 }
0x2ac8   :  { %v1447_v45 = vmul.f32 %v1445_v44, %v1428_v37 }
0x2aca   :  { %v1449_v46 = vrot.slane %v1447_v45, 5  ;;  %v1584_v47 = vrot.slane %v1447_v45, 6 }
0x2acc   :  { %1450 = vrot.lane.b32.xlu2 %v1449_v46, %s1904_s2  ;;  %v1594_v49 = vsel %vm1593_vm3, %v1592_v48, %v1584_v47  ;;  %v1725_v48 = vld [vmem:[%s2368_s8] ss:$0 sm:$0xff] }
0x2b26   :  { %v1451_v51 = vpop.permute.xlu2 %1450 }
0x2b27   :  { %v1453_v53 = vsel %vm43_vm1, %v2292_v23, %v1451_v51 }
0x2b28   :  { %v1455_v54 = vrot.slane %v1453_v53, 3 }
0x2b2a   :  { %1708 = vmatmul.msk.f32.vlgmr.msra.gmra.mxu3 %vm1249_vm15, %v1455_v54 }
0x2bad   :  { %v1475_v55 = vpop.f32.mrf.mxu3 }
0x2bae   :  { %v1476_v0 = vadd.f32 %v1475_v55, %v2300_v26 }
0x2bb0   :  { %1878 = vtanh.f32 %v1476_v0  ;;  %v1709_v56 = vmul.f32 -1.442695, %v1476_v0 }
0x2bb2   :  { %1880 = vpow2.f32 %v1709_v56 }
0x2bb6   :  { %v1879_v1 = vpop.eup %1878 }
0x2bb7   :  { %1500 = vrot.lane.b32.xlu0 %v1879_v1, %s1900_s18 }
0x2bb8   :  { %v1881_v50 = vpop.eup %1880 }
0x2bb9   :  { %v1481_v3 = vadd.f32 1.0, %v1881_v50 }
0x2bbb   :  { %1882 = vrcp.f32 %v1481_v3  ;;  %v1493_v62 = vand.u32 2147483648, %v1481_v3  ;;  %vm1487_vm5 = vweird.f32 %v1481_v3  ;;  %v1491_v52 = vand.u32 2147483647, %v1481_v3 }
0x2bbd   :  { %v1494_v29 = vor.u32 1.1754944e-38, %v1493_v62  ;;  %vm1492_vm7 = vcmp.eq.f32.partialorder %v1491_v52, 8.507059e+37 }
0x2bc1   :  { %v1883_v57 = vpop.eup %1882 }
0x2bc2   :  { %v1483_v58 = vmul.f32 %v1883_v57, %v1481_v3  ;;  %vm1488_vm4 = vweird.f32 %v1883_v57 }
0x2bc3   :  { %vm1489_vm6 = vmor %vm1487_vm5, %vm1488_vm4 }
0x2bc4   :  { %v1484_v59 = vsub.f32 1.0, %v1483_v58 }
0x2bc6   :  { %v1485_v60 = vmul.f32 %v1883_v57, %v1484_v59 }
0x2bc8   :  { %v1486_v61 = vadd.f32 %v1883_v57, %v1485_v60 }
0x2bca   :  { %v1490_v63 = vsel %vm1489_vm6, %v1883_v57, %v1486_v61 }
0x2bcb   :  { %v1495_v24 = vsel %vm1492_vm7, %v1494_v29, %v1490_v63 }
0x2bcc   :  { %v1498_v4 = vmul.f32 %v1495_v24, %v1441_v41  ;;  %v1599_v41 = vld [vmem:[%s2367_s7 + $0x8] sm:$0xf] }
0x2bcd   :  { %1713 = vmatpush.msk.msrb.mxu1 %vm1253_vm13, %v1599_v41 }
0x2bcf   :  { %1627 = vmatpush.msrb.mxu1 %v1598_v42 }
0x2c29   :  { %v1501_v22 = vpop.permute.xlu0 %1500 }
0x2c2a   :  { %v1503_v2 = vmul.f32 %v1501_v22, %v1495_v24 }
0x2c2c   :  { %1505 = vrot.lane.b32.xlu1 %v1503_v2, %s1901_s19 }
0x2c9e   :  { %v1506_v6 = vpop.permute.xlu1 %1505 }
0x2c9f   :  { %v1508_v7 = vadd.f32 %v1506_v6, %v1498_v4 }
0x2ca1   :  { %1884 = vtanh.f32 %v1508_v7 }
0x2ca7   :  { %v1885_v8 = vpop.eup %1884 }
0x2ca8   :  { %1511 = vrot.lane.b32.xlu2 %v1885_v8, %s1903_s22 }
0x2d02   :  { %v1512_v9 = vpop.permute.xlu2 %1511 }
0x2d03   :  { %v1514_v10 = vmul.f32 %v1512_v9, %v1495_v24 }
0x2d05   :  { %v1516_v11 = vrot.slane %v1514_v10, 4  ;;  %v1586_v12 = vrot.slane %v1514_v10, 5 }
0x2d07   :  { %1517 = vrot.lane.b32.xlu0 %v1516_v11, %s1904_s2  ;;  %v1596_v13 = vsel %vm1595_vm8, %v1594_v49, %v1586_v12 }
0x2d79   :  { %v1518_v14 = vpop.permute.xlu0 %1517 }
0x2d7a   :  { %v1520_v15 = vsel %vm43_vm1, %v2292_v23, %v1518_v14 }
0x2d7b   :  { %v1522_v16 = vrot.slane %v1520_v15, 4 }
0x2d7d   :  { %1711 = vmatmul.msk.f32.vlgmr.msra.gmra.mxu0 %vm1249_vm15, %v1522_v16 }
0x2dfa   :  { %v1542_v17 = vpop.f32.mrf.mxu0 }
0x2dfb   :  { %v1543_v18 = vadd.f32 %v1542_v17, %v2300_v26 }
0x2dfd   :  { %1886 = vtanh.f32 %v1543_v18  ;;  %v1712_v20 = vmul.f32 -1.442695, %v1543_v18 }
0x2dff   :  { %1888 = vpow2.f32 %v1712_v20 }
0x2e03   :  { %v1887_v19 = vpop.eup %1886 }
0x2e04   :  { %1567 = vrot.lane.b32.xlu1 %v1887_v19, %s1900_s18 }
0x2e05   :  { %v1889_v21 = vpop.eup %1888 }
0x2e06   :  { %v1548_v25 = vadd.f32 1.0, %v1889_v21 }
0x2e08   :  { %1890 = vrcp.f32 %v1548_v25  ;;  %v1560_v32 = vand.u32 2147483648, %v1548_v25  ;;  %vm1554_vm15 = vweird.f32 %v1548_v25  ;;  %v1558_v5 = vand.u32 2147483647, %v1548_v25 }
0x2e0a   :  { %v1561_v33 = vor.u32 1.1754944e-38, %v1560_v32  ;;  %vm1559_vm10 = vcmp.eq.f32.partialorder %v1558_v5, 8.507059e+37 }
0x2e0e   :  { %v1891_v27 = vpop.eup %1890 }
0x2e0f   :  { %v1550_v28 = vmul.f32 %v1891_v27, %v1548_v25  ;;  %vm1555_vm1 = vweird.f32 %v1891_v27 }
0x2e10   :  { %vm1556_vm9 = vmor %vm1554_vm15, %vm1555_vm1 }
0x2e11   :  { %v1551_v30 = vsub.f32 1.0, %v1550_v28 }
0x2e13   :  { %v1552_v31 = vmul.f32 %v1891_v27, %v1551_v30 }
0x2e15   :  { %v1553_v23 = vadd.f32 %v1891_v27, %v1552_v31 }
0x2e17   :  { %v1557_v26 = vsel %vm1556_vm9, %v1891_v27, %v1553_v23 }
0x2e18   :  { %v1562_v35 = vsel %vm1559_vm10, %v1561_v33, %v1557_v26 }
0x2e19   :  { %v1565_v37 = vmul.f32 %v1562_v35, %v1508_v7 }
0x2e76   :  { %v1568_v34 = vpop.permute.xlu1 %1567 }
0x2e77   :  { %v1570_v36 = vmul.f32 %v1568_v34, %v1562_v35 }
0x2e79   :  { %1572 = vrot.lane.b32.xlu2 %v1570_v36, %s1901_s19  ;;  %s1905_s19 = smov 92  }
0x2ed3   :  { %v1573_v38 = vpop.permute.xlu2 %1572 }
0x2ed4   :  { %v1575_v39 = vadd.f32 %v1573_v38, %v1565_v37 }
0x2ed6   :  { %1892 = vtanh.f32 %v1575_v39 }
0x2edc   :  { %v1893_v40 = vpop.eup %1892 }
0x2edd   :  { %1578 = vrot.lane.b32.xlu0 %v1893_v40, %s1903_s22 }
0x2f4f   :  { %v1579_v43 = vpop.permute.xlu0 %1578 }
0x2f50   :  { %v1581_v44 = vmul.f32 %v1579_v43, %v1562_v35 }
0x2f52   :  { %v1589_v45 = vrot.slane %v1581_v44, 4 }
0x2f54   :  { %v1597_v46 = vsel %vm1253_vm13, %v1596_v13, %v1589_v45 }
0x2f55   :  { %1605 = vrot.lane.b32.xlu1 %v1597_v46, %s1905_s19 }
0x2fc7   :  { %v1606_v47 = vpop.permute.xlu1 %1605 }
0x2fc8   :  { %1714 = vmatmul.msk.f32.vlgmr.msrb.gmra.mxu1 %vm38_vm0, %v1606_v47 }
0x3045   :  { %v1629_v49 = vpop.f32.mrf.mxu1 }
0x3046   :  { %v1630_v51 = vadd.f32 %v1725_v48, %v1629_v49 }
0x3048   :  { %v1633_v53 = vsel %vm1632_vm11, %v1630_v51, -inf }
0x3049   :  { %1634 = vmax.xlane.f32.xlu2 %v1633_v53 }
0x30bc   :  { %v1635_v54 = vpop.xlane.xlu2 %1634 }
0x30bd   :  { %v1636_v55 = vsub.f32 %v1630_v51, %v1635_v54 }
0x30bf   :  { %v1637_v0 = vmul.f32 1.442695, %v1636_v55 }
0x30c1   :  { %1894 = vpow2.f32 %v1637_v0 }
0x30c7   :  { %v1895_v1 = vpop.eup %1894 }
0x30c8   :  { %v1639_v56 = vsel %vm1632_vm11, %v1895_v1, 0.0 }
0x30c9   :  { %1640 = vadd.xlane.f32.xlu0 %v1639_v56 }
0x313c   :  { %v1641_v50 = vpop.xlane.xlu0 %1640 }
0x313d   :  { %1896 = vlog2.f32 %v1641_v50 }
0x3143   :  { %v1897_v3 = vpop.eup %1896 }
0x3144   :  { %v1643_v57 = vmul.f32 0.6931472, %v1897_v3 }
0x3146   :  { %v1644_v58 = vadd.f32 %v1643_v57, %v1635_v54 }
0x3148   :  { %v1645_v59 = vsub.f32 %v1630_v51, %v1644_v58 }
0x314a   :  { %1646 = vst.msk [vmem:[%s2369_s9] sm:$0x1f] %vm1632_vm11, %v1645_v59 }

</bundles_post_ra>
